<compile_context>
chip_gen: v7x
topology: tpu7x:2x2x1
jax: 0.10.0
libtpu: 0.0.40
codegen_flags: <defaults>
</compile_context>

<pallas_src>
import functools

import numpy as np
import jax
import jax.numpy as jnp
from jax.experimental import pallas as pl
from jax.experimental.pallas import tpu as pltpu

# ----------------------------- configuration ------------------------------
H = 32          # decoder_hidden_size == encoder_hidden_size
E = 32          # decoder_embedding_size (must equal hidden size for concat)
B = 2           # batch
S1 = 8          # source length
S2 = 2          # number of variables
OP_NUM = 4
CONST_NUM = 2
VAR_START = OP_NUM + CONST_NUM          # 6
O_CAND = VAR_START + S2                 # op + const + var candidates = 8
T_TGT = 5                               # target length
NEG = -1e12

assert E == H, "GTS tree decoder requires decoder_embedding_size == hidden_size"


# ------------------------- host-side schedule builder ----------------------
def _build_schedule(tgt, op_num):
    """Simulate _forward_train's tree-stack bookkeeping on the host.

    The structure (which slot is on top of which stack at each step, which
    merges happen) depends only on the integer target sequence, so it can be
    precomputed and passed to the fused kernel.

    Hidden slots  : 0 = problem_output, 1 = padding(zeros),
                    2+2t = l_child(step t), 3+2t = r_child(step t)
    Embedding slots: 0 = None(zeros), 1+t = embedding pushed at step t
                    (token embedding if op, merged subtree embedding if number)

    Returns:
      sched  int32[T*B*K]  flattened (t, b, field); fields per (t,b):
             [cur_slot, left_slot, (op_slot, sub_slot) * maxm]
      masks  f32[T, B, 3+maxm] with columns
             [has_left, is_op, active(stack nonempty), (j < n_merge) * maxm]
      maxm   max merges in a single step
    """
    tgt = np.asarray(tgt)
    bsz, tlen = tgt.shape
    recs = [[None] * tlen for _ in range(bsz)]
    max_merge = 0
    for b in range(bsz):
        node_stack = [0]          # hidden-slot indices; 0 = init hidden
        es = []                   # embeddings stack: (emb_slot, terminal)
        left = None               # emb slot of left-subtree embedding or None
        for t in range(tlen):
            rec = dict(cur=node_stack[-1] if node_stack else 1,
                       has_left=0 if left is None else 1,
                       left=0 if left is None else left,
                       is_op=0, active=1 if node_stack else 0, merges=[])
            recs[b][t] = rec
            if not node_stack:                 # empty stack: predict with padding,
                left = None                    # skip all state updates (reference)
                continue
            node_stack.pop()
            tid = int(tgt[b, t])
            if tid < op_num:
                node_stack.append(3 + 2 * t)   # right child
                node_stack.append(2 + 2 * t)   # left child (top)
                es.append((1 + t, False))      # token embedding pushed
                rec["is_op"] = 1
            else:
                while es and es[-1][1]:
                    sub_slot, _ = es.pop()
                    op_slot, _ = es.pop()
                    rec["merges"].append((op_slot, sub_slot))
                es.append((1 + t, True))       # merged subtree embedding pushed
                max_merge = max(max_merge, len(rec["merges"]))
            left = es[-1][0] if (es and es[-1][1]) else None

    maxm = max_merge
    K = 2 + 2 * maxm
    sched = np.zeros((tlen, bsz, K), np.int32)
    masks = np.zeros((tlen, bsz, 3 + maxm), np.float32)
    for b in range(bsz):
        for t in range(tlen):
            rec = recs[b][t]
            sched[t, b, 0] = rec["cur"]
            sched[t, b, 1] = rec["left"]
            masks[t, b, 0] = rec["has_left"]
            masks[t, b, 1] = rec["is_op"]
            masks[t, b, 2] = rec["active"]
            for j, (o, s) in enumerate(rec["merges"]):
                sched[t, b, 2 + 2 * j] = o
                sched[t, b, 3 + 2 * j] = s
                masks[t, b, 3 + j] = 1.0
    return sched.reshape(-1), masks, maxm


# ------------------------------ fused kernel --------------------------------
def _make_fused_kernel(bsz, h, tlen, maxm, nslot_h, nslot_e):
    K = 2 + 2 * maxm
    f32 = jnp.float32

    def mm(x, w):
        return jnp.dot(x, w, preferred_element_type=f32)

    def sig(x):                       # exact sigmoid (gates): keeps numerics tight
        return 1.0 / (1.0 + jnp.exp(-x))

    def kernel(sched_ref,
               prob_ref, enc_ref, eenc_ref, eemb_ref, smask_ref, cmask_ref,
               mask_ref, wslab_ref, bslab_ref, tok_ref, cand_ref,
               score_ref,
               hid_ref, emb_ref, xbuf_ref):
        # -------------------- one-time state init --------------------
        hid_ref[...] = jnp.zeros_like(hid_ref)
        emb_ref[...] = jnp.zeros_like(emb_ref)
        for b in range(bsz):
            r0 = b * nslot_h
            hid_ref[r0:r0 + 1, :] = prob_ref[b:b + 1, :]

        # ------------- hoisted loop-invariant loads (once per call) -------------
        w_pred = wslab_ref[0:2 * h, 0:4 * h]           # [2H, 4H] prediction l/lg/r/rg
        w_gen = wslab_ref[2 * h:5 * h, :]              # [3H, 4H+E] generate + score leaf
        w_mrg = wslab_ref[5 * h:8 * h, 0:2 * h]        # [3H, 2H] merge / merge_g
        w_ah = wslab_ref[8 * h:9 * h, 0:h]             # [H, H] attention hidden proj
        ball = bslab_ref[...]                          # [4, 4H+E]
        b_pred = ball[0:1, 0:4 * h]
        b_gen = ball[1:2, :]
        b_mrg = ball[2:3, 0:2 * h]
        b_attn = ball[3:4, 0:h]
        v_attn = ball[3:4, h:2 * h]
        v_scr = ball[3:4, 2 * h:3 * h]
        b_va = ball[3:4, 3 * h:3 * h + 1]
        b_vs = ball[3:4, 3 * h + 1:3 * h + 2]
        enc = enc_ref[...]                             # [B, S1, H]
        eenc = eenc_ref[...]                           # [B, S1, H]  enc @ Wa_e (hoisted)
        eemb = eemb_ref[...]                           # [B, O,  E]  emb_all @ Ws_e (hoisted)
        smask = smask_ref[...] > 0.5
        cmask = cmask_ref[...] > 0.5

        # Statically unrolled teacher-forced decode loop: the whole recurrence
        # lives in one kernel invocation -> no per-grid-step pipeline overhead.
        for t in range(tlen):
            base_t = t * bsz * K
            mk = mask_ref[t]                           # [B, 3+maxm] {0,1} flags
            has_l = mk[:, 0:1]
            is_op = mk[:, 1:2]
            active = mk[:, 2:3]

            # ---- gather [left_subtree_emb | current_hidden] via staging buffer ----
            for b in range(bsz):
                cslot = sched_ref[base_t + b * K + 0]
                lslot = sched_ref[base_t + b * K + 1]
                xbuf_ref[b:b + 1, 0:h] = emb_ref[pl.ds(b * nslot_e + lslot, 1), :]
                xbuf_ref[b:b + 1, h:2 * h] = hid_ref[pl.ds(b * nslot_h + cslot, 1), :]
            x_pred = xbuf_ref[:, 0:2 * h]                                   # [B, 2H]

            # ---- Prediction: l/lg/r/rg fused into one [B,2H]x[2H,4H] dot ----
            pre = mm(x_pred, w_pred) + b_pred
            node_l = jnp.tanh(pre[:, 0:h]) * sig(pre[:, h:2 * h])
            node_r = jnp.tanh(pre[:, 2 * h:3 * h]) * sig(pre[:, 3 * h:4 * h])
            node = node_l + has_l * (node_r - node_l)                       # [B, H]

            # ---- attention over encoder outputs (enc-side projection hoisted) ----
            e_hid = mm(node, w_ah) + b_attn                                 # [B, H]
            energy = jnp.tanh(eenc + e_hid[:, None, :])                     # [B, S1, H]
            att = jnp.sum(energy * v_attn[:, None, :], axis=-1) + b_va      # [B, S1]
            att = jnp.where(smask, att, NEG)
            att = jnp.exp(att - jnp.max(att, axis=-1, keepdims=True))
            att = att * pl.reciprocal(jnp.sum(att, axis=-1, keepdims=True),
                                      approx=True)
            ctx = jnp.sum(att[:, :, None] * enc, axis=1)                    # [B, H]

            # ---- GenerateNode + Score-leaf fused: one [B,3H]x[3H,4H+E] dot ----
            tok = tok_ref[t]                                                # [B, E]
            g = mm(jnp.concatenate([node, ctx, tok], axis=1), w_gen) + b_gen
            l_child = jnp.tanh(g[:, 0:h]) * sig(g[:, h:2 * h])
            r_child = jnp.tanh(g[:, 2 * h:3 * h]) * sig(g[:, 3 * h:4 * h])
            leaf = g[:, 4 * h:5 * h]                                        # [B, E]

            # ---- candidate scoring (emb-side projection hoisted) ----
            s = jnp.tanh(eemb + leaf[:, None, :])                           # [B, O, E]
            score = jnp.sum(s * v_scr[:, None, :], axis=-1) + b_vs          # [B, O]
            score_ref[t] = jnp.where(cmask, score, NEG)

            # ---- tree-stack updates (structure precomputed on the host) ----
            # inactive (empty-stack) samples keep zeros -> matches the reference
            # "skip" because untouched slots are zero-initialized and unique per t.
            l_store = l_child * active
            r_store = r_child * active
            for b in range(bsz):
                rl = b * nslot_h + 2 + 2 * t
                hid_ref[rl:rl + 1, :] = l_store[b:b + 1, :]
                hid_ref[rl + 1:rl + 2, :] = r_store[b:b + 1, :]

            # embeddings stack: batched merges, then push (token emb if op, else merged)
            cur_num = cand_ref[t]                                           # [B, E]
            for j in range(maxm):
                for b in range(bsz):
                    oslot = sched_ref[base_t + b * K + 2 + 2 * j]
                    sslot = sched_ref[base_t + b * K + 3 + 2 * j]
                    xbuf_ref[b:b + 1, 0:h] = emb_ref[pl.ds(b * nslot_e + oslot, 1), :]
                    xbuf_ref[b:b + 1, h:2 * h] = emb_ref[pl.ds(b * nslot_e + sslot, 1), :]
                xbuf_ref[:, 2 * h:3 * h] = cur_num
                m = mm(xbuf_ref[...], w_mrg) + b_mrg                        # [B, 2H]
                merged = jnp.tanh(m[:, 0:h]) * sig(m[:, h:2 * h])
                mflag = mk[:, 3 + j:4 + j]                                  # j < n_merge
                cur_num = cur_num + mflag * (merged - cur_num)
            new_e = (cur_num + is_op * (tok - cur_num)) * active
            for b in range(bsz):
                re_ = b * nslot_e + t + 1
                emb_ref[re_:re_ + 1, :] = new_e[b:b + 1, :]

    return kernel


# ------------------------------ device forward ------------------------------
@functools.partial(jax.jit, static_argnames=("var_start",))
def _device_forward(p, sched, masks, tok_ids, tgt, enc, prob, len_source,
                    var_positions, len_var, *, var_start):
    bsz, s1, h = enc.shape
    tlen = tgt.shape[1]
    emb_table = p["emb_table"]
    e = emb_table.shape[1]
    maxm = masks.shape[-1] - 3

    # variable embeddings gathered from encoder outputs (get_var_encoder_outputs)
    vidx = jnp.broadcast_to(var_positions[:, :, None], var_positions.shape + (h,))
    var_emb = jnp.take_along_axis(enc, vidx, axis=1)                   # [B, S2, H]
    o_cand = var_start + var_emb.shape[1]

    source_mask = (jnp.arange(s1)[None, :] < len_source[:, None]).astype(jnp.float32)
    candi_mask = (jnp.arange(o_cand)[None, :] <
                  (len_var + var_start)[:, None]).astype(jnp.float32)

    emb_all = jnp.concatenate(
        [jnp.broadcast_to(emb_table[None], (bsz,) + emb_table.shape), var_emb], axis=1)

    # loop-invariant projections hoisted out of the decode loop (computed once)
    e_enc = jnp.einsum("bsh,hf->bsf", enc, p["wa_e"])                  # attn enc-side
    e_emb = jnp.einsum("boe,ef->bof", emb_all, p["ws_e"])              # score emb-side

    # per-step token / candidate embeddings, gathered once: [T, B, E]
    # tok_ids = clamp(target, max=op_num-1) reproduces GenerateNode's torch.clamp.
    tok_emb = jnp.transpose(emb_table[tok_ids], (1, 0, 2))
    cidx = jnp.broadcast_to(tgt[:, :, None], (bsz, tlen, e))
    cand_emb = jnp.transpose(jnp.take_along_axis(emb_all, cidx, axis=1), (1, 0, 2))

    # ---- pack every weight into one lane-padded slab (one prologue DMA each) ----
    lanes = 4 * h + e                                                   # 160

    def pad_lanes(w):
        return jnp.pad(w, ((0, 0), (0, lanes - w.shape[1])))

    # Prediction: columns [l, lg, r, rg]; zero rows for `left` in the l/lg block.
    w_pred = jnp.concatenate(
        [jnp.concatenate([jnp.zeros((e, 2 * h), jnp.float32), p["wL"]], axis=0),
         p["wR"]], axis=1)                                              # [2H, 4H]
    # GenerateNode + Score leaf: columns [l, lg, r, rg, S]; zero rows for tok in S.
    w_gs = jnp.concatenate(
        [p["wGEN"],
         jnp.concatenate([p["wS"], jnp.zeros((e, e), jnp.float32)], axis=0)],
        axis=1)                                                         # [3H, 4H+E]
    w_slab = jnp.concatenate([pad_lanes(w_pred), pad_lanes(w_gs),
                              pad_lanes(p["wMRG"]), pad_lanes(p["wa_h"])],
                             axis=0)                                    # [9H, 160]
    b_attn_row = jnp.concatenate([p["ba"], p["va"], p["vs"], p["bva"], p["bvs"]],
                                 axis=1)
    b_slab = jnp.concatenate([
        pad_lanes(jnp.concatenate([p["bL"], p["bR"]], axis=1)),
        pad_lanes(jnp.concatenate([p["bGEN"], p["bS"]], axis=1)),
        pad_lanes(p["bMRG"]),
        pad_lanes(b_attn_row)], axis=0)                                 # [4, 160]

    nslot_h = 2 + 2 * tlen
    nslot_e = 1 + tlen
    kernel = _make_fused_kernel(bsz, h, tlen, maxm, nslot_h, nslot_e)

    dense = (prob, enc, e_enc, e_emb, source_mask, candi_mask, masks,
             w_slab, b_slab, tok_emb, cand_emb)

    def _const_spec(x):
        nd = x.ndim
        return pl.BlockSpec(x.shape, lambda i, s, _nd=nd: (0,) * _nd)

    grid_spec = pltpu.PrefetchScalarGridSpec(
        num_scalar_prefetch=1,
        grid=(1,),
        in_specs=[_const_spec(x) for x in dense],
        out_specs=pl.BlockSpec((tlen, bsz, o_cand), lambda i, s: (0, 0, 0)),
        scratch_shapes=[pltpu.VMEM((bsz * nslot_h, h), jnp.float32),   # node-stack slots
                        pltpu.VMEM((bsz * nslot_e, h), jnp.float32),   # subtree-emb slots
                        pltpu.VMEM((bsz, 3 * h), jnp.float32)])        # gather staging

    scores = pl.pallas_call(
        kernel,
        out_shape=jax.ShapeDtypeStruct((tlen, bsz, o_cand), jnp.float32),
        grid_spec=grid_spec,
        compiler_params=pltpu.CompilerParams(dimension_semantics=("arbitrary",)),
    )(sched, *dense)

    return jnp.transpose(scores, (1, 0, 2))    # [B, T, op+const+var]


# ---------------------------- parameter init --------------------------------
def _init_params(key):
    keys = iter(jax.random.split(key, 40))

    def nk():
        return next(keys)

    def w_(fan_in, shape):
        return jax.random.normal(nk(), shape, jnp.float32) / np.sqrt(fan_in)

    def b_(shape):
        return jax.random.normal(nk(), shape, jnp.float32) * 0.01

    p = {}
    p["emb_table"] = jax.random.normal(nk(), (OP_NUM + CONST_NUM, E), jnp.float32) * 0.1

    # Prediction: concat_l / concat_lg (H -> H), packed column-wise -> [H, 2H]
    p["wL"] = jnp.concatenate([w_(H, (H, H)), w_(H, (H, H))], axis=1)
    p["bL"] = jnp.concatenate([b_((1, H)), b_((1, H))], axis=1)
    # concat_r / concat_rg (2H -> H), input order [left, cur] -> [2H, 2H]
    p["wR"] = jnp.concatenate([w_(2 * H, (2 * H, H)), w_(2 * H, (2 * H, H))], axis=1)
    p["bR"] = jnp.concatenate([b_((1, H)), b_((1, H))], axis=1)

    # Attn: Linear(H_dec + H_enc -> H) split by input rows [hidden | enc]; score Linear(H -> 1)
    w_attn = w_(2 * H, (2 * H, H))
    p["wa_h"], p["wa_e"] = w_attn[:H], w_attn[H:]
    p["ba"] = b_((1, H))
    p["va"] = w_(H, (1, H))
    p["bva"] = b_((1, 1))

    # Score: Linear((H+H) + E -> E) split by input rows [node|ctx | emb]; score Linear(E -> 1)
    w_score = w_(2 * H + E, (2 * H + E, E))
    p["wS"], p["ws_e"] = w_score[:2 * H], w_score[2 * H:]
    p["bS"] = b_((1, E))
    p["vs"] = w_(E, (1, E))
    p["bvs"] = b_((1, 1))

    # GenerateNode: 4 x Linear(2H + E -> H), input order [q, c, e], packed -> [96, 128]
    p["wGEN"] = jnp.concatenate([w_(2 * H + E, (2 * H + E, H)) for _ in range(4)], axis=1)
    p["bGEN"] = jnp.concatenate([b_((1, H)) for _ in range(4)], axis=1)

    # Merge: 2 x Linear(2H + E -> H), input order [op_emb, sub1, sub2], packed -> [96, 64]
    p["wMRG"] = jnp.concatenate([w_(2 * H + E, (2 * H + E, H)) for _ in range(2)], axis=1)
    p["bMRG"] = jnp.concatenate([b_((1, H)) for _ in range(2)], axis=1)
    return p


# ----------------------------- TreeDecoder port -----------------------------
class TreeDecoderPallas:
    """JAX/Pallas port of TreeDecoder (training forward path, eval-mode dropout)."""

    def __init__(self, params, op_num=OP_NUM, const_num=CONST_NUM):
        self.p = params
        self.op_num = op_num
        self.const_num = const_num
        self.var_start = op_num + const_num

    def forward(self, encoder_outputs, problem_output, len_source, var_positions,
                len_var, is_train=True, text_target=None, len_target=None):
        if not is_train:
            # TODO(synk): the beam-search test path (_forward_test) is host-side
            # sequential control flow over Python beam objects; only the
            # teacher-forced training path is ported.
            raise NotImplementedError("only the training forward path is implemented")
        tgt = np.asarray(text_target).astype(np.int32)
        sched, masks, _ = _build_schedule(tgt, self.op_num)
        tok_ids = np.minimum(tgt, self.op_num - 1).astype(np.int32)
        return _device_forward(self.p, jnp.asarray(sched), jnp.asarray(masks),
                               jnp.asarray(tok_ids), jnp.asarray(tgt),
                               encoder_outputs, problem_output,
                               len_source, var_positions, len_var,
                               var_start=self.var_start)


# ---------------------------------- main -------------------------------------
if __name__ == "__main__":
    key = jax.random.PRNGKey(0)
    k_param, k_enc, k_prob = jax.random.split(key, 3)

    params = _init_params(k_param)
    decoder = TreeDecoderPallas(params)

    encoder_outputs = jax.random.normal(k_enc, (B, S1, H), jnp.float32)
    problem_output = jax.random.normal(k_prob, (B, H), jnp.float32)
    len_source = jnp.array([8, 6], jnp.int32)
    var_positions = jnp.array([[1, 3], [0, 2]], jnp.int32)
    len_var = jnp.array([2, 2], jnp.int32)
    # prefix-order target sequences (ops < OP_NUM, numbers/vars >= OP_NUM)
    text_target = np.array([[0, 6, 7, 1, 6],
                            [2, 6, 1, 7, 6]], dtype=np.int32)

    out = decoder.forward(encoder_outputs, problem_output, len_source,
                          var_positions, len_var, is_train=True,
                          text_target=text_target)
    out = jax.block_until_ready(out)
    assert out.shape == (B, T_TGT, O_CAND), out.shape
    assert bool(jnp.all(jnp.isfinite(out)))
    print("KERNEL_OK")
</pallas_src>

<mosaic_0001>
module attributes {stable_mosaic.version = 11 : i64} {
  func.func @kernel(%arg0: i32, %arg1: memref<60xi32, #tpu.memory_space<smem>>, %arg2: memref<2x32xf32, #tpu.memory_space<vmem>>, %arg3: memref<2x8x32xf32, #tpu.memory_space<vmem>>, %arg4: memref<2x8x32xf32, #tpu.memory_space<vmem>>, %arg5: memref<2x8x32xf32, #tpu.memory_space<vmem>>, %arg6: memref<2x8xf32, #tpu.memory_space<vmem>>, %arg7: memref<2x8xf32, #tpu.memory_space<vmem>>, %arg8: memref<5x2x5xf32, #tpu.memory_space<vmem>>, %arg9: memref<288x160xf32, #tpu.memory_space<vmem>>, %arg10: memref<4x160xf32, #tpu.memory_space<vmem>>, %arg11: memref<5x2x32xf32, #tpu.memory_space<vmem>>, %arg12: memref<5x2x32xf32, #tpu.memory_space<vmem>>, %arg13: memref<5x2x8xf32, #tpu.memory_space<vmem>>, %arg14: memref<24x32xf32, #tpu.memory_space<vmem>>, %arg15: memref<12x32xf32, #tpu.memory_space<vmem>>, %arg16: memref<2x96xf32, #tpu.memory_space<vmem>>) attributes {dimension_semantics = [#tpu.dimension_semantics<arbitrary>], iteration_bounds = array<i64: 1>, scalar_prefetch = 1 : i64, scratch_operands = 3 : i64, tpu.core_type = #tpu.core_type<tc>, window_params = [{pipeline_mode = #tpu.pipeline_mode<synchronous>, transform_indices = @transform_0, window_bounds = array<i64: 2, 32>}, {pipeline_mode = #tpu.pipeline_mode<synchronous>, transform_indices = @transform_1, window_bounds = array<i64: 2, 8, 32>}, {pipeline_mode = #tpu.pipeline_mode<synchronous>, transform_indices = @transform_2, window_bounds = array<i64: 2, 8, 32>}, {pipeline_mode = #tpu.pipeline_mode<synchronous>, transform_indices = @transform_3, window_bounds = array<i64: 2, 8, 32>}, {pipeline_mode = #tpu.pipeline_mode<synchronous>, transform_indices = @transform_4, window_bounds = array<i64: 2, 8>}, {pipeline_mode = #tpu.pipeline_mode<synchronous>, transform_indices = @transform_5, window_bounds = array<i64: 2, 8>}, {pipeline_mode = #tpu.pipeline_mode<synchronous>, transform_indices = @transform_6, window_bounds = array<i64: 5, 2, 5>}, {pipeline_mode = #tpu.pipeline_mode<synchronous>, transform_indices = @transform_7, window_bounds = array<i64: 288, 160>}, {pipeline_mode = #tpu.pipeline_mode<synchronous>, transform_indices = @transform_8, window_bounds = array<i64: 4, 160>}, {pipeline_mode = #tpu.pipeline_mode<synchronous>, transform_indices = @transform_9, window_bounds = array<i64: 5, 2, 32>}, {pipeline_mode = #tpu.pipeline_mode<synchronous>, transform_indices = @transform_10, window_bounds = array<i64: 5, 2, 32>}, {pipeline_mode = #tpu.pipeline_mode<synchronous>, transform_indices = @transform_11, window_bounds = array<i64: 5, 2, 8>}]} {
    %cst = arith.constant 0.000000e+00 : f32
    %0 = vector.broadcast %cst : f32 to vector<24x32xf32>
    %c0 = arith.constant 0 : index
    %c0_0 = arith.constant 0 : index
    %1 = vector.load %arg14[%c0, %c0_0] : memref<24x32xf32, #tpu.memory_space<vmem>>, vector<24x32xf32>
    tpu.vector_store %arg14[%c0, %c0_0], %0 {strides = array<i32>} : memref<24x32xf32, #tpu.memory_space<vmem>>, vector<24x32xf32>,
    %cst_1 = arith.constant 0.000000e+00 : f32
    %2 = vector.broadcast %cst_1 : f32 to vector<12x32xf32>
    %c0_2 = arith.constant 0 : index
    %c0_3 = arith.constant 0 : index
    %3 = vector.load %arg15[%c0_2, %c0_3] : memref<12x32xf32, #tpu.memory_space<vmem>>, vector<12x32xf32>
    tpu.vector_store %arg15[%c0_2, %c0_3], %2 {strides = array<i32>} : memref<12x32xf32, #tpu.memory_space<vmem>>, vector<12x32xf32>,
    %c0_4 = arith.constant 0 : index
    %c0_5 = arith.constant 0 : index
    %4 = vector.load %arg2[%c0_4, %c0_5] : memref<2x32xf32, #tpu.memory_space<vmem>>, vector<1x32xf32>
    %c0_6 = arith.constant 0 : index
    %c0_7 = arith.constant 0 : index
    %5 = vector.load %arg14[%c0_6, %c0_7] : memref<24x32xf32, #tpu.memory_space<vmem>>, vector<1x32xf32>
    tpu.vector_store %arg14[%c0_6, %c0_7], %4 {strides = array<i32>} : memref<24x32xf32, #tpu.memory_space<vmem>>, vector<1x32xf32>,
    %c1 = arith.constant 1 : index
    %c0_8 = arith.constant 0 : index
    %6 = vector.load %arg2[%c1, %c0_8] : memref<2x32xf32, #tpu.memory_space<vmem>>, vector<1x32xf32>
    %c12 = arith.constant 12 : index
    %c0_9 = arith.constant 0 : index
    %7 = vector.load %arg14[%c12, %c0_9] : memref<24x32xf32, #tpu.memory_space<vmem>>, vector<1x32xf32>
    tpu.vector_store %arg14[%c12, %c0_9], %6 {strides = array<i32>} : memref<24x32xf32, #tpu.memory_space<vmem>>, vector<1x32xf32>,
    %c0_10 = arith.constant 0 : index
    %c0_11 = arith.constant 0 : index
    %8 = vector.load %arg9[%c0_10, %c0_11] : memref<288x160xf32, #tpu.memory_space<vmem>>, vector<64x128xf32>
    %c64 = arith.constant 64 : index
    %c0_12 = arith.constant 0 : index
    %9 = vector.load %arg9[%c64, %c0_12] : memref<288x160xf32, #tpu.memory_space<vmem>>, vector<96x160xf32>
    %c160 = arith.constant 160 : index
    %c0_13 = arith.constant 0 : index
    %10 = vector.load %arg9[%c160, %c0_13] : memref<288x160xf32, #tpu.memory_space<vmem>>, vector<96x64xf32>
    %c256 = arith.constant 256 : index
    %c0_14 = arith.constant 0 : index
    %11 = vector.load %arg9[%c256, %c0_14] : memref<288x160xf32, #tpu.memory_space<vmem>>, vector<32x32xf32>
    %c0_15 = arith.constant 0 : index
    %c0_16 = arith.constant 0 : index
    %12 = vector.load %arg10[%c0_15, %c0_16] : memref<4x160xf32, #tpu.memory_space<vmem>>, vector<4x160xf32>
    %13 = vector.extract_strided_slice %12 {offsets = [0, 0], sizes = [1, 128], strides = [1, 1]} : vector<4x160xf32> to vector<1x128xf32>
    %14 = vector.extract_strided_slice %12 {offsets = [1, 0], sizes = [1, 160], strides = [1, 1]} : vector<4x160xf32> to vector<1x160xf32>
    %15 = vector.extract_strided_slice %12 {offsets = [2, 0], sizes = [1, 64], strides = [1, 1]} : vector<4x160xf32> to vector<1x64xf32>
    %16 = vector.extract_strided_slice %12 {offsets = [3, 0], sizes = [1, 32], strides = [1, 1]} : vector<4x160xf32> to vector<1x32xf32>
    %17 = vector.extract_strided_slice %12 {offsets = [3, 32], sizes = [1, 32], strides = [1, 1]} : vector<4x160xf32> to vector<1x32xf32>
    %18 = vector.extract_strided_slice %12 {offsets = [3, 64], sizes = [1, 32], strides = [1, 1]} : vector<4x160xf32> to vector<1x32xf32>
    %19 = vector.extract_strided_slice %12 {offsets = [3, 96], sizes = [1, 1], strides = [1, 1]} : vector<4x160xf32> to vector<1x1xf32>
    %20 = vector.extract_strided_slice %12 {offsets = [3, 97], sizes = [1, 1], strides = [1, 1]} : vector<4x160xf32> to vector<1x1xf32>
    %c0_17 = arith.constant 0 : index
    %c0_18 = arith.constant 0 : index
    %c0_19 = arith.constant 0 : index
    %21 = vector.load %arg3[%c0_17, %c0_18, %c0_19] : memref<2x8x32xf32, #tpu.memory_space<vmem>>, vector<2x8x32xf32>
    %c0_20 = arith.constant 0 : index
    %c0_21 = arith.constant 0 : index
    %c0_22 = arith.constant 0 : index
    %22 = vector.load %arg4[%c0_20, %c0_21, %c0_22] : memref<2x8x32xf32, #tpu.memory_space<vmem>>, vector<2x8x32xf32>
    %c0_23 = arith.constant 0 : index
    %c0_24 = arith.constant 0 : index
    %c0_25 = arith.constant 0 : index
    %23 = vector.load %arg5[%c0_23, %c0_24, %c0_25] : memref<2x8x32xf32, #tpu.memory_space<vmem>>, vector<2x8x32xf32>
    %c0_26 = arith.constant 0 : index
    %c0_27 = arith.constant 0 : index
    %24 = vector.load %arg6[%c0_26, %c0_27] : memref<2x8xf32, #tpu.memory_space<vmem>>, vector<2x8xf32>
    %cst_28 = arith.constant 5.000000e-01 : f32
    %25 = vector.broadcast %cst_28 : f32 to vector<2x8xf32>
    %26 = arith.cmpf ogt, %24, %25 : vector<2x8xf32>
    %c0_29 = arith.constant 0 : index
    %c0_30 = arith.constant 0 : index
    %27 = vector.load %arg7[%c0_29, %c0_30] : memref<2x8xf32, #tpu.memory_space<vmem>>, vector<2x8xf32>
    %cst_31 = arith.constant 5.000000e-01 : f32
    %28 = vector.broadcast %cst_31 : f32 to vector<2x8xf32>
    %29 = arith.cmpf ogt, %27, %28 : vector<2x8xf32>
    %c0_32 = arith.constant 0 : index
    %c0_33 = arith.constant 0 : index
    %c0_34 = arith.constant 0 : index
    %30 = vector.load %arg8[%c0_32, %c0_33, %c0_34] : memref<5x2x5xf32, #tpu.memory_space<vmem>>, vector<1x2x5xf32>
    %31 = vector.shape_cast %30 : vector<1x2x5xf32> to vector<2x5xf32>
    %32 = vector.extract_strided_slice %31 {offsets = [0, 0], sizes = [2, 1], strides = [1, 1]} : vector<2x5xf32> to vector<2x1xf32>
    %33 = vector.extract_strided_slice %31 {offsets = [0, 1], sizes = [2, 1], strides = [1, 1]} : vector<2x5xf32> to vector<2x1xf32>
    %34 = vector.extract_strided_slice %31 {offsets = [0, 2], sizes = [2, 1], strides = [1, 1]} : vector<2x5xf32> to vector<2x1xf32>
    %c0_35 = arith.constant 0 : index
    %35 = memref.load %arg1[%c0_35] : memref<60xi32, #tpu.memory_space<smem>>
    %c1_36 = arith.constant 1 : index
    %36 = memref.load %arg1[%c1_36] : memref<60xi32, #tpu.memory_space<smem>>
    %c0_i32 = arith.constant 0 : i32
    %37 = arith.addi %c0_i32, %36 : i32
    %38 = arith.index_cast %37 : i32 to index
    %c0_37 = arith.constant 0 : index
    %39 = vector.load %arg15[%38, %c0_37] : memref<12x32xf32, #tpu.memory_space<vmem>>, vector<1x32xf32>
    %c0_38 = arith.constant 0 : index
    %c0_39 = arith.constant 0 : index
    %40 = vector.load %arg16[%c0_38, %c0_39] : memref<2x96xf32, #tpu.memory_space<vmem>>, vector<1x32xf32>
    tpu.vector_store %arg16[%c0_38, %c0_39], %39 {strides = array<i32>} : memref<2x96xf32, #tpu.memory_space<vmem>>, vector<1x32xf32>,
    %c0_i32_40 = arith.constant 0 : i32
    %41 = arith.addi %c0_i32_40, %35 : i32
    %42 = arith.index_cast %41 : i32 to index
    %c0_41 = arith.constant 0 : index
    %43 = vector.load %arg14[%42, %c0_41] : memref<24x32xf32, #tpu.memory_space<vmem>>, vector<1x32xf32>
    %c0_42 = arith.constant 0 : index
    %c32 = arith.constant 32 : index
    %44 = vector.load %arg16[%c0_42, %c32] : memref<2x96xf32, #tpu.memory_space<vmem>>, vector<1x32xf32>
    tpu.vector_store %arg16[%c0_42, %c32], %43 {strides = array<i32>} : memref<2x96xf32, #tpu.memory_space<vmem>>, vector<1x32xf32>,
    %c6 = arith.constant 6 : index
    %45 = memref.load %arg1[%c6] : memref<60xi32, #tpu.memory_space<smem>>
    %c7 = arith.constant 7 : index
    %46 = memref.load %arg1[%c7] : memref<60xi32, #tpu.memory_space<smem>>
    %c6_i32 = arith.constant 6 : i32
    %47 = arith.addi %c6_i32, %46 : i32
    %48 = arith.index_cast %47 : i32 to index
    %c0_43 = arith.constant 0 : index
    %49 = vector.load %arg15[%48, %c0_43] : memref<12x32xf32, #tpu.memory_space<vmem>>, vector<1x32xf32>
    %c1_44 = arith.constant 1 : index
    %c0_45 = arith.constant 0 : index
    %50 = vector.load %arg16[%c1_44, %c0_45] : memref<2x96xf32, #tpu.memory_space<vmem>>, vector<1x32xf32>
    tpu.vector_store %arg16[%c1_44, %c0_45], %49 {strides = array<i32>} : memref<2x96xf32, #tpu.memory_space<vmem>>, vector<1x32xf32>,
    %c12_i32 = arith.constant 12 : i32
    %51 = arith.addi %c12_i32, %45 : i32
    %52 = arith.index_cast %51 : i32 to index
    %c0_46 = arith.constant 0 : index
    %53 = vector.load %arg14[%52, %c0_46] : memref<24x32xf32, #tpu.memory_space<vmem>>, vector<1x32xf32>
    %c1_47 = arith.constant 1 : index
    %c32_48 = arith.constant 32 : index
    %54 = vector.load %arg16[%c1_47, %c32_48] : memref<2x96xf32, #tpu.memory_space<vmem>>, vector<1x32xf32>
    tpu.vector_store %arg16[%c1_47, %c32_48], %53 {strides = array<i32>} : memref<2x96xf32, #tpu.memory_space<vmem>>, vector<1x32xf32>,
    %c0_49 = arith.constant 0 : index
    %c0_50 = arith.constant 0 : index
    %55 = vector.load %arg16[%c0_49, %c0_50] : memref<2x96xf32, #tpu.memory_space<vmem>>, vector<2x64xf32>
    %cst_51 = arith.constant dense<0.000000e+00> : vector<2x128xf32>
    %56 = tpu.matmul %55, %8, %cst_51 {dimension_numbers = #tpu.dot_dimension_numbers<[1], [0], [0], [1], [0, 0, 1, 1], [], []>} : vector<2x64xf32>, vector<64x128xf32>, vector<2x128xf32> -> vector<2x128xf32>
    %57 = vector.broadcast %13 : vector<1x128xf32> to vector<2x128xf32>
    %58 = arith.addf %56, %57 : vector<2x128xf32>
    %59 = vector.extract_strided_slice %58 {offsets = [0, 0], sizes = [2, 32], strides = [1, 1]} : vector<2x128xf32> to vector<2x32xf32>
    %60 = math.tanh %59 : vector<2x32xf32>
    %61 = vector.extract_strided_slice %58 {offsets = [0, 32], sizes = [2, 32], strides = [1, 1]} : vector<2x128xf32> to vector<2x32xf32>
    %cst_52 = arith.constant 0.000000e+00 : f32
    %62 = vector.broadcast %cst_52 : f32 to vector<2x32xf32>
    %63 = arith.subf %62, %61 : vector<2x32xf32>
    %64 = math.exp %63 : vector<2x32xf32>
    %cst_53 = arith.constant 1.000000e+00 : f32
    %65 = vector.broadcast %cst_53 : f32 to vector<2x32xf32>
    %66 = arith.addf %65, %64 : vector<2x32xf32>
    %cst_54 = arith.constant 1.000000e+00 : f32
    %67 = vector.broadcast %cst_54 : f32 to vector<2x32xf32>
    %68 = arith.divf %67, %66 : vector<2x32xf32>
    %69 = arith.mulf %60, %68 : vector<2x32xf32>
    %70 = vector.extract_strided_slice %58 {offsets = [0, 64], sizes = [2, 32], strides = [1, 1]} : vector<2x128xf32> to vector<2x32xf32>
    %71 = math.tanh %70 : vector<2x32xf32>
    %72 = vector.extract_strided_slice %58 {offsets = [0, 96], sizes = [2, 32], strides = [1, 1]} : vector<2x128xf32> to vector<2x32xf32>
    %cst_55 = arith.constant 0.000000e+00 : f32
    %73 = vector.broadcast %cst_55 : f32 to vector<2x32xf32>
    %74 = arith.subf %73, %72 : vector<2x32xf32>
    %75 = math.exp %74 : vector<2x32xf32>
    %cst_56 = arith.constant 1.000000e+00 : f32
    %76 = vector.broadcast %cst_56 : f32 to vector<2x32xf32>
    %77 = arith.addf %76, %75 : vector<2x32xf32>
    %cst_57 = arith.constant 1.000000e+00 : f32
    %78 = vector.broadcast %cst_57 : f32 to vector<2x32xf32>
    %79 = arith.divf %78, %77 : vector<2x32xf32>
    %80 = arith.mulf %71, %79 : vector<2x32xf32>
    %81 = arith.subf %80, %69 : vector<2x32xf32>
    %82 = vector.broadcast %32 : vector<2x1xf32> to vector<2x32xf32>
    %83 = arith.mulf %82, %81 : vector<2x32xf32>
    %84 = arith.addf %69, %83 : vector<2x32xf32>
    %cst_58 = arith.constant dense<0.000000e+00> : vector<2x32xf32>
    %85 = tpu.matmul %84, %11, %cst_58 {dimension_numbers = #tpu.dot_dimension_numbers<[1], [0], [0], [1], [0, 0, 1, 1], [], []>} : vector<2x32xf32>, vector<32x32xf32>, vector<2x32xf32> -> vector<2x32xf32>
    %86 = vector.broadcast %16 : vector<1x32xf32> to vector<2x32xf32>
    %87 = arith.addf %85, %86 : vector<2x32xf32>
    %88 = vector.shape_cast %87 : vector<2x32xf32> to vector<2x1x32xf32>
    %89 = vector.broadcast %88 : vector<2x1x32xf32> to vector<2x8x32xf32>
    %90 = arith.addf %22, %89 : vector<2x8x32xf32>
    %91 = math.tanh %90 : vector<2x8x32xf32>
    %92 = vector.shape_cast %17 : vector<1x32xf32> to vector<1x1x32xf32>
    %93 = vector.broadcast %92 : vector<1x1x32xf32> to vector<2x8x32xf32>
    %94 = arith.mulf %91, %93 : vector<2x8x32xf32>
    %cst_59 = arith.constant dense<0.000000e+00> : vector<2x8xf32>
    %95 = vector.multi_reduction <add>, %94, %cst_59 [2] : vector<2x8x32xf32> to vector<2x8xf32>
    %96 = vector.broadcast %19 : vector<1x1xf32> to vector<2x8xf32>
    %97 = arith.addf %95, %96 : vector<2x8xf32>
    %cst_60 = arith.constant -9.99999995E+11 : f32
    %98 = vector.broadcast %cst_60 : f32 to vector<2x8xf32>
    %99 = arith.select %26, %97, %98 : vector<2x8xi1>, vector<2x8xf32>
    %cst_61 = arith.constant dense<0xFF800000> : vector<2xf32>
    %100 = vector.multi_reduction <maximumf>, %99, %cst_61 [1] : vector<2x8xf32> to vector<2xf32>
    %101 = vector.shape_cast %100 : vector<2xf32> to vector<2x1xf32>
    %102 = vector.broadcast %101 : vector<2x1xf32> to vector<2x8xf32>
    %103 = arith.subf %99, %102 : vector<2x8xf32>
    %104 = math.exp %103 : vector<2x8xf32>
    %cst_62 = arith.constant dense<0.000000e+00> : vector<2xf32>
    %105 = vector.multi_reduction <add>, %104, %cst_62 [1] : vector<2x8xf32> to vector<2xf32>
    %106 = vector.shape_cast %105 : vector<2xf32> to vector<2x1xf32>
    %107 = tpu.reciprocal %106 {approx = true} : vector<2x1xf32> -> vector<2x1xf32>
    %108 = vector.broadcast %107 : vector<2x1xf32> to vector<2x8xf32>
    %109 = arith.mulf %104, %108 : vector<2x8xf32>
    %110 = vector.shape_cast %109 : vector<2x8xf32> to vector<2x8x1xf32>
    %111 = vector.broadcast %110 : vector<2x8x1xf32> to vector<2x8x32xf32>
    %112 = arith.mulf %111, %21 : vector<2x8x32xf32>
    %cst_63 = arith.constant dense<0.000000e+00> : vector<2x32xf32>
    %113 = vector.multi_reduction <add>, %112, %cst_63 [1] : vector<2x8x32xf32> to vector<2x32xf32>
    %c0_64 = arith.constant 0 : index
    %c0_65 = arith.constant 0 : index
    %c0_66 = arith.constant 0 : index
    %114 = vector.load %arg11[%c0_64, %c0_65, %c0_66] : memref<5x2x32xf32, #tpu.memory_space<vmem>>, vector<1x2x32xf32>
    %115 = vector.shape_cast %114 : vector<1x2x32xf32> to vector<2x32xf32>
    %116 = tpu.concatenate %84, %113, %115 in 1 : vector<2x32xf32>, vector<2x32xf32>, vector<2x32xf32> -> vector<2x96xf32>
    %cst_67 = arith.constant dense<0.000000e+00> : vector<2x160xf32>
    %117 = tpu.matmul %116, %9, %cst_67 {dimension_numbers = #tpu.dot_dimension_numbers<[1], [0], [0], [1], [0, 0, 1, 1], [], []>} : vector<2x96xf32>, vector<96x160xf32>, vector<2x160xf32> -> vector<2x160xf32>
    %118 = vector.broadcast %14 : vector<1x160xf32> to vector<2x160xf32>
    %119 = arith.addf %117, %118 : vector<2x160xf32>
    %120 = vector.extract_strided_slice %119 {offsets = [0, 0], sizes = [2, 32], strides = [1, 1]} : vector<2x160xf32> to vector<2x32xf32>
    %121 = math.tanh %120 : vector<2x32xf32>
    %122 = vector.extract_strided_slice %119 {offsets = [0, 32], sizes = [2, 32], strides = [1, 1]} : vector<2x160xf32> to vector<2x32xf32>
    %cst_68 = arith.constant 0.000000e+00 : f32
    %123 = vector.broadcast %cst_68 : f32 to vector<2x32xf32>
    %124 = arith.subf %123, %122 : vector<2x32xf32>
    %125 = math.exp %124 : vector<2x32xf32>
    %cst_69 = arith.constant 1.000000e+00 : f32
    %126 = vector.broadcast %cst_69 : f32 to vector<2x32xf32>
    %127 = arith.addf %126, %125 : vector<2x32xf32>
    %cst_70 = arith.constant 1.000000e+00 : f32
    %128 = vector.broadcast %cst_70 : f32 to vector<2x32xf32>
    %129 = arith.divf %128, %127 : vector<2x32xf32>
    %130 = arith.mulf %121, %129 : vector<2x32xf32>
    %131 = vector.extract_strided_slice %119 {offsets = [0, 64], sizes = [2, 32], strides = [1, 1]} : vector<2x160xf32> to vector<2x32xf32>
    %132 = math.tanh %131 : vector<2x32xf32>
    %133 = vector.extract_strided_slice %119 {offsets = [0, 96], sizes = [2, 32], strides = [1, 1]} : vector<2x160xf32> to vector<2x32xf32>
    %cst_71 = arith.constant 0.000000e+00 : f32
    %134 = vector.broadcast %cst_71 : f32 to vector<2x32xf32>
    %135 = arith.subf %134, %133 : vector<2x32xf32>
    %136 = math.exp %135 : vector<2x32xf32>
    %cst_72 = arith.constant 1.000000e+00 : f32
    %137 = vector.broadcast %cst_72 : f32 to vector<2x32xf32>
    %138 = arith.addf %137, %136 : vector<2x32xf32>
    %cst_73 = arith.constant 1.000000e+00 : f32
    %139 = vector.broadcast %cst_73 : f32 to vector<2x32xf32>
    %140 = arith.divf %139, %138 : vector<2x32xf32>
    %141 = arith.mulf %132, %140 : vector<2x32xf32>
    %142 = vector.extract_strided_slice %119 {offsets = [0, 128], sizes = [2, 32], strides = [1, 1]} : vector<2x160xf32> to vector<2x32xf32>
    %143 = vector.shape_cast %142 : vector<2x32xf32> to vector<2x1x32xf32>
    %144 = vector.broadcast %143 : vector<2x1x32xf32> to vector<2x8x32xf32>
    %145 = arith.addf %23, %144 : vector<2x8x32xf32>
    %146 = math.tanh %145 : vector<2x8x32xf32>
    %147 = vector.shape_cast %18 : vector<1x32xf32> to vector<1x1x32xf32>
    %148 = vector.broadcast %147 : vector<1x1x32xf32> to vector<2x8x32xf32>
    %149 = arith.mulf %146, %148 : vector<2x8x32xf32>
    %cst_74 = arith.constant dense<0.000000e+00> : vector<2x8xf32>
    %150 = vector.multi_reduction <add>, %149, %cst_74 [2] : vector<2x8x32xf32> to vector<2x8xf32>
    %151 = vector.broadcast %20 : vector<1x1xf32> to vector<2x8xf32>
    %152 = arith.addf %150, %151 : vector<2x8xf32>
    %cst_75 = arith.constant -9.99999995E+11 : f32
    %153 = vector.broadcast %cst_75 : f32 to vector<2x8xf32>
    %154 = arith.select %29, %152, %153 : vector<2x8xi1>, vector<2x8xf32>
    %c0_76 = arith.constant 0 : index
    %c0_77 = arith.constant 0 : index
    %c0_78 = arith.constant 0 : index
    %155 = vector.load %arg13[%c0_76, %c0_77, %c0_78] : memref<5x2x8xf32, #tpu.memory_space<vmem>>, vector<1x2x8xf32>
    %156 = vector.shape_cast %155 : vector<1x2x8xf32> to vector<2x8xf32>
    %157 = vector.shape_cast %154 : vector<2x8xf32> to vector<1x2x8xf32>
    tpu.vector_store %arg13[%c0_76, %c0_77, %c0_78], %157 {strides = array<i32>} : memref<5x2x8xf32, #tpu.memory_space<vmem>>, vector<1x2x8xf32>,
    %158 = vector.broadcast %34 : vector<2x1xf32> to vector<2x32xf32>
    %159 = arith.mulf %130, %158 : vector<2x32xf32>
    %160 = vector.broadcast %34 : vector<2x1xf32> to vector<2x32xf32>
    %161 = arith.mulf %141, %160 : vector<2x32xf32>
    %162 = vector.extract_strided_slice %159 {offsets = [0, 0], sizes = [1, 32], strides = [1, 1]} : vector<2x32xf32> to vector<1x32xf32>
    %c2 = arith.constant 2 : index
    %c0_79 = arith.constant 0 : index
    %163 = vector.load %arg14[%c2, %c0_79] : memref<24x32xf32, #tpu.memory_space<vmem>>, vector<1x32xf32>
    tpu.vector_store %arg14[%c2, %c0_79], %162 {strides = array<i32>} : memref<24x32xf32, #tpu.memory_space<vmem>>, vector<1x32xf32>,
    %164 = vector.extract_strided_slice %161 {offsets = [0, 0], sizes = [1, 32], strides = [1, 1]} : vector<2x32xf32> to vector<1x32xf32>
    %c3 = arith.constant 3 : index
    %c0_80 = arith.constant 0 : index
    %165 = vector.load %arg14[%c3, %c0_80] : memref<24x32xf32, #tpu.memory_space<vmem>>, vector<1x32xf32>
    tpu.vector_store %arg14[%c3, %c0_80], %164 {strides = array<i32>} : memref<24x32xf32, #tpu.memory_space<vmem>>, vector<1x32xf32>,
    %166 = vector.extract_strided_slice %159 {offsets = [1, 0], sizes = [1, 32], strides = [1, 1]} : vector<2x32xf32> to vector<1x32xf32>
    %c14 = arith.constant 14 : index
    %c0_81 = arith.constant 0 : index
    %167 = vector.load %arg14[%c14, %c0_81] : memref<24x32xf32, #tpu.memory_space<vmem>>, vector<1x32xf32>
    tpu.vector_store %arg14[%c14, %c0_81], %166 {strides = array<i32>} : memref<24x32xf32, #tpu.memory_space<vmem>>, vector<1x32xf32>,
    %168 = vector.extract_strided_slice %161 {offsets = [1, 0], sizes = [1, 32], strides = [1, 1]} : vector<2x32xf32> to vector<1x32xf32>
    %c15 = arith.constant 15 : index
    %c0_82 = arith.constant 0 : index
    %169 = vector.load %arg14[%c15, %c0_82] : memref<24x32xf32, #tpu.memory_space<vmem>>, vector<1x32xf32>
    tpu.vector_store %arg14[%c15, %c0_82], %168 {strides = array<i32>} : memref<24x32xf32, #tpu.memory_space<vmem>>, vector<1x32xf32>,
    %c0_83 = arith.constant 0 : index
    %c0_84 = arith.constant 0 : index
    %c0_85 = arith.constant 0 : index
    %170 = vector.load %arg12[%c0_83, %c0_84, %c0_85] : memref<5x2x32xf32, #tpu.memory_space<vmem>>, vector<1x2x32xf32>
    %171 = vector.shape_cast %170 : vector<1x2x32xf32> to vector<2x32xf32>
    %c2_86 = arith.constant 2 : index
    %172 = memref.load %arg1[%c2_86] : memref<60xi32, #tpu.memory_space<smem>>
    %c3_87 = arith.constant 3 : index
    %173 = memref.load %arg1[%c3_87] : memref<60xi32, #tpu.memory_space<smem>>
    %c0_i32_88 = arith.constant 0 : i32
    %174 = arith.addi %c0_i32_88, %172 : i32
    %175 = arith.index_cast %174 : i32 to index
    %c0_89 = arith.constant 0 : index
    %176 = vector.load %arg15[%175, %c0_89] : memref<12x32xf32, #tpu.memory_space<vmem>>, vector<1x32xf32>
    %c0_90 = arith.constant 0 : index
    %c0_91 = arith.constant 0 : index
    %177 = vector.load %arg16[%c0_90, %c0_91] : memref<2x96xf32, #tpu.memory_space<vmem>>, vector<1x32xf32>
    tpu.vector_store %arg16[%c0_90, %c0_91], %176 {strides = array<i32>} : memref<2x96xf32, #tpu.memory_space<vmem>>, vector<1x32xf32>,
    %c0_i32_92 = arith.constant 0 : i32
    %178 = arith.addi %c0_i32_92, %173 : i32
    %179 = arith.index_cast %178 : i32 to index
    %c0_93 = arith.constant 0 : index
    %180 = vector.load %arg15[%179, %c0_93] : memref<12x32xf32, #tpu.memory_space<vmem>>, vector<1x32xf32>
    %c0_94 = arith.constant 0 : index
    %c32_95 = arith.constant 32 : index
    %181 = vector.load %arg16[%c0_94, %c32_95] : memref<2x96xf32, #tpu.memory_space<vmem>>, vector<1x32xf32>
    tpu.vector_store %arg16[%c0_94, %c32_95], %180 {strides = array<i32>} : memref<2x96xf32, #tpu.memory_space<vmem>>, vector<1x32xf32>,
    %c8 = arith.constant 8 : index
    %182 = memref.load %arg1[%c8] : memref<60xi32, #tpu.memory_space<smem>>
    %c9 = arith.constant 9 : index
    %183 = memref.load %arg1[%c9] : memref<60xi32, #tpu.memory_space<smem>>
    %c6_i32_96 = arith.constant 6 : i32
    %184 = arith.addi %c6_i32_96, %182 : i32
    %185 = arith.index_cast %184 : i32 to index
    %c0_97 = arith.constant 0 : index
    %186 = vector.load %arg15[%185, %c0_97] : memref<12x32xf32, #tpu.memory_space<vmem>>, vector<1x32xf32>
    %c1_98 = arith.constant 1 : index
    %c0_99 = arith.constant 0 : index
    %187 = vector.load %arg16[%c1_98, %c0_99] : memref<2x96xf32, #tpu.memory_space<vmem>>, vector<1x32xf32>
    tpu.vector_store %arg16[%c1_98, %c0_99], %186 {strides = array<i32>} : memref<2x96xf32, #tpu.memory_space<vmem>>, vector<1x32xf32>,
    %c6_i32_100 = arith.constant 6 : i32
    %188 = arith.addi %c6_i32_100, %183 : i32
    %189 = arith.index_cast %188 : i32 to index
    %c0_101 = arith.constant 0 : index
    %190 = vector.load %arg15[%189, %c0_101] : memref<12x32xf32, #tpu.memory_space<vmem>>, vector<1x32xf32>
    %c1_102 = arith.constant 1 : index
    %c32_103 = arith.constant 32 : index
    %191 = vector.load %arg16[%c1_102, %c32_103] : memref<2x96xf32, #tpu.memory_space<vmem>>, vector<1x32xf32>
    tpu.vector_store %arg16[%c1_102, %c32_103], %190 {strides = array<i32>} : memref<2x96xf32, #tpu.memory_space<vmem>>, vector<1x32xf32>,
    %c0_104 = arith.constant 0 : index
    %c64_105 = arith.constant 64 : index
    %192 = vector.load %arg16[%c0_104, %c64_105] : memref<2x96xf32, #tpu.memory_space<vmem>>, vector<2x32xf32>
    tpu.vector_store %arg16[%c0_104, %c64_105], %171 {strides = array<i32>} : memref<2x96xf32, #tpu.memory_space<vmem>>, vector<2x32xf32>,
    %c0_106 = arith.constant 0 : index
    %c0_107 = arith.constant 0 : index
    %193 = vector.load %arg16[%c0_106, %c0_107] : memref<2x96xf32, #tpu.memory_space<vmem>>, vector<2x96xf32>
    %cst_108 = arith.constant dense<0.000000e+00> : vector<2x64xf32>
    %194 = tpu.matmul %193, %10, %cst_108 {dimension_numbers = #tpu.dot_dimension_numbers<[1], [0], [0], [1], [0, 0, 1, 1], [], []>} : vector<2x96xf32>, vector<96x64xf32>, vector<2x64xf32> -> vector<2x64xf32>
    %195 = vector.broadcast %15 : vector<1x64xf32> to vector<2x64xf32>
    %196 = arith.addf %194, %195 : vector<2x64xf32>
    %197 = vector.extract_strided_slice %196 {offsets = [0, 0], sizes = [2, 32], strides = [1, 1]} : vector<2x64xf32> to vector<2x32xf32>
    %198 = math.tanh %197 : vector<2x32xf32>
    %199 = vector.extract_strided_slice %196 {offsets = [0, 32], sizes = [2, 32], strides = [1, 1]} : vector<2x64xf32> to vector<2x32xf32>
    %cst_109 = arith.constant 0.000000e+00 : f32
    %200 = vector.broadcast %cst_109 : f32 to vector<2x32xf32>
    %201 = arith.subf %200, %199 : vector<2x32xf32>
    %202 = math.exp %201 : vector<2x32xf32>
    %cst_110 = arith.constant 1.000000e+00 : f32
    %203 = vector.broadcast %cst_110 : f32 to vector<2x32xf32>
    %204 = arith.addf %203, %202 : vector<2x32xf32>
    %cst_111 = arith.constant 1.000000e+00 : f32
    %205 = vector.broadcast %cst_111 : f32 to vector<2x32xf32>
    %206 = arith.divf %205, %204 : vector<2x32xf32>
    %207 = arith.mulf %198, %206 : vector<2x32xf32>
    %208 = vector.extract_strided_slice %31 {offsets = [0, 3], sizes = [2, 1], strides = [1, 1]} : vector<2x5xf32> to vector<2x1xf32>
    %209 = arith.subf %207, %171 : vector<2x32xf32>
    %210 = vector.broadcast %208 : vector<2x1xf32> to vector<2x32xf32>
    %211 = arith.mulf %210, %209 : vector<2x32xf32>
    %212 = arith.addf %171, %211 : vector<2x32xf32>
    %c4 = arith.constant 4 : index
    %213 = memref.load %arg1[%c4] : memref<60xi32, #tpu.memory_space<smem>>
    %c5 = arith.constant 5 : index
    %214 = memref.load %arg1[%c5] : memref<60xi32, #tpu.memory_space<smem>>
    %c0_i32_112 = arith.constant 0 : i32
    %215 = arith.addi %c0_i32_112, %213 : i32
    %216 = arith.index_cast %215 : i32 to index
    %c0_113 = arith.constant 0 : index
    %217 = vector.load %arg15[%216, %c0_113] : memref<12x32xf32, #tpu.memory_space<vmem>>, vector<1x32xf32>
    %c0_114 = arith.constant 0 : index
    %c0_115 = arith.constant 0 : index
    %218 = vector.load %arg16[%c0_114, %c0_115] : memref<2x96xf32, #tpu.memory_space<vmem>>, vector<1x32xf32>
    tpu.vector_store %arg16[%c0_114, %c0_115], %217 {strides = array<i32>} : memref<2x96xf32, #tpu.memory_space<vmem>>, vector<1x32xf32>,
    %c0_i32_116 = arith.constant 0 : i32
    %219 = arith.addi %c0_i32_116, %214 : i32
    %220 = arith.index_cast %219 : i32 to index
    %c0_117 = arith.constant 0 : index
    %221 = vector.load %arg15[%220, %c0_117] : memref<12x32xf32, #tpu.memory_space<vmem>>, vector<1x32xf32>
    %c0_118 = arith.constant 0 : index
    %c32_119 = arith.constant 32 : index
    %222 = vector.load %arg16[%c0_118, %c32_119] : memref<2x96xf32, #tpu.memory_space<vmem>>, vector<1x32xf32>
    tpu.vector_store %arg16[%c0_118, %c32_119], %221 {strides = array<i32>} : memref<2x96xf32, #tpu.memory_space<vmem>>, vector<1x32xf32>,
    %c10 = arith.constant 10 : index
    %223 = memref.load %arg1[%c10] : memref<60xi32, #tpu.memory_space<smem>>
    %c11 = arith.constant 11 : index
    %224 = memref.load %arg1[%c11] : memref<60xi32, #tpu.memory_space<smem>>
    %c6_i32_120 = arith.constant 6 : i32
    %225 = arith.addi %c6_i32_120, %223 : i32
    %226 = arith.index_cast %225 : i32 to index
    %c0_121 = arith.constant 0 : index
    %227 = vector.load %arg15[%226, %c0_121] : memref<12x32xf32, #tpu.memory_space<vmem>>, vector<1x32xf32>
    %c1_122 = arith.constant 1 : index
    %c0_123 = arith.constant 0 : index
    %228 = vector.load %arg16[%c1_122, %c0_123] : memref<2x96xf32, #tpu.memory_space<vmem>>, vector<1x32xf32>
    tpu.vector_store %arg16[%c1_122, %c0_123], %227 {strides = array<i32>} : memref<2x96xf32, #tpu.memory_space<vmem>>, vector<1x32xf32>,
    %c6_i32_124 = arith.constant 6 : i32
    %229 = arith.addi %c6_i32_124, %224 : i32
    %230 = arith.index_cast %229 : i32 to index
    %c0_125 = arith.constant 0 : index
    %231 = vector.load %arg15[%230, %c0_125] : memref<12x32xf32, #tpu.memory_space<vmem>>, vector<1x32xf32>
    %c1_126 = arith.constant 1 : index
    %c32_127 = arith.constant 32 : index
    %232 = vector.load %arg16[%c1_126, %c32_127] : memref<2x96xf32, #tpu.memory_space<vmem>>, vector<1x32xf32>
    tpu.vector_store %arg16[%c1_126, %c32_127], %231 {strides = array<i32>} : memref<2x96xf32, #tpu.memory_space<vmem>>, vector<1x32xf32>,
    %c0_128 = arith.constant 0 : index
    %c64_129 = arith.constant 64 : index
    %233 = vector.load %arg16[%c0_128, %c64_129] : memref<2x96xf32, #tpu.memory_space<vmem>>, vector<2x32xf32>
    tpu.vector_store %arg16[%c0_128, %c64_129], %212 {strides = array<i32>} : memref<2x96xf32, #tpu.memory_space<vmem>>, vector<2x32xf32>,
    %c0_130 = arith.constant 0 : index
    %c0_131 = arith.constant 0 : index
    %234 = vector.load %arg16[%c0_130, %c0_131] : memref<2x96xf32, #tpu.memory_space<vmem>>, vector<2x96xf32>
    %cst_132 = arith.constant dense<0.000000e+00> : vector<2x64xf32>
    %235 = tpu.matmul %234, %10, %cst_132 {dimension_numbers = #tpu.dot_dimension_numbers<[1], [0], [0], [1], [0, 0, 1, 1], [], []>} : vector<2x96xf32>, vector<96x64xf32>, vector<2x64xf32> -> vector<2x64xf32>
    %236 = vector.broadcast %15 : vector<1x64xf32> to vector<2x64xf32>
    %237 = arith.addf %235, %236 : vector<2x64xf32>
    %238 = vector.extract_strided_slice %237 {offsets = [0, 0], sizes = [2, 32], strides = [1, 1]} : vector<2x64xf32> to vector<2x32xf32>
    %239 = math.tanh %238 : vector<2x32xf32>
    %240 = vector.extract_strided_slice %237 {offsets = [0, 32], sizes = [2, 32], strides = [1, 1]} : vector<2x64xf32> to vector<2x32xf32>
    %cst_133 = arith.constant 0.000000e+00 : f32
    %241 = vector.broadcast %cst_133 : f32 to vector<2x32xf32>
    %242 = arith.subf %241, %240 : vector<2x32xf32>
    %243 = math.exp %242 : vector<2x32xf32>
    %cst_134 = arith.constant 1.000000e+00 : f32
    %244 = vector.broadcast %cst_134 : f32 to vector<2x32xf32>
    %245 = arith.addf %244, %243 : vector<2x32xf32>
    %cst_135 = arith.constant 1.000000e+00 : f32
    %246 = vector.broadcast %cst_135 : f32 to vector<2x32xf32>
    %247 = arith.divf %246, %245 : vector<2x32xf32>
    %248 = arith.mulf %239, %247 : vector<2x32xf32>
    %249 = vector.extract_strided_slice %31 {offsets = [0, 4], sizes = [2, 1], strides = [1, 1]} : vector<2x5xf32> to vector<2x1xf32>
    %250 = arith.subf %248, %212 : vector<2x32xf32>
    %251 = vector.broadcast %249 : vector<2x1xf32> to vector<2x32xf32>
    %252 = arith.mulf %251, %250 : vector<2x32xf32>
    %253 = arith.addf %212, %252 : vector<2x32xf32>
    %254 = arith.subf %115, %253 : vector<2x32xf32>
    %255 = vector.broadcast %33 : vector<2x1xf32> to vector<2x32xf32>
    %256 = arith.mulf %255, %254 : vector<2x32xf32>
    %257 = arith.addf %253, %256 : vector<2x32xf32>
    %258 = vector.broadcast %34 : vector<2x1xf32> to vector<2x32xf32>
    %259 = arith.mulf %257, %258 : vector<2x32xf32>
    %260 = vector.extract_strided_slice %259 {offsets = [0, 0], sizes = [1, 32], strides = [1, 1]} : vector<2x32xf32> to vector<1x32xf32>
    %c1_136 = arith.constant 1 : index
    %c0_137 = arith.constant 0 : index
    %261 = vector.load %arg15[%c1_136, %c0_137] : memref<12x32xf32, #tpu.memory_space<vmem>>, vector<1x32xf32>
    tpu.vector_store %arg15[%c1_136, %c0_137], %260 {strides = array<i32>} : memref<12x32xf32, #tpu.memory_space<vmem>>, vector<1x32xf32>,
    %262 = vector.extract_strided_slice %259 {offsets = [1, 0], sizes = [1, 32], strides = [1, 1]} : vector<2x32xf32> to vector<1x32xf32>
    %c7_138 = arith.constant 7 : index
    %c0_139 = arith.constant 0 : index
    %263 = vector.load %arg15[%c7_138, %c0_139] : memref<12x32xf32, #tpu.memory_space<vmem>>, vector<1x32xf32>
    tpu.vector_store %arg15[%c7_138, %c0_139], %262 {strides = array<i32>} : memref<12x32xf32, #tpu.memory_space<vmem>>, vector<1x32xf32>,
    %c1_140 = arith.constant 1 : index
    %c0_141 = arith.constant 0 : index
    %c0_142 = arith.constant 0 : index
    %264 = vector.load %arg8[%c1_140, %c0_141, %c0_142] : memref<5x2x5xf32, #tpu.memory_space<vmem>>, vector<1x2x5xf32>
    %265 = vector.shape_cast %264 : vector<1x2x5xf32> to vector<2x5xf32>
    %266 = vector.extract_strided_slice %265 {offsets = [0, 0], sizes = [2, 1], strides = [1, 1]} : vector<2x5xf32> to vector<2x1xf32>
    %267 = vector.extract_strided_slice %265 {offsets = [0, 1], sizes = [2, 1], strides = [1, 1]} : vector<2x5xf32> to vector<2x1xf32>
    %268 = vector.extract_strided_slice %265 {offsets = [0, 2], sizes = [2, 1], strides = [1, 1]} : vector<2x5xf32> to vector<2x1xf32>
    %c12_143 = arith.constant 12 : index
    %269 = memref.load %arg1[%c12_143] : memref<60xi32, #tpu.memory_space<smem>>
    %c13 = arith.constant 13 : index
    %270 = memref.load %arg1[%c13] : memref<60xi32, #tpu.memory_space<smem>>
    %c0_i32_144 = arith.constant 0 : i32
    %271 = arith.addi %c0_i32_144, %270 : i32
    %272 = arith.index_cast %271 : i32 to index
    %c0_145 = arith.constant 0 : index
    %273 = vector.load %arg15[%272, %c0_145] : memref<12x32xf32, #tpu.memory_space<vmem>>, vector<1x32xf32>
    %c0_146 = arith.constant 0 : index
    %c0_147 = arith.constant 0 : index
    %274 = vector.load %arg16[%c0_146, %c0_147] : memref<2x96xf32, #tpu.memory_space<vmem>>, vector<1x32xf32>
    tpu.vector_store %arg16[%c0_146, %c0_147], %273 {strides = array<i32>} : memref<2x96xf32, #tpu.memory_space<vmem>>, vector<1x32xf32>,
    %c0_i32_148 = arith.constant 0 : i32
    %275 = arith.addi %c0_i32_148, %269 : i32
    %276 = arith.index_cast %275 : i32 to index
    %c0_149 = arith.constant 0 : index
    %277 = vector.load %arg14[%276, %c0_149] : memref<24x32xf32, #tpu.memory_space<vmem>>, vector<1x32xf32>
    %c0_150 = arith.constant 0 : index
    %c32_151 = arith.constant 32 : index
    %278 = vector.load %arg16[%c0_150, %c32_151] : memref<2x96xf32, #tpu.memory_space<vmem>>, vector<1x32xf32>
    tpu.vector_store %arg16[%c0_150, %c32_151], %277 {strides = array<i32>} : memref<2x96xf32, #tpu.memory_space<vmem>>, vector<1x32xf32>,
    %c18 = arith.constant 18 : index
    %279 = memref.load %arg1[%c18] : memref<60xi32, #tpu.memory_space<smem>>
    %c19 = arith.constant 19 : index
    %280 = memref.load %arg1[%c19] : memref<60xi32, #tpu.memory_space<smem>>
    %c6_i32_152 = arith.constant 6 : i32
    %281 = arith.addi %c6_i32_152, %280 : i32
    %282 = arith.index_cast %281 : i32 to index
    %c0_153 = arith.constant 0 : index
    %283 = vector.load %arg15[%282, %c0_153] : memref<12x32xf32, #tpu.memory_space<vmem>>, vector<1x32xf32>
    %c1_154 = arith.constant 1 : index
    %c0_155 = arith.constant 0 : index
    %284 = vector.load %arg16[%c1_154, %c0_155] : memref<2x96xf32, #tpu.memory_space<vmem>>, vector<1x32xf32>
    tpu.vector_store %arg16[%c1_154, %c0_155], %283 {strides = array<i32>} : memref<2x96xf32, #tpu.memory_space<vmem>>, vector<1x32xf32>,
    %c12_i32_156 = arith.constant 12 : i32
    %285 = arith.addi %c12_i32_156, %279 : i32
    %286 = arith.index_cast %285 : i32 to index
    %c0_157 = arith.constant 0 : index
    %287 = vector.load %arg14[%286, %c0_157] : memref<24x32xf32, #tpu.memory_space<vmem>>, vector<1x32xf32>
    %c1_158 = arith.constant 1 : index
    %c32_159 = arith.constant 32 : index
    %288 = vector.load %arg16[%c1_158, %c32_159] : memref<2x96xf32, #tpu.memory_space<vmem>>, vector<1x32xf32>
    tpu.vector_store %arg16[%c1_158, %c32_159], %287 {strides = array<i32>} : memref<2x96xf32, #tpu.memory_space<vmem>>, vector<1x32xf32>,
    %c0_160 = arith.constant 0 : index
    %c0_161 = arith.constant 0 : index
    %289 = vector.load %arg16[%c0_160, %c0_161] : memref<2x96xf32, #tpu.memory_space<vmem>>, vector<2x64xf32>
    %cst_162 = arith.constant dense<0.000000e+00> : vector<2x128xf32>
    %290 = tpu.matmul %289, %8, %cst_162 {dimension_numbers = #tpu.dot_dimension_numbers<[1], [0], [0], [1], [0, 0, 1, 1], [], []>} : vector<2x64xf32>, vector<64x128xf32>, vector<2x128xf32> -> vector<2x128xf32>
    %291 = vector.broadcast %13 : vector<1x128xf32> to vector<2x128xf32>
    %292 = arith.addf %290, %291 : vector<2x128xf32>
    %293 = vector.extract_strided_slice %292 {offsets = [0, 0], sizes = [2, 32], strides = [1, 1]} : vector<2x128xf32> to vector<2x32xf32>
    %294 = math.tanh %293 : vector<2x32xf32>
    %295 = vector.extract_strided_slice %292 {offsets = [0, 32], sizes = [2, 32], strides = [1, 1]} : vector<2x128xf32> to vector<2x32xf32>
    %cst_163 = arith.constant 0.000000e+00 : f32
    %296 = vector.broadcast %cst_163 : f32 to vector<2x32xf32>
    %297 = arith.subf %296, %295 : vector<2x32xf32>
    %298 = math.exp %297 : vector<2x32xf32>
    %cst_164 = arith.constant 1.000000e+00 : f32
    %299 = vector.broadcast %cst_164 : f32 to vector<2x32xf32>
    %300 = arith.addf %299, %298 : vector<2x32xf32>
    %cst_165 = arith.constant 1.000000e+00 : f32
    %301 = vector.broadcast %cst_165 : f32 to vector<2x32xf32>
    %302 = arith.divf %301, %300 : vector<2x32xf32>
    %303 = arith.mulf %294, %302 : vector<2x32xf32>
    %304 = vector.extract_strided_slice %292 {offsets = [0, 64], sizes = [2, 32], strides = [1, 1]} : vector<2x128xf32> to vector<2x32xf32>
    %305 = math.tanh %304 : vector<2x32xf32>
    %306 = vector.extract_strided_slice %292 {offsets = [0, 96], sizes = [2, 32], strides = [1, 1]} : vector<2x128xf32> to vector<2x32xf32>
    %cst_166 = arith.constant 0.000000e+00 : f32
    %307 = vector.broadcast %cst_166 : f32 to vector<2x32xf32>
    %308 = arith.subf %307, %306 : vector<2x32xf32>
    %309 = math.exp %308 : vector<2x32xf32>
    %cst_167 = arith.constant 1.000000e+00 : f32
    %310 = vector.broadcast %cst_167 : f32 to vector<2x32xf32>
    %311 = arith.addf %310, %309 : vector<2x32xf32>
    %cst_168 = arith.constant 1.000000e+00 : f32
    %312 = vector.broadcast %cst_168 : f32 to vector<2x32xf32>
    %313 = arith.divf %312, %311 : vector<2x32xf32>
    %314 = arith.mulf %305, %313 : vector<2x32xf32>
    %315 = arith.subf %314, %303 : vector<2x32xf32>
    %316 = vector.broadcast %266 : vector<2x1xf32> to vector<2x32xf32>
    %317 = arith.mulf %316, %315 : vector<2x32xf32>
    %318 = arith.addf %303, %317 : vector<2x32xf32>
    %cst_169 = arith.constant dense<0.000000e+00> : vector<2x32xf32>
    %319 = tpu.matmul %318, %11, %cst_169 {dimension_numbers = #tpu.dot_dimension_numbers<[1], [0], [0], [1], [0, 0, 1, 1], [], []>} : vector<2x32xf32>, vector<32x32xf32>, vector<2x32xf32> -> vector<2x32xf32>
    %320 = vector.broadcast %16 : vector<1x32xf32> to vector<2x32xf32>
    %321 = arith.addf %319, %320 : vector<2x32xf32>
    %322 = vector.shape_cast %321 : vector<2x32xf32> to vector<2x1x32xf32>
    %323 = vector.broadcast %322 : vector<2x1x32xf32> to vector<2x8x32xf32>
    %324 = arith.addf %22, %323 : vector<2x8x32xf32>
    %325 = math.tanh %324 : vector<2x8x32xf32>
    %326 = vector.shape_cast %17 : vector<1x32xf32> to vector<1x1x32xf32>
    %327 = vector.broadcast %326 : vector<1x1x32xf32> to vector<2x8x32xf32>
    %328 = arith.mulf %325, %327 : vector<2x8x32xf32>
    %cst_170 = arith.constant dense<0.000000e+00> : vector<2x8xf32>
    %329 = vector.multi_reduction <add>, %328, %cst_170 [2] : vector<2x8x32xf32> to vector<2x8xf32>
    %330 = vector.broadcast %19 : vector<1x1xf32> to vector<2x8xf32>
    %331 = arith.addf %329, %330 : vector<2x8xf32>
    %cst_171 = arith.constant -9.99999995E+11 : f32
    %332 = vector.broadcast %cst_171 : f32 to vector<2x8xf32>
    %333 = arith.select %26, %331, %332 : vector<2x8xi1>, vector<2x8xf32>
    %cst_172 = arith.constant dense<0xFF800000> : vector<2xf32>
    %334 = vector.multi_reduction <maximumf>, %333, %cst_172 [1] : vector<2x8xf32> to vector<2xf32>
    %335 = vector.shape_cast %334 : vector<2xf32> to vector<2x1xf32>
    %336 = vector.broadcast %335 : vector<2x1xf32> to vector<2x8xf32>
    %337 = arith.subf %333, %336 : vector<2x8xf32>
    %338 = math.exp %337 : vector<2x8xf32>
    %cst_173 = arith.constant dense<0.000000e+00> : vector<2xf32>
    %339 = vector.multi_reduction <add>, %338, %cst_173 [1] : vector<2x8xf32> to vector<2xf32>
    %340 = vector.shape_cast %339 : vector<2xf32> to vector<2x1xf32>
    %341 = tpu.reciprocal %340 {approx = true} : vector<2x1xf32> -> vector<2x1xf32>
    %342 = vector.broadcast %341 : vector<2x1xf32> to vector<2x8xf32>
    %343 = arith.mulf %338, %342 : vector<2x8xf32>
    %344 = vector.shape_cast %343 : vector<2x8xf32> to vector<2x8x1xf32>
    %345 = vector.broadcast %344 : vector<2x8x1xf32> to vector<2x8x32xf32>
    %346 = arith.mulf %345, %21 : vector<2x8x32xf32>
    %cst_174 = arith.constant dense<0.000000e+00> : vector<2x32xf32>
    %347 = vector.multi_reduction <add>, %346, %cst_174 [1] : vector<2x8x32xf32> to vector<2x32xf32>
    %c1_175 = arith.constant 1 : index
    %c0_176 = arith.constant 0 : index
    %c0_177 = arith.constant 0 : index
    %348 = vector.load %arg11[%c1_175, %c0_176, %c0_177] : memref<5x2x32xf32, #tpu.memory_space<vmem>>, vector<1x2x32xf32>
    %349 = vector.shape_cast %348 : vector<1x2x32xf32> to vector<2x32xf32>
    %350 = tpu.concatenate %318, %347, %349 in 1 : vector<2x32xf32>, vector<2x32xf32>, vector<2x32xf32> -> vector<2x96xf32>
    %cst_178 = arith.constant dense<0.000000e+00> : vector<2x160xf32>
    %351 = tpu.matmul %350, %9, %cst_178 {dimension_numbers = #tpu.dot_dimension_numbers<[1], [0], [0], [1], [0, 0, 1, 1], [], []>} : vector<2x96xf32>, vector<96x160xf32>, vector<2x160xf32> -> vector<2x160xf32>
    %352 = vector.broadcast %14 : vector<1x160xf32> to vector<2x160xf32>
    %353 = arith.addf %351, %352 : vector<2x160xf32>
    %354 = vector.extract_strided_slice %353 {offsets = [0, 0], sizes = [2, 32], strides = [1, 1]} : vector<2x160xf32> to vector<2x32xf32>
    %355 = math.tanh %354 : vector<2x32xf32>
    %356 = vector.extract_strided_slice %353 {offsets = [0, 32], sizes = [2, 32], strides = [1, 1]} : vector<2x160xf32> to vector<2x32xf32>
    %cst_179 = arith.constant 0.000000e+00 : f32
    %357 = vector.broadcast %cst_179 : f32 to vector<2x32xf32>
    %358 = arith.subf %357, %356 : vector<2x32xf32>
    %359 = math.exp %358 : vector<2x32xf32>
    %cst_180 = arith.constant 1.000000e+00 : f32
    %360 = vector.broadcast %cst_180 : f32 to vector<2x32xf32>
    %361 = arith.addf %360, %359 : vector<2x32xf32>
    %cst_181 = arith.constant 1.000000e+00 : f32
    %362 = vector.broadcast %cst_181 : f32 to vector<2x32xf32>
    %363 = arith.divf %362, %361 : vector<2x32xf32>
    %364 = arith.mulf %355, %363 : vector<2x32xf32>
    %365 = vector.extract_strided_slice %353 {offsets = [0, 64], sizes = [2, 32], strides = [1, 1]} : vector<2x160xf32> to vector<2x32xf32>
    %366 = math.tanh %365 : vector<2x32xf32>
    %367 = vector.extract_strided_slice %353 {offsets = [0, 96], sizes = [2, 32], strides = [1, 1]} : vector<2x160xf32> to vector<2x32xf32>
    %cst_182 = arith.constant 0.000000e+00 : f32
    %368 = vector.broadcast %cst_182 : f32 to vector<2x32xf32>
    %369 = arith.subf %368, %367 : vector<2x32xf32>
    %370 = math.exp %369 : vector<2x32xf32>
    %cst_183 = arith.constant 1.000000e+00 : f32
    %371 = vector.broadcast %cst_183 : f32 to vector<2x32xf32>
    %372 = arith.addf %371, %370 : vector<2x32xf32>
    %cst_184 = arith.constant 1.000000e+00 : f32
    %373 = vector.broadcast %cst_184 : f32 to vector<2x32xf32>
    %374 = arith.divf %373, %372 : vector<2x32xf32>
    %375 = arith.mulf %366, %374 : vector<2x32xf32>
    %376 = vector.extract_strided_slice %353 {offsets = [0, 128], sizes = [2, 32], strides = [1, 1]} : vector<2x160xf32> to vector<2x32xf32>
    %377 = vector.shape_cast %376 : vector<2x32xf32> to vector<2x1x32xf32>
    %378 = vector.broadcast %377 : vector<2x1x32xf32> to vector<2x8x32xf32>
    %379 = arith.addf %23, %378 : vector<2x8x32xf32>
    %380 = math.tanh %379 : vector<2x8x32xf32>
    %381 = vector.shape_cast %18 : vector<1x32xf32> to vector<1x1x32xf32>
    %382 = vector.broadcast %381 : vector<1x1x32xf32> to vector<2x8x32xf32>
    %383 = arith.mulf %380, %382 : vector<2x8x32xf32>
    %cst_185 = arith.constant dense<0.000000e+00> : vector<2x8xf32>
    %384 = vector.multi_reduction <add>, %383, %cst_185 [2] : vector<2x8x32xf32> to vector<2x8xf32>
    %385 = vector.broadcast %20 : vector<1x1xf32> to vector<2x8xf32>
    %386 = arith.addf %384, %385 : vector<2x8xf32>
    %cst_186 = arith.constant -9.99999995E+11 : f32
    %387 = vector.broadcast %cst_186 : f32 to vector<2x8xf32>
    %388 = arith.select %29, %386, %387 : vector<2x8xi1>, vector<2x8xf32>
    %c1_187 = arith.constant 1 : index
    %c0_188 = arith.constant 0 : index
    %c0_189 = arith.constant 0 : index
    %389 = vector.load %arg13[%c1_187, %c0_188, %c0_189] : memref<5x2x8xf32, #tpu.memory_space<vmem>>, vector<1x2x8xf32>
    %390 = vector.shape_cast %389 : vector<1x2x8xf32> to vector<2x8xf32>
    %391 = vector.shape_cast %388 : vector<2x8xf32> to vector<1x2x8xf32>
    tpu.vector_store %arg13[%c1_187, %c0_188, %c0_189], %391 {strides = array<i32>} : memref<5x2x8xf32, #tpu.memory_space<vmem>>, vector<1x2x8xf32>,
    %392 = vector.broadcast %268 : vector<2x1xf32> to vector<2x32xf32>
    %393 = arith.mulf %364, %392 : vector<2x32xf32>
    %394 = vector.broadcast %268 : vector<2x1xf32> to vector<2x32xf32>
    %395 = arith.mulf %375, %394 : vector<2x32xf32>
    %396 = vector.extract_strided_slice %393 {offsets = [0, 0], sizes = [1, 32], strides = [1, 1]} : vector<2x32xf32> to vector<1x32xf32>
    %c4_190 = arith.constant 4 : index
    %c0_191 = arith.constant 0 : index
    %397 = vector.load %arg14[%c4_190, %c0_191] : memref<24x32xf32, #tpu.memory_space<vmem>>, vector<1x32xf32>
    tpu.vector_store %arg14[%c4_190, %c0_191], %396 {strides = array<i32>} : memref<24x32xf32, #tpu.memory_space<vmem>>, vector<1x32xf32>,
    %398 = vector.extract_strided_slice %395 {offsets = [0, 0], sizes = [1, 32], strides = [1, 1]} : vector<2x32xf32> to vector<1x32xf32>
    %c5_192 = arith.constant 5 : index
    %c0_193 = arith.constant 0 : index
    %399 = vector.load %arg14[%c5_192, %c0_193] : memref<24x32xf32, #tpu.memory_space<vmem>>, vector<1x32xf32>
    tpu.vector_store %arg14[%c5_192, %c0_193], %398 {strides = array<i32>} : memref<24x32xf32, #tpu.memory_space<vmem>>, vector<1x32xf32>,
    %400 = vector.extract_strided_slice %393 {offsets = [1, 0], sizes = [1, 32], strides = [1, 1]} : vector<2x32xf32> to vector<1x32xf32>
    %c16 = arith.constant 16 : index
    %c0_194 = arith.constant 0 : index
    %401 = vector.load %arg14[%c16, %c0_194] : memref<24x32xf32, #tpu.memory_space<vmem>>, vector<1x32xf32>
    tpu.vector_store %arg14[%c16, %c0_194], %400 {strides = array<i32>} : memref<24x32xf32, #tpu.memory_space<vmem>>, vector<1x32xf32>,
    %402 = vector.extract_strided_slice %395 {offsets = [1, 0], sizes = [1, 32], strides = [1, 1]} : vector<2x32xf32> to vector<1x32xf32>
    %c17 = arith.constant 17 : index
    %c0_195 = arith.constant 0 : index
    %403 = vector.load %arg14[%c17, %c0_195] : memref<24x32xf32, #tpu.memory_space<vmem>>, vector<1x32xf32>
    tpu.vector_store %arg14[%c17, %c0_195], %402 {strides = array<i32>} : memref<24x32xf32, #tpu.memory_space<vmem>>, vector<1x32xf32>,
    %c1_196 = arith.constant 1 : index
    %c0_197 = arith.constant 0 : index
    %c0_198 = arith.constant 0 : index
    %404 = vector.load %arg12[%c1_196, %c0_197, %c0_198] : memref<5x2x32xf32, #tpu.memory_space<vmem>>, vector<1x2x32xf32>
    %405 = vector.shape_cast %404 : vector<1x2x32xf32> to vector<2x32xf32>
    %c14_199 = arith.constant 14 : index
    %406 = memref.load %arg1[%c14_199] : memref<60xi32, #tpu.memory_space<smem>>
    %c15_200 = arith.constant 15 : index
    %407 = memref.load %arg1[%c15_200] : memref<60xi32, #tpu.memory_space<smem>>
    %c0_i32_201 = arith.constant 0 : i32
    %408 = arith.addi %c0_i32_201, %406 : i32
    %409 = arith.index_cast %408 : i32 to index
    %c0_202 = arith.constant 0 : index
    %410 = vector.load %arg15[%409, %c0_202] : memref<12x32xf32, #tpu.memory_space<vmem>>, vector<1x32xf32>
    %c0_203 = arith.constant 0 : index
    %c0_204 = arith.constant 0 : index
    %411 = vector.load %arg16[%c0_203, %c0_204] : memref<2x96xf32, #tpu.memory_space<vmem>>, vector<1x32xf32>
    tpu.vector_store %arg16[%c0_203, %c0_204], %410 {strides = array<i32>} : memref<2x96xf32, #tpu.memory_space<vmem>>, vector<1x32xf32>,
    %c0_i32_205 = arith.constant 0 : i32
    %412 = arith.addi %c0_i32_205, %407 : i32
    %413 = arith.index_cast %412 : i32 to index
    %c0_206 = arith.constant 0 : index
    %414 = vector.load %arg15[%413, %c0_206] : memref<12x32xf32, #tpu.memory_space<vmem>>, vector<1x32xf32>
    %c0_207 = arith.constant 0 : index
    %c32_208 = arith.constant 32 : index
    %415 = vector.load %arg16[%c0_207, %c32_208] : memref<2x96xf32, #tpu.memory_space<vmem>>, vector<1x32xf32>
    tpu.vector_store %arg16[%c0_207, %c32_208], %414 {strides = array<i32>} : memref<2x96xf32, #tpu.memory_space<vmem>>, vector<1x32xf32>,
    %c20 = arith.constant 20 : index
    %416 = memref.load %arg1[%c20] : memref<60xi32, #tpu.memory_space<smem>>
    %c21 = arith.constant 21 : index
    %417 = memref.load %arg1[%c21] : memref<60xi32, #tpu.memory_space<smem>>
    %c6_i32_209 = arith.constant 6 : i32
    %418 = arith.addi %c6_i32_209, %416 : i32
    %419 = arith.index_cast %418 : i32 to index
    %c0_210 = arith.constant 0 : index
    %420 = vector.load %arg15[%419, %c0_210] : memref<12x32xf32, #tpu.memory_space<vmem>>, vector<1x32xf32>
    %c1_211 = arith.constant 1 : index
    %c0_212 = arith.constant 0 : index
    %421 = vector.load %arg16[%c1_211, %c0_212] : memref<2x96xf32, #tpu.memory_space<vmem>>, vector<1x32xf32>
    tpu.vector_store %arg16[%c1_211, %c0_212], %420 {strides = array<i32>} : memref<2x96xf32, #tpu.memory_space<vmem>>, vector<1x32xf32>,
    %c6_i32_213 = arith.constant 6 : i32
    %422 = arith.addi %c6_i32_213, %417 : i32
    %423 = arith.index_cast %422 : i32 to index
    %c0_214 = arith.constant 0 : index
    %424 = vector.load %arg15[%423, %c0_214] : memref<12x32xf32, #tpu.memory_space<vmem>>, vector<1x32xf32>
    %c1_215 = arith.constant 1 : index
    %c32_216 = arith.constant 32 : index
    %425 = vector.load %arg16[%c1_215, %c32_216] : memref<2x96xf32, #tpu.memory_space<vmem>>, vector<1x32xf32>
    tpu.vector_store %arg16[%c1_215, %c32_216], %424 {strides = array<i32>} : memref<2x96xf32, #tpu.memory_space<vmem>>, vector<1x32xf32>,
    %c0_217 = arith.constant 0 : index
    %c64_218 = arith.constant 64 : index
    %426 = vector.load %arg16[%c0_217, %c64_218] : memref<2x96xf32, #tpu.memory_space<vmem>>, vector<2x32xf32>
    tpu.vector_store %arg16[%c0_217, %c64_218], %405 {strides = array<i32>} : memref<2x96xf32, #tpu.memory_space<vmem>>, vector<2x32xf32>,
    %c0_219 = arith.constant 0 : index
    %c0_220 = arith.constant 0 : index
    %427 = vector.load %arg16[%c0_219, %c0_220] : memref<2x96xf32, #tpu.memory_space<vmem>>, vector<2x96xf32>
    %cst_221 = arith.constant dense<0.000000e+00> : vector<2x64xf32>
    %428 = tpu.matmul %427, %10, %cst_221 {dimension_numbers = #tpu.dot_dimension_numbers<[1], [0], [0], [1], [0, 0, 1, 1], [], []>} : vector<2x96xf32>, vector<96x64xf32>, vector<2x64xf32> -> vector<2x64xf32>
    %429 = vector.broadcast %15 : vector<1x64xf32> to vector<2x64xf32>
    %430 = arith.addf %428, %429 : vector<2x64xf32>
    %431 = vector.extract_strided_slice %430 {offsets = [0, 0], sizes = [2, 32], strides = [1, 1]} : vector<2x64xf32> to vector<2x32xf32>
    %432 = math.tanh %431 : vector<2x32xf32>
    %433 = vector.extract_strided_slice %430 {offsets = [0, 32], sizes = [2, 32], strides = [1, 1]} : vector<2x64xf32> to vector<2x32xf32>
    %cst_222 = arith.constant 0.000000e+00 : f32
    %434 = vector.broadcast %cst_222 : f32 to vector<2x32xf32>
    %435 = arith.subf %434, %433 : vector<2x32xf32>
    %436 = math.exp %435 : vector<2x32xf32>
    %cst_223 = arith.constant 1.000000e+00 : f32
    %437 = vector.broadcast %cst_223 : f32 to vector<2x32xf32>
    %438 = arith.addf %437, %436 : vector<2x32xf32>
    %cst_224 = arith.constant 1.000000e+00 : f32
    %439 = vector.broadcast %cst_224 : f32 to vector<2x32xf32>
    %440 = arith.divf %439, %438 : vector<2x32xf32>
    %441 = arith.mulf %432, %440 : vector<2x32xf32>
    %442 = vector.extract_strided_slice %265 {offsets = [0, 3], sizes = [2, 1], strides = [1, 1]} : vector<2x5xf32> to vector<2x1xf32>
    %443 = arith.subf %441, %405 : vector<2x32xf32>
    %444 = vector.broadcast %442 : vector<2x1xf32> to vector<2x32xf32>
    %445 = arith.mulf %444, %443 : vector<2x32xf32>
    %446 = arith.addf %405, %445 : vector<2x32xf32>
    %c16_225 = arith.constant 16 : index
    %447 = memref.load %arg1[%c16_225] : memref<60xi32, #tpu.memory_space<smem>>
    %c17_226 = arith.constant 17 : index
    %448 = memref.load %arg1[%c17_226] : memref<60xi32, #tpu.memory_space<smem>>
    %c0_i32_227 = arith.constant 0 : i32
    %449 = arith.addi %c0_i32_227, %447 : i32
    %450 = arith.index_cast %449 : i32 to index
    %c0_228 = arith.constant 0 : index
    %451 = vector.load %arg15[%450, %c0_228] : memref<12x32xf32, #tpu.memory_space<vmem>>, vector<1x32xf32>
    %c0_229 = arith.constant 0 : index
    %c0_230 = arith.constant 0 : index
    %452 = vector.load %arg16[%c0_229, %c0_230] : memref<2x96xf32, #tpu.memory_space<vmem>>, vector<1x32xf32>
    tpu.vector_store %arg16[%c0_229, %c0_230], %451 {strides = array<i32>} : memref<2x96xf32, #tpu.memory_space<vmem>>, vector<1x32xf32>,
    %c0_i32_231 = arith.constant 0 : i32
    %453 = arith.addi %c0_i32_231, %448 : i32
    %454 = arith.index_cast %453 : i32 to index
    %c0_232 = arith.constant 0 : index
    %455 = vector.load %arg15[%454, %c0_232] : memref<12x32xf32, #tpu.memory_space<vmem>>, vector<1x32xf32>
    %c0_233 = arith.constant 0 : index
    %c32_234 = arith.constant 32 : index
    %456 = vector.load %arg16[%c0_233, %c32_234] : memref<2x96xf32, #tpu.memory_space<vmem>>, vector<1x32xf32>
    tpu.vector_store %arg16[%c0_233, %c32_234], %455 {strides = array<i32>} : memref<2x96xf32, #tpu.memory_space<vmem>>, vector<1x32xf32>,
    %c22 = arith.constant 22 : index
    %457 = memref.load %arg1[%c22] : memref<60xi32, #tpu.memory_space<smem>>
    %c23 = arith.constant 23 : index
    %458 = memref.load %arg1[%c23] : memref<60xi32, #tpu.memory_space<smem>>
    %c6_i32_235 = arith.constant 6 : i32
    %459 = arith.addi %c6_i32_235, %457 : i32
    %460 = arith.index_cast %459 : i32 to index
    %c0_236 = arith.constant 0 : index
    %461 = vector.load %arg15[%460, %c0_236] : memref<12x32xf32, #tpu.memory_space<vmem>>, vector<1x32xf32>
    %c1_237 = arith.constant 1 : index
    %c0_238 = arith.constant 0 : index
    %462 = vector.load %arg16[%c1_237, %c0_238] : memref<2x96xf32, #tpu.memory_space<vmem>>, vector<1x32xf32>
    tpu.vector_store %arg16[%c1_237, %c0_238], %461 {strides = array<i32>} : memref<2x96xf32, #tpu.memory_space<vmem>>, vector<1x32xf32>,
    %c6_i32_239 = arith.constant 6 : i32
    %463 = arith.addi %c6_i32_239, %458 : i32
    %464 = arith.index_cast %463 : i32 to index
    %c0_240 = arith.constant 0 : index
    %465 = vector.load %arg15[%464, %c0_240] : memref<12x32xf32, #tpu.memory_space<vmem>>, vector<1x32xf32>
    %c1_241 = arith.constant 1 : index
    %c32_242 = arith.constant 32 : index
    %466 = vector.load %arg16[%c1_241, %c32_242] : memref<2x96xf32, #tpu.memory_space<vmem>>, vector<1x32xf32>
    tpu.vector_store %arg16[%c1_241, %c32_242], %465 {strides = array<i32>} : memref<2x96xf32, #tpu.memory_space<vmem>>, vector<1x32xf32>,
    %c0_243 = arith.constant 0 : index
    %c64_244 = arith.constant 64 : index
    %467 = vector.load %arg16[%c0_243, %c64_244] : memref<2x96xf32, #tpu.memory_space<vmem>>, vector<2x32xf32>
    tpu.vector_store %arg16[%c0_243, %c64_244], %446 {strides = array<i32>} : memref<2x96xf32, #tpu.memory_space<vmem>>, vector<2x32xf32>,
    %c0_245 = arith.constant 0 : index
    %c0_246 = arith.constant 0 : index
    %468 = vector.load %arg16[%c0_245, %c0_246] : memref<2x96xf32, #tpu.memory_space<vmem>>, vector<2x96xf32>
    %cst_247 = arith.constant dense<0.000000e+00> : vector<2x64xf32>
    %469 = tpu.matmul %468, %10, %cst_247 {dimension_numbers = #tpu.dot_dimension_numbers<[1], [0], [0], [1], [0, 0, 1, 1], [], []>} : vector<2x96xf32>, vector<96x64xf32>, vector<2x64xf32> -> vector<2x64xf32>
    %470 = vector.broadcast %15 : vector<1x64xf32> to vector<2x64xf32>
    %471 = arith.addf %469, %470 : vector<2x64xf32>
    %472 = vector.extract_strided_slice %471 {offsets = [0, 0], sizes = [2, 32], strides = [1, 1]} : vector<2x64xf32> to vector<2x32xf32>
    %473 = math.tanh %472 : vector<2x32xf32>
    %474 = vector.extract_strided_slice %471 {offsets = [0, 32], sizes = [2, 32], strides = [1, 1]} : vector<2x64xf32> to vector<2x32xf32>
    %cst_248 = arith.constant 0.000000e+00 : f32
    %475 = vector.broadcast %cst_248 : f32 to vector<2x32xf32>
    %476 = arith.subf %475, %474 : vector<2x32xf32>
    %477 = math.exp %476 : vector<2x32xf32>
    %cst_249 = arith.constant 1.000000e+00 : f32
    %478 = vector.broadcast %cst_249 : f32 to vector<2x32xf32>
    %479 = arith.addf %478, %477 : vector<2x32xf32>
    %cst_250 = arith.constant 1.000000e+00 : f32
    %480 = vector.broadcast %cst_250 : f32 to vector<2x32xf32>
    %481 = arith.divf %480, %479 : vector<2x32xf32>
    %482 = arith.mulf %473, %481 : vector<2x32xf32>
    %483 = vector.extract_strided_slice %265 {offsets = [0, 4], sizes = [2, 1], strides = [1, 1]} : vector<2x5xf32> to vector<2x1xf32>
    %484 = arith.subf %482, %446 : vector<2x32xf32>
    %485 = vector.broadcast %483 : vector<2x1xf32> to vector<2x32xf32>
    %486 = arith.mulf %485, %484 : vector<2x32xf32>
    %487 = arith.addf %446, %486 : vector<2x32xf32>
    %488 = arith.subf %349, %487 : vector<2x32xf32>
    %489 = vector.broadcast %267 : vector<2x1xf32> to vector<2x32xf32>
    %490 = arith.mulf %489, %488 : vector<2x32xf32>
    %491 = arith.addf %487, %490 : vector<2x32xf32>
    %492 = vector.broadcast %268 : vector<2x1xf32> to vector<2x32xf32>
    %493 = arith.mulf %491, %492 : vector<2x32xf32>
    %494 = vector.extract_strided_slice %493 {offsets = [0, 0], sizes = [1, 32], strides = [1, 1]} : vector<2x32xf32> to vector<1x32xf32>
    %c2_251 = arith.constant 2 : index
    %c0_252 = arith.constant 0 : index
    %495 = vector.load %arg15[%c2_251, %c0_252] : memref<12x32xf32, #tpu.memory_space<vmem>>, vector<1x32xf32>
    tpu.vector_store %arg15[%c2_251, %c0_252], %494 {strides = array<i32>} : memref<12x32xf32, #tpu.memory_space<vmem>>, vector<1x32xf32>,
    %496 = vector.extract_strided_slice %493 {offsets = [1, 0], sizes = [1, 32], strides = [1, 1]} : vector<2x32xf32> to vector<1x32xf32>
    %c8_253 = arith.constant 8 : index
    %c0_254 = arith.constant 0 : index
    %497 = vector.load %arg15[%c8_253, %c0_254] : memref<12x32xf32, #tpu.memory_space<vmem>>, vector<1x32xf32>
    tpu.vector_store %arg15[%c8_253, %c0_254], %496 {strides = array<i32>} : memref<12x32xf32, #tpu.memory_space<vmem>>, vector<1x32xf32>,
    %c2_255 = arith.constant 2 : index
    %c0_256 = arith.constant 0 : index
    %c0_257 = arith.constant 0 : index
    %498 = vector.load %arg8[%c2_255, %c0_256, %c0_257] : memref<5x2x5xf32, #tpu.memory_space<vmem>>, vector<1x2x5xf32>
    %499 = vector.shape_cast %498 : vector<1x2x5xf32> to vector<2x5xf32>
    %500 = vector.extract_strided_slice %499 {offsets = [0, 0], sizes = [2, 1], strides = [1, 1]} : vector<2x5xf32> to vector<2x1xf32>
    %501 = vector.extract_strided_slice %499 {offsets = [0, 1], sizes = [2, 1], strides = [1, 1]} : vector<2x5xf32> to vector<2x1xf32>
    %502 = vector.extract_strided_slice %499 {offsets = [0, 2], sizes = [2, 1], strides = [1, 1]} : vector<2x5xf32> to vector<2x1xf32>
    %c24 = arith.constant 24 : index
    %503 = memref.load %arg1[%c24] : memref<60xi32, #tpu.memory_space<smem>>
    %c25 = arith.constant 25 : index
    %504 = memref.load %arg1[%c25] : memref<60xi32, #tpu.memory_space<smem>>
    %c0_i32_258 = arith.constant 0 : i32
    %505 = arith.addi %c0_i32_258, %504 : i32
    %506 = arith.index_cast %505 : i32 to index
    %c0_259 = arith.constant 0 : index
    %507 = vector.load %arg15[%506, %c0_259] : memref<12x32xf32, #tpu.memory_space<vmem>>, vector<1x32xf32>
    %c0_260 = arith.constant 0 : index
    %c0_261 = arith.constant 0 : index
    %508 = vector.load %arg16[%c0_260, %c0_261] : memref<2x96xf32, #tpu.memory_space<vmem>>, vector<1x32xf32>
    tpu.vector_store %arg16[%c0_260, %c0_261], %507 {strides = array<i32>} : memref<2x96xf32, #tpu.memory_space<vmem>>, vector<1x32xf32>,
    %c0_i32_262 = arith.constant 0 : i32
    %509 = arith.addi %c0_i32_262, %503 : i32
    %510 = arith.index_cast %509 : i32 to index
    %c0_263 = arith.constant 0 : index
    %511 = vector.load %arg14[%510, %c0_263] : memref<24x32xf32, #tpu.memory_space<vmem>>, vector<1x32xf32>
    %c0_264 = arith.constant 0 : index
    %c32_265 = arith.constant 32 : index
    %512 = vector.load %arg16[%c0_264, %c32_265] : memref<2x96xf32, #tpu.memory_space<vmem>>, vector<1x32xf32>
    tpu.vector_store %arg16[%c0_264, %c32_265], %511 {strides = array<i32>} : memref<2x96xf32, #tpu.memory_space<vmem>>, vector<1x32xf32>,
    %c30 = arith.constant 30 : index
    %513 = memref.load %arg1[%c30] : memref<60xi32, #tpu.memory_space<smem>>
    %c31 = arith.constant 31 : index
    %514 = memref.load %arg1[%c31] : memref<60xi32, #tpu.memory_space<smem>>
    %c6_i32_266 = arith.constant 6 : i32
    %515 = arith.addi %c6_i32_266, %514 : i32
    %516 = arith.index_cast %515 : i32 to index
    %c0_267 = arith.constant 0 : index
    %517 = vector.load %arg15[%516, %c0_267] : memref<12x32xf32, #tpu.memory_space<vmem>>, vector<1x32xf32>
    %c1_268 = arith.constant 1 : index
    %c0_269 = arith.constant 0 : index
    %518 = vector.load %arg16[%c1_268, %c0_269] : memref<2x96xf32, #tpu.memory_space<vmem>>, vector<1x32xf32>
    tpu.vector_store %arg16[%c1_268, %c0_269], %517 {strides = array<i32>} : memref<2x96xf32, #tpu.memory_space<vmem>>, vector<1x32xf32>,
    %c12_i32_270 = arith.constant 12 : i32
    %519 = arith.addi %c12_i32_270, %513 : i32
    %520 = arith.index_cast %519 : i32 to index
    %c0_271 = arith.constant 0 : index
    %521 = vector.load %arg14[%520, %c0_271] : memref<24x32xf32, #tpu.memory_space<vmem>>, vector<1x32xf32>
    %c1_272 = arith.constant 1 : index
    %c32_273 = arith.constant 32 : index
    %522 = vector.load %arg16[%c1_272, %c32_273] : memref<2x96xf32, #tpu.memory_space<vmem>>, vector<1x32xf32>
    tpu.vector_store %arg16[%c1_272, %c32_273], %521 {strides = array<i32>} : memref<2x96xf32, #tpu.memory_space<vmem>>, vector<1x32xf32>,
    %c0_274 = arith.constant 0 : index
    %c0_275 = arith.constant 0 : index
    %523 = vector.load %arg16[%c0_274, %c0_275] : memref<2x96xf32, #tpu.memory_space<vmem>>, vector<2x64xf32>
    %cst_276 = arith.constant dense<0.000000e+00> : vector<2x128xf32>
    %524 = tpu.matmul %523, %8, %cst_276 {dimension_numbers = #tpu.dot_dimension_numbers<[1], [0], [0], [1], [0, 0, 1, 1], [], []>} : vector<2x64xf32>, vector<64x128xf32>, vector<2x128xf32> -> vector<2x128xf32>
    %525 = vector.broadcast %13 : vector<1x128xf32> to vector<2x128xf32>
    %526 = arith.addf %524, %525 : vector<2x128xf32>
    %527 = vector.extract_strided_slice %526 {offsets = [0, 0], sizes = [2, 32], strides = [1, 1]} : vector<2x128xf32> to vector<2x32xf32>
    %528 = math.tanh %527 : vector<2x32xf32>
    %529 = vector.extract_strided_slice %526 {offsets = [0, 32], sizes = [2, 32], strides = [1, 1]} : vector<2x128xf32> to vector<2x32xf32>
    %cst_277 = arith.constant 0.000000e+00 : f32
    %530 = vector.broadcast %cst_277 : f32 to vector<2x32xf32>
    %531 = arith.subf %530, %529 : vector<2x32xf32>
    %532 = math.exp %531 : vector<2x32xf32>
    %cst_278 = arith.constant 1.000000e+00 : f32
    %533 = vector.broadcast %cst_278 : f32 to vector<2x32xf32>
    %534 = arith.addf %533, %532 : vector<2x32xf32>
    %cst_279 = arith.constant 1.000000e+00 : f32
    %535 = vector.broadcast %cst_279 : f32 to vector<2x32xf32>
    %536 = arith.divf %535, %534 : vector<2x32xf32>
    %537 = arith.mulf %528, %536 : vector<2x32xf32>
    %538 = vector.extract_strided_slice %526 {offsets = [0, 64], sizes = [2, 32], strides = [1, 1]} : vector<2x128xf32> to vector<2x32xf32>
    %539 = math.tanh %538 : vector<2x32xf32>
    %540 = vector.extract_strided_slice %526 {offsets = [0, 96], sizes = [2, 32], strides = [1, 1]} : vector<2x128xf32> to vector<2x32xf32>
    %cst_280 = arith.constant 0.000000e+00 : f32
    %541 = vector.broadcast %cst_280 : f32 to vector<2x32xf32>
    %542 = arith.subf %541, %540 : vector<2x32xf32>
    %543 = math.exp %542 : vector<2x32xf32>
    %cst_281 = arith.constant 1.000000e+00 : f32
    %544 = vector.broadcast %cst_281 : f32 to vector<2x32xf32>
    %545 = arith.addf %544, %543 : vector<2x32xf32>
    %cst_282 = arith.constant 1.000000e+00 : f32
    %546 = vector.broadcast %cst_282 : f32 to vector<2x32xf32>
    %547 = arith.divf %546, %545 : vector<2x32xf32>
    %548 = arith.mulf %539, %547 : vector<2x32xf32>
    %549 = arith.subf %548, %537 : vector<2x32xf32>
    %550 = vector.broadcast %500 : vector<2x1xf32> to vector<2x32xf32>
    %551 = arith.mulf %550, %549 : vector<2x32xf32>
    %552 = arith.addf %537, %551 : vector<2x32xf32>
    %cst_283 = arith.constant dense<0.000000e+00> : vector<2x32xf32>
    %553 = tpu.matmul %552, %11, %cst_283 {dimension_numbers = #tpu.dot_dimension_numbers<[1], [0], [0], [1], [0, 0, 1, 1], [], []>} : vector<2x32xf32>, vector<32x32xf32>, vector<2x32xf32> -> vector<2x32xf32>
    %554 = vector.broadcast %16 : vector<1x32xf32> to vector<2x32xf32>
    %555 = arith.addf %553, %554 : vector<2x32xf32>
    %556 = vector.shape_cast %555 : vector<2x32xf32> to vector<2x1x32xf32>
    %557 = vector.broadcast %556 : vector<2x1x32xf32> to vector<2x8x32xf32>
    %558 = arith.addf %22, %557 : vector<2x8x32xf32>
    %559 = math.tanh %558 : vector<2x8x32xf32>
    %560 = vector.shape_cast %17 : vector<1x32xf32> to vector<1x1x32xf32>
    %561 = vector.broadcast %560 : vector<1x1x32xf32> to vector<2x8x32xf32>
    %562 = arith.mulf %559, %561 : vector<2x8x32xf32>
    %cst_284 = arith.constant dense<0.000000e+00> : vector<2x8xf32>
    %563 = vector.multi_reduction <add>, %562, %cst_284 [2] : vector<2x8x32xf32> to vector<2x8xf32>
    %564 = vector.broadcast %19 : vector<1x1xf32> to vector<2x8xf32>
    %565 = arith.addf %563, %564 : vector<2x8xf32>
    %cst_285 = arith.constant -9.99999995E+11 : f32
    %566 = vector.broadcast %cst_285 : f32 to vector<2x8xf32>
    %567 = arith.select %26, %565, %566 : vector<2x8xi1>, vector<2x8xf32>
    %cst_286 = arith.constant dense<0xFF800000> : vector<2xf32>
    %568 = vector.multi_reduction <maximumf>, %567, %cst_286 [1] : vector<2x8xf32> to vector<2xf32>
    %569 = vector.shape_cast %568 : vector<2xf32> to vector<2x1xf32>
    %570 = vector.broadcast %569 : vector<2x1xf32> to vector<2x8xf32>
    %571 = arith.subf %567, %570 : vector<2x8xf32>
    %572 = math.exp %571 : vector<2x8xf32>
    %cst_287 = arith.constant dense<0.000000e+00> : vector<2xf32>
    %573 = vector.multi_reduction <add>, %572, %cst_287 [1] : vector<2x8xf32> to vector<2xf32>
    %574 = vector.shape_cast %573 : vector<2xf32> to vector<2x1xf32>
    %575 = tpu.reciprocal %574 {approx = true} : vector<2x1xf32> -> vector<2x1xf32>
    %576 = vector.broadcast %575 : vector<2x1xf32> to vector<2x8xf32>
    %577 = arith.mulf %572, %576 : vector<2x8xf32>
    %578 = vector.shape_cast %577 : vector<2x8xf32> to vector<2x8x1xf32>
    %579 = vector.broadcast %578 : vector<2x8x1xf32> to vector<2x8x32xf32>
    %580 = arith.mulf %579, %21 : vector<2x8x32xf32>
    %cst_288 = arith.constant dense<0.000000e+00> : vector<2x32xf32>
    %581 = vector.multi_reduction <add>, %580, %cst_288 [1] : vector<2x8x32xf32> to vector<2x32xf32>
    %c2_289 = arith.constant 2 : index
    %c0_290 = arith.constant 0 : index
    %c0_291 = arith.constant 0 : index
    %582 = vector.load %arg11[%c2_289, %c0_290, %c0_291] : memref<5x2x32xf32, #tpu.memory_space<vmem>>, vector<1x2x32xf32>
    %583 = vector.shape_cast %582 : vector<1x2x32xf32> to vector<2x32xf32>
    %584 = tpu.concatenate %552, %581, %583 in 1 : vector<2x32xf32>, vector<2x32xf32>, vector<2x32xf32> -> vector<2x96xf32>
    %cst_292 = arith.constant dense<0.000000e+00> : vector<2x160xf32>
    %585 = tpu.matmul %584, %9, %cst_292 {dimension_numbers = #tpu.dot_dimension_numbers<[1], [0], [0], [1], [0, 0, 1, 1], [], []>} : vector<2x96xf32>, vector<96x160xf32>, vector<2x160xf32> -> vector<2x160xf32>
    %586 = vector.broadcast %14 : vector<1x160xf32> to vector<2x160xf32>
    %587 = arith.addf %585, %586 : vector<2x160xf32>
    %588 = vector.extract_strided_slice %587 {offsets = [0, 0], sizes = [2, 32], strides = [1, 1]} : vector<2x160xf32> to vector<2x32xf32>
    %589 = math.tanh %588 : vector<2x32xf32>
    %590 = vector.extract_strided_slice %587 {offsets = [0, 32], sizes = [2, 32], strides = [1, 1]} : vector<2x160xf32> to vector<2x32xf32>
    %cst_293 = arith.constant 0.000000e+00 : f32
    %591 = vector.broadcast %cst_293 : f32 to vector<2x32xf32>
    %592 = arith.subf %591, %590 : vector<2x32xf32>
    %593 = math.exp %592 : vector<2x32xf32>
    %cst_294 = arith.constant 1.000000e+00 : f32
    %594 = vector.broadcast %cst_294 : f32 to vector<2x32xf32>
    %595 = arith.addf %594, %593 : vector<2x32xf32>
    %cst_295 = arith.constant 1.000000e+00 : f32
    %596 = vector.broadcast %cst_295 : f32 to vector<2x32xf32>
    %597 = arith.divf %596, %595 : vector<2x32xf32>
    %598 = arith.mulf %589, %597 : vector<2x32xf32>
    %599 = vector.extract_strided_slice %587 {offsets = [0, 64], sizes = [2, 32], strides = [1, 1]} : vector<2x160xf32> to vector<2x32xf32>
    %600 = math.tanh %599 : vector<2x32xf32>
    %601 = vector.extract_strided_slice %587 {offsets = [0, 96], sizes = [2, 32], strides = [1, 1]} : vector<2x160xf32> to vector<2x32xf32>
    %cst_296 = arith.constant 0.000000e+00 : f32
    %602 = vector.broadcast %cst_296 : f32 to vector<2x32xf32>
    %603 = arith.subf %602, %601 : vector<2x32xf32>
    %604 = math.exp %603 : vector<2x32xf32>
    %cst_297 = arith.constant 1.000000e+00 : f32
    %605 = vector.broadcast %cst_297 : f32 to vector<2x32xf32>
    %606 = arith.addf %605, %604 : vector<2x32xf32>
    %cst_298 = arith.constant 1.000000e+00 : f32
    %607 = vector.broadcast %cst_298 : f32 to vector<2x32xf32>
    %608 = arith.divf %607, %606 : vector<2x32xf32>
    %609 = arith.mulf %600, %608 : vector<2x32xf32>
    %610 = vector.extract_strided_slice %587 {offsets = [0, 128], sizes = [2, 32], strides = [1, 1]} : vector<2x160xf32> to vector<2x32xf32>
    %611 = vector.shape_cast %610 : vector<2x32xf32> to vector<2x1x32xf32>
    %612 = vector.broadcast %611 : vector<2x1x32xf32> to vector<2x8x32xf32>
    %613 = arith.addf %23, %612 : vector<2x8x32xf32>
    %614 = math.tanh %613 : vector<2x8x32xf32>
    %615 = vector.shape_cast %18 : vector<1x32xf32> to vector<1x1x32xf32>
    %616 = vector.broadcast %615 : vector<1x1x32xf32> to vector<2x8x32xf32>
    %617 = arith.mulf %614, %616 : vector<2x8x32xf32>
    %cst_299 = arith.constant dense<0.000000e+00> : vector<2x8xf32>
    %618 = vector.multi_reduction <add>, %617, %cst_299 [2] : vector<2x8x32xf32> to vector<2x8xf32>
    %619 = vector.broadcast %20 : vector<1x1xf32> to vector<2x8xf32>
    %620 = arith.addf %618, %619 : vector<2x8xf32>
    %cst_300 = arith.constant -9.99999995E+11 : f32
    %621 = vector.broadcast %cst_300 : f32 to vector<2x8xf32>
    %622 = arith.select %29, %620, %621 : vector<2x8xi1>, vector<2x8xf32>
    %c2_301 = arith.constant 2 : index
    %c0_302 = arith.constant 0 : index
    %c0_303 = arith.constant 0 : index
    %623 = vector.load %arg13[%c2_301, %c0_302, %c0_303] : memref<5x2x8xf32, #tpu.memory_space<vmem>>, vector<1x2x8xf32>
    %624 = vector.shape_cast %623 : vector<1x2x8xf32> to vector<2x8xf32>
    %625 = vector.shape_cast %622 : vector<2x8xf32> to vector<1x2x8xf32>
    tpu.vector_store %arg13[%c2_301, %c0_302, %c0_303], %625 {strides = array<i32>} : memref<5x2x8xf32, #tpu.memory_space<vmem>>, vector<1x2x8xf32>,
    %626 = vector.broadcast %502 : vector<2x1xf32> to vector<2x32xf32>
    %627 = arith.mulf %598, %626 : vector<2x32xf32>
    %628 = vector.broadcast %502 : vector<2x1xf32> to vector<2x32xf32>
    %629 = arith.mulf %609, %628 : vector<2x32xf32>
    %630 = vector.extract_strided_slice %627 {offsets = [0, 0], sizes = [1, 32], strides = [1, 1]} : vector<2x32xf32> to vector<1x32xf32>
    %c6_304 = arith.constant 6 : index
    %c0_305 = arith.constant 0 : index
    %631 = vector.load %arg14[%c6_304, %c0_305] : memref<24x32xf32, #tpu.memory_space<vmem>>, vector<1x32xf32>
    tpu.vector_store %arg14[%c6_304, %c0_305], %630 {strides = array<i32>} : memref<24x32xf32, #tpu.memory_space<vmem>>, vector<1x32xf32>,
    %632 = vector.extract_strided_slice %629 {offsets = [0, 0], sizes = [1, 32], strides = [1, 1]} : vector<2x32xf32> to vector<1x32xf32>
    %c7_306 = arith.constant 7 : index
    %c0_307 = arith.constant 0 : index
    %633 = vector.load %arg14[%c7_306, %c0_307] : memref<24x32xf32, #tpu.memory_space<vmem>>, vector<1x32xf32>
    tpu.vector_store %arg14[%c7_306, %c0_307], %632 {strides = array<i32>} : memref<24x32xf32, #tpu.memory_space<vmem>>, vector<1x32xf32>,
    %634 = vector.extract_strided_slice %627 {offsets = [1, 0], sizes = [1, 32], strides = [1, 1]} : vector<2x32xf32> to vector<1x32xf32>
    %c18_308 = arith.constant 18 : index
    %c0_309 = arith.constant 0 : index
    %635 = vector.load %arg14[%c18_308, %c0_309] : memref<24x32xf32, #tpu.memory_space<vmem>>, vector<1x32xf32>
    tpu.vector_store %arg14[%c18_308, %c0_309], %634 {strides = array<i32>} : memref<24x32xf32, #tpu.memory_space<vmem>>, vector<1x32xf32>,
    %636 = vector.extract_strided_slice %629 {offsets = [1, 0], sizes = [1, 32], strides = [1, 1]} : vector<2x32xf32> to vector<1x32xf32>
    %c19_310 = arith.constant 19 : index
    %c0_311 = arith.constant 0 : index
    %637 = vector.load %arg14[%c19_310, %c0_311] : memref<24x32xf32, #tpu.memory_space<vmem>>, vector<1x32xf32>
    tpu.vector_store %arg14[%c19_310, %c0_311], %636 {strides = array<i32>} : memref<24x32xf32, #tpu.memory_space<vmem>>, vector<1x32xf32>,
    %c2_312 = arith.constant 2 : index
    %c0_313 = arith.constant 0 : index
    %c0_314 = arith.constant 0 : index
    %638 = vector.load %arg12[%c2_312, %c0_313, %c0_314] : memref<5x2x32xf32, #tpu.memory_space<vmem>>, vector<1x2x32xf32>
    %639 = vector.shape_cast %638 : vector<1x2x32xf32> to vector<2x32xf32>
    %c26 = arith.constant 26 : index
    %640 = memref.load %arg1[%c26] : memref<60xi32, #tpu.memory_space<smem>>
    %c27 = arith.constant 27 : index
    %641 = memref.load %arg1[%c27] : memref<60xi32, #tpu.memory_space<smem>>
    %c0_i32_315 = arith.constant 0 : i32
    %642 = arith.addi %c0_i32_315, %640 : i32
    %643 = arith.index_cast %642 : i32 to index
    %c0_316 = arith.constant 0 : index
    %644 = vector.load %arg15[%643, %c0_316] : memref<12x32xf32, #tpu.memory_space<vmem>>, vector<1x32xf32>
    %c0_317 = arith.constant 0 : index
    %c0_318 = arith.constant 0 : index
    %645 = vector.load %arg16[%c0_317, %c0_318] : memref<2x96xf32, #tpu.memory_space<vmem>>, vector<1x32xf32>
    tpu.vector_store %arg16[%c0_317, %c0_318], %644 {strides = array<i32>} : memref<2x96xf32, #tpu.memory_space<vmem>>, vector<1x32xf32>,
    %c0_i32_319 = arith.constant 0 : i32
    %646 = arith.addi %c0_i32_319, %641 : i32
    %647 = arith.index_cast %646 : i32 to index
    %c0_320 = arith.constant 0 : index
    %648 = vector.load %arg15[%647, %c0_320] : memref<12x32xf32, #tpu.memory_space<vmem>>, vector<1x32xf32>
    %c0_321 = arith.constant 0 : index
    %c32_322 = arith.constant 32 : index
    %649 = vector.load %arg16[%c0_321, %c32_322] : memref<2x96xf32, #tpu.memory_space<vmem>>, vector<1x32xf32>
    tpu.vector_store %arg16[%c0_321, %c32_322], %648 {strides = array<i32>} : memref<2x96xf32, #tpu.memory_space<vmem>>, vector<1x32xf32>,
    %c32_323 = arith.constant 32 : index
    %650 = memref.load %arg1[%c32_323] : memref<60xi32, #tpu.memory_space<smem>>
    %c33 = arith.constant 33 : index
    %651 = memref.load %arg1[%c33] : memref<60xi32, #tpu.memory_space<smem>>
    %c6_i32_324 = arith.constant 6 : i32
    %652 = arith.addi %c6_i32_324, %650 : i32
    %653 = arith.index_cast %652 : i32 to index
    %c0_325 = arith.constant 0 : index
    %654 = vector.load %arg15[%653, %c0_325] : memref<12x32xf32, #tpu.memory_space<vmem>>, vector<1x32xf32>
    %c1_326 = arith.constant 1 : index
    %c0_327 = arith.constant 0 : index
    %655 = vector.load %arg16[%c1_326, %c0_327] : memref<2x96xf32, #tpu.memory_space<vmem>>, vector<1x32xf32>
    tpu.vector_store %arg16[%c1_326, %c0_327], %654 {strides = array<i32>} : memref<2x96xf32, #tpu.memory_space<vmem>>, vector<1x32xf32>,
    %c6_i32_328 = arith.constant 6 : i32
    %656 = arith.addi %c6_i32_328, %651 : i32
    %657 = arith.index_cast %656 : i32 to index
    %c0_329 = arith.constant 0 : index
    %658 = vector.load %arg15[%657, %c0_329] : memref<12x32xf32, #tpu.memory_space<vmem>>, vector<1x32xf32>
    %c1_330 = arith.constant 1 : index
    %c32_331 = arith.constant 32 : index
    %659 = vector.load %arg16[%c1_330, %c32_331] : memref<2x96xf32, #tpu.memory_space<vmem>>, vector<1x32xf32>
    tpu.vector_store %arg16[%c1_330, %c32_331], %658 {strides = array<i32>} : memref<2x96xf32, #tpu.memory_space<vmem>>, vector<1x32xf32>,
    %c0_332 = arith.constant 0 : index
    %c64_333 = arith.constant 64 : index
    %660 = vector.load %arg16[%c0_332, %c64_333] : memref<2x96xf32, #tpu.memory_space<vmem>>, vector<2x32xf32>
    tpu.vector_store %arg16[%c0_332, %c64_333], %639 {strides = array<i32>} : memref<2x96xf32, #tpu.memory_space<vmem>>, vector<2x32xf32>,
    %c0_334 = arith.constant 0 : index
    %c0_335 = arith.constant 0 : index
    %661 = vector.load %arg16[%c0_334, %c0_335] : memref<2x96xf32, #tpu.memory_space<vmem>>, vector<2x96xf32>
    %cst_336 = arith.constant dense<0.000000e+00> : vector<2x64xf32>
    %662 = tpu.matmul %661, %10, %cst_336 {dimension_numbers = #tpu.dot_dimension_numbers<[1], [0], [0], [1], [0, 0, 1, 1], [], []>} : vector<2x96xf32>, vector<96x64xf32>, vector<2x64xf32> -> vector<2x64xf32>
    %663 = vector.broadcast %15 : vector<1x64xf32> to vector<2x64xf32>
    %664 = arith.addf %662, %663 : vector<2x64xf32>
    %665 = vector.extract_strided_slice %664 {offsets = [0, 0], sizes = [2, 32], strides = [1, 1]} : vector<2x64xf32> to vector<2x32xf32>
    %666 = math.tanh %665 : vector<2x32xf32>
    %667 = vector.extract_strided_slice %664 {offsets = [0, 32], sizes = [2, 32], strides = [1, 1]} : vector<2x64xf32> to vector<2x32xf32>
    %cst_337 = arith.constant 0.000000e+00 : f32
    %668 = vector.broadcast %cst_337 : f32 to vector<2x32xf32>
    %669 = arith.subf %668, %667 : vector<2x32xf32>
    %670 = math.exp %669 : vector<2x32xf32>
    %cst_338 = arith.constant 1.000000e+00 : f32
    %671 = vector.broadcast %cst_338 : f32 to vector<2x32xf32>
    %672 = arith.addf %671, %670 : vector<2x32xf32>
    %cst_339 = arith.constant 1.000000e+00 : f32
    %673 = vector.broadcast %cst_339 : f32 to vector<2x32xf32>
    %674 = arith.divf %673, %672 : vector<2x32xf32>
    %675 = arith.mulf %666, %674 : vector<2x32xf32>
    %676 = vector.extract_strided_slice %499 {offsets = [0, 3], sizes = [2, 1], strides = [1, 1]} : vector<2x5xf32> to vector<2x1xf32>
    %677 = arith.subf %675, %639 : vector<2x32xf32>
    %678 = vector.broadcast %676 : vector<2x1xf32> to vector<2x32xf32>
    %679 = arith.mulf %678, %677 : vector<2x32xf32>
    %680 = arith.addf %639, %679 : vector<2x32xf32>
    %c28 = arith.constant 28 : index
    %681 = memref.load %arg1[%c28] : memref<60xi32, #tpu.memory_space<smem>>
    %c29 = arith.constant 29 : index
    %682 = memref.load %arg1[%c29] : memref<60xi32, #tpu.memory_space<smem>>
    %c0_i32_340 = arith.constant 0 : i32
    %683 = arith.addi %c0_i32_340, %681 : i32
    %684 = arith.index_cast %683 : i32 to index
    %c0_341 = arith.constant 0 : index
    %685 = vector.load %arg15[%684, %c0_341] : memref<12x32xf32, #tpu.memory_space<vmem>>, vector<1x32xf32>
    %c0_342 = arith.constant 0 : index
    %c0_343 = arith.constant 0 : index
    %686 = vector.load %arg16[%c0_342, %c0_343] : memref<2x96xf32, #tpu.memory_space<vmem>>, vector<1x32xf32>
    tpu.vector_store %arg16[%c0_342, %c0_343], %685 {strides = array<i32>} : memref<2x96xf32, #tpu.memory_space<vmem>>, vector<1x32xf32>,
    %c0_i32_344 = arith.constant 0 : i32
    %687 = arith.addi %c0_i32_344, %682 : i32
    %688 = arith.index_cast %687 : i32 to index
    %c0_345 = arith.constant 0 : index
    %689 = vector.load %arg15[%688, %c0_345] : memref<12x32xf32, #tpu.memory_space<vmem>>, vector<1x32xf32>
    %c0_346 = arith.constant 0 : index
    %c32_347 = arith.constant 32 : index
    %690 = vector.load %arg16[%c0_346, %c32_347] : memref<2x96xf32, #tpu.memory_space<vmem>>, vector<1x32xf32>
    tpu.vector_store %arg16[%c0_346, %c32_347], %689 {strides = array<i32>} : memref<2x96xf32, #tpu.memory_space<vmem>>, vector<1x32xf32>,
    %c34 = arith.constant 34 : index
    %691 = memref.load %arg1[%c34] : memref<60xi32, #tpu.memory_space<smem>>
    %c35 = arith.constant 35 : index
    %692 = memref.load %arg1[%c35] : memref<60xi32, #tpu.memory_space<smem>>
    %c6_i32_348 = arith.constant 6 : i32
    %693 = arith.addi %c6_i32_348, %691 : i32
    %694 = arith.index_cast %693 : i32 to index
    %c0_349 = arith.constant 0 : index
    %695 = vector.load %arg15[%694, %c0_349] : memref<12x32xf32, #tpu.memory_space<vmem>>, vector<1x32xf32>
    %c1_350 = arith.constant 1 : index
    %c0_351 = arith.constant 0 : index
    %696 = vector.load %arg16[%c1_350, %c0_351] : memref<2x96xf32, #tpu.memory_space<vmem>>, vector<1x32xf32>
    tpu.vector_store %arg16[%c1_350, %c0_351], %695 {strides = array<i32>} : memref<2x96xf32, #tpu.memory_space<vmem>>, vector<1x32xf32>,
    %c6_i32_352 = arith.constant 6 : i32
    %697 = arith.addi %c6_i32_352, %692 : i32
    %698 = arith.index_cast %697 : i32 to index
    %c0_353 = arith.constant 0 : index
    %699 = vector.load %arg15[%698, %c0_353] : memref<12x32xf32, #tpu.memory_space<vmem>>, vector<1x32xf32>
    %c1_354 = arith.constant 1 : index
    %c32_355 = arith.constant 32 : index
    %700 = vector.load %arg16[%c1_354, %c32_355] : memref<2x96xf32, #tpu.memory_space<vmem>>, vector<1x32xf32>
    tpu.vector_store %arg16[%c1_354, %c32_355], %699 {strides = array<i32>} : memref<2x96xf32, #tpu.memory_space<vmem>>, vector<1x32xf32>,
    %c0_356 = arith.constant 0 : index
    %c64_357 = arith.constant 64 : index
    %701 = vector.load %arg16[%c0_356, %c64_357] : memref<2x96xf32, #tpu.memory_space<vmem>>, vector<2x32xf32>
    tpu.vector_store %arg16[%c0_356, %c64_357], %680 {strides = array<i32>} : memref<2x96xf32, #tpu.memory_space<vmem>>, vector<2x32xf32>,
    %c0_358 = arith.constant 0 : index
    %c0_359 = arith.constant 0 : index
    %702 = vector.load %arg16[%c0_358, %c0_359] : memref<2x96xf32, #tpu.memory_space<vmem>>, vector<2x96xf32>
    %cst_360 = arith.constant dense<0.000000e+00> : vector<2x64xf32>
    %703 = tpu.matmul %702, %10, %cst_360 {dimension_numbers = #tpu.dot_dimension_numbers<[1], [0], [0], [1], [0, 0, 1, 1], [], []>} : vector<2x96xf32>, vector<96x64xf32>, vector<2x64xf32> -> vector<2x64xf32>
    %704 = vector.broadcast %15 : vector<1x64xf32> to vector<2x64xf32>
    %705 = arith.addf %703, %704 : vector<2x64xf32>
    %706 = vector.extract_strided_slice %705 {offsets = [0, 0], sizes = [2, 32], strides = [1, 1]} : vector<2x64xf32> to vector<2x32xf32>
    %707 = math.tanh %706 : vector<2x32xf32>
    %708 = vector.extract_strided_slice %705 {offsets = [0, 32], sizes = [2, 32], strides = [1, 1]} : vector<2x64xf32> to vector<2x32xf32>
    %cst_361 = arith.constant 0.000000e+00 : f32
    %709 = vector.broadcast %cst_361 : f32 to vector<2x32xf32>
    %710 = arith.subf %709, %708 : vector<2x32xf32>
    %711 = math.exp %710 : vector<2x32xf32>
    %cst_362 = arith.constant 1.000000e+00 : f32
    %712 = vector.broadcast %cst_362 : f32 to vector<2x32xf32>
    %713 = arith.addf %712, %711 : vector<2x32xf32>
    %cst_363 = arith.constant 1.000000e+00 : f32
    %714 = vector.broadcast %cst_363 : f32 to vector<2x32xf32>
    %715 = arith.divf %714, %713 : vector<2x32xf32>
    %716 = arith.mulf %707, %715 : vector<2x32xf32>
    %717 = vector.extract_strided_slice %499 {offsets = [0, 4], sizes = [2, 1], strides = [1, 1]} : vector<2x5xf32> to vector<2x1xf32>
    %718 = arith.subf %716, %680 : vector<2x32xf32>
    %719 = vector.broadcast %717 : vector<2x1xf32> to vector<2x32xf32>
    %720 = arith.mulf %719, %718 : vector<2x32xf32>
    %721 = arith.addf %680, %720 : vector<2x32xf32>
    %722 = arith.subf %583, %721 : vector<2x32xf32>
    %723 = vector.broadcast %501 : vector<2x1xf32> to vector<2x32xf32>
    %724 = arith.mulf %723, %722 : vector<2x32xf32>
    %725 = arith.addf %721, %724 : vector<2x32xf32>
    %726 = vector.broadcast %502 : vector<2x1xf32> to vector<2x32xf32>
    %727 = arith.mulf %725, %726 : vector<2x32xf32>
    %728 = vector.extract_strided_slice %727 {offsets = [0, 0], sizes = [1, 32], strides = [1, 1]} : vector<2x32xf32> to vector<1x32xf32>
    %c3_364 = arith.constant 3 : index
    %c0_365 = arith.constant 0 : index
    %729 = vector.load %arg15[%c3_364, %c0_365] : memref<12x32xf32, #tpu.memory_space<vmem>>, vector<1x32xf32>
    tpu.vector_store %arg15[%c3_364, %c0_365], %728 {strides = array<i32>} : memref<12x32xf32, #tpu.memory_space<vmem>>, vector<1x32xf32>,
    %730 = vector.extract_strided_slice %727 {offsets = [1, 0], sizes = [1, 32], strides = [1, 1]} : vector<2x32xf32> to vector<1x32xf32>
    %c9_366 = arith.constant 9 : index
    %c0_367 = arith.constant 0 : index
    %731 = vector.load %arg15[%c9_366, %c0_367] : memref<12x32xf32, #tpu.memory_space<vmem>>, vector<1x32xf32>
    tpu.vector_store %arg15[%c9_366, %c0_367], %730 {strides = array<i32>} : memref<12x32xf32, #tpu.memory_space<vmem>>, vector<1x32xf32>,
    %c3_368 = arith.constant 3 : index
    %c0_369 = arith.constant 0 : index
    %c0_370 = arith.constant 0 : index
    %732 = vector.load %arg8[%c3_368, %c0_369, %c0_370] : memref<5x2x5xf32, #tpu.memory_space<vmem>>, vector<1x2x5xf32>
    %733 = vector.shape_cast %732 : vector<1x2x5xf32> to vector<2x5xf32>
    %734 = vector.extract_strided_slice %733 {offsets = [0, 0], sizes = [2, 1], strides = [1, 1]} : vector<2x5xf32> to vector<2x1xf32>
    %735 = vector.extract_strided_slice %733 {offsets = [0, 1], sizes = [2, 1], strides = [1, 1]} : vector<2x5xf32> to vector<2x1xf32>
    %736 = vector.extract_strided_slice %733 {offsets = [0, 2], sizes = [2, 1], strides = [1, 1]} : vector<2x5xf32> to vector<2x1xf32>
    %c36 = arith.constant 36 : index
    %737 = memref.load %arg1[%c36] : memref<60xi32, #tpu.memory_space<smem>>
    %c37 = arith.constant 37 : index
    %738 = memref.load %arg1[%c37] : memref<60xi32, #tpu.memory_space<smem>>
    %c0_i32_371 = arith.constant 0 : i32
    %739 = arith.addi %c0_i32_371, %738 : i32
    %740 = arith.index_cast %739 : i32 to index
    %c0_372 = arith.constant 0 : index
    %741 = vector.load %arg15[%740, %c0_372] : memref<12x32xf32, #tpu.memory_space<vmem>>, vector<1x32xf32>
    %c0_373 = arith.constant 0 : index
    %c0_374 = arith.constant 0 : index
    %742 = vector.load %arg16[%c0_373, %c0_374] : memref<2x96xf32, #tpu.memory_space<vmem>>, vector<1x32xf32>
    tpu.vector_store %arg16[%c0_373, %c0_374], %741 {strides = array<i32>} : memref<2x96xf32, #tpu.memory_space<vmem>>, vector<1x32xf32>,
    %c0_i32_375 = arith.constant 0 : i32
    %743 = arith.addi %c0_i32_375, %737 : i32
    %744 = arith.index_cast %743 : i32 to index
    %c0_376 = arith.constant 0 : index
    %745 = vector.load %arg14[%744, %c0_376] : memref<24x32xf32, #tpu.memory_space<vmem>>, vector<1x32xf32>
    %c0_377 = arith.constant 0 : index
    %c32_378 = arith.constant 32 : index
    %746 = vector.load %arg16[%c0_377, %c32_378] : memref<2x96xf32, #tpu.memory_space<vmem>>, vector<1x32xf32>
    tpu.vector_store %arg16[%c0_377, %c32_378], %745 {strides = array<i32>} : memref<2x96xf32, #tpu.memory_space<vmem>>, vector<1x32xf32>,
    %c42 = arith.constant 42 : index
    %747 = memref.load %arg1[%c42] : memref<60xi32, #tpu.memory_space<smem>>
    %c43 = arith.constant 43 : index
    %748 = memref.load %arg1[%c43] : memref<60xi32, #tpu.memory_space<smem>>
    %c6_i32_379 = arith.constant 6 : i32
    %749 = arith.addi %c6_i32_379, %748 : i32
    %750 = arith.index_cast %749 : i32 to index
    %c0_380 = arith.constant 0 : index
    %751 = vector.load %arg15[%750, %c0_380] : memref<12x32xf32, #tpu.memory_space<vmem>>, vector<1x32xf32>
    %c1_381 = arith.constant 1 : index
    %c0_382 = arith.constant 0 : index
    %752 = vector.load %arg16[%c1_381, %c0_382] : memref<2x96xf32, #tpu.memory_space<vmem>>, vector<1x32xf32>
    tpu.vector_store %arg16[%c1_381, %c0_382], %751 {strides = array<i32>} : memref<2x96xf32, #tpu.memory_space<vmem>>, vector<1x32xf32>,
    %c12_i32_383 = arith.constant 12 : i32
    %753 = arith.addi %c12_i32_383, %747 : i32
    %754 = arith.index_cast %753 : i32 to index
    %c0_384 = arith.constant 0 : index
    %755 = vector.load %arg14[%754, %c0_384] : memref<24x32xf32, #tpu.memory_space<vmem>>, vector<1x32xf32>
    %c1_385 = arith.constant 1 : index
    %c32_386 = arith.constant 32 : index
    %756 = vector.load %arg16[%c1_385, %c32_386] : memref<2x96xf32, #tpu.memory_space<vmem>>, vector<1x32xf32>
    tpu.vector_store %arg16[%c1_385, %c32_386], %755 {strides = array<i32>} : memref<2x96xf32, #tpu.memory_space<vmem>>, vector<1x32xf32>,
    %c0_387 = arith.constant 0 : index
    %c0_388 = arith.constant 0 : index
    %757 = vector.load %arg16[%c0_387, %c0_388] : memref<2x96xf32, #tpu.memory_space<vmem>>, vector<2x64xf32>
    %cst_389 = arith.constant dense<0.000000e+00> : vector<2x128xf32>
    %758 = tpu.matmul %757, %8, %cst_389 {dimension_numbers = #tpu.dot_dimension_numbers<[1], [0], [0], [1], [0, 0, 1, 1], [], []>} : vector<2x64xf32>, vector<64x128xf32>, vector<2x128xf32> -> vector<2x128xf32>
    %759 = vector.broadcast %13 : vector<1x128xf32> to vector<2x128xf32>
    %760 = arith.addf %758, %759 : vector<2x128xf32>
    %761 = vector.extract_strided_slice %760 {offsets = [0, 0], sizes = [2, 32], strides = [1, 1]} : vector<2x128xf32> to vector<2x32xf32>
    %762 = math.tanh %761 : vector<2x32xf32>
    %763 = vector.extract_strided_slice %760 {offsets = [0, 32], sizes = [2, 32], strides = [1, 1]} : vector<2x128xf32> to vector<2x32xf32>
    %cst_390 = arith.constant 0.000000e+00 : f32
    %764 = vector.broadcast %cst_390 : f32 to vector<2x32xf32>
    %765 = arith.subf %764, %763 : vector<2x32xf32>
    %766 = math.exp %765 : vector<2x32xf32>
    %cst_391 = arith.constant 1.000000e+00 : f32
    %767 = vector.broadcast %cst_391 : f32 to vector<2x32xf32>
    %768 = arith.addf %767, %766 : vector<2x32xf32>
    %cst_392 = arith.constant 1.000000e+00 : f32
    %769 = vector.broadcast %cst_392 : f32 to vector<2x32xf32>
    %770 = arith.divf %769, %768 : vector<2x32xf32>
    %771 = arith.mulf %762, %770 : vector<2x32xf32>
    %772 = vector.extract_strided_slice %760 {offsets = [0, 64], sizes = [2, 32], strides = [1, 1]} : vector<2x128xf32> to vector<2x32xf32>
    %773 = math.tanh %772 : vector<2x32xf32>
    %774 = vector.extract_strided_slice %760 {offsets = [0, 96], sizes = [2, 32], strides = [1, 1]} : vector<2x128xf32> to vector<2x32xf32>
    %cst_393 = arith.constant 0.000000e+00 : f32
    %775 = vector.broadcast %cst_393 : f32 to vector<2x32xf32>
    %776 = arith.subf %775, %774 : vector<2x32xf32>
    %777 = math.exp %776 : vector<2x32xf32>
    %cst_394 = arith.constant 1.000000e+00 : f32
    %778 = vector.broadcast %cst_394 : f32 to vector<2x32xf32>
    %779 = arith.addf %778, %777 : vector<2x32xf32>
    %cst_395 = arith.constant 1.000000e+00 : f32
    %780 = vector.broadcast %cst_395 : f32 to vector<2x32xf32>
    %781 = arith.divf %780, %779 : vector<2x32xf32>
    %782 = arith.mulf %773, %781 : vector<2x32xf32>
    %783 = arith.subf %782, %771 : vector<2x32xf32>
    %784 = vector.broadcast %734 : vector<2x1xf32> to vector<2x32xf32>
    %785 = arith.mulf %784, %783 : vector<2x32xf32>
    %786 = arith.addf %771, %785 : vector<2x32xf32>
    %cst_396 = arith.constant dense<0.000000e+00> : vector<2x32xf32>
    %787 = tpu.matmul %786, %11, %cst_396 {dimension_numbers = #tpu.dot_dimension_numbers<[1], [0], [0], [1], [0, 0, 1, 1], [], []>} : vector<2x32xf32>, vector<32x32xf32>, vector<2x32xf32> -> vector<2x32xf32>
    %788 = vector.broadcast %16 : vector<1x32xf32> to vector<2x32xf32>
    %789 = arith.addf %787, %788 : vector<2x32xf32>
    %790 = vector.shape_cast %789 : vector<2x32xf32> to vector<2x1x32xf32>
    %791 = vector.broadcast %790 : vector<2x1x32xf32> to vector<2x8x32xf32>
    %792 = arith.addf %22, %791 : vector<2x8x32xf32>
    %793 = math.tanh %792 : vector<2x8x32xf32>
    %794 = vector.shape_cast %17 : vector<1x32xf32> to vector<1x1x32xf32>
    %795 = vector.broadcast %794 : vector<1x1x32xf32> to vector<2x8x32xf32>
    %796 = arith.mulf %793, %795 : vector<2x8x32xf32>
    %cst_397 = arith.constant dense<0.000000e+00> : vector<2x8xf32>
    %797 = vector.multi_reduction <add>, %796, %cst_397 [2] : vector<2x8x32xf32> to vector<2x8xf32>
    %798 = vector.broadcast %19 : vector<1x1xf32> to vector<2x8xf32>
    %799 = arith.addf %797, %798 : vector<2x8xf32>
    %cst_398 = arith.constant -9.99999995E+11 : f32
    %800 = vector.broadcast %cst_398 : f32 to vector<2x8xf32>
    %801 = arith.select %26, %799, %800 : vector<2x8xi1>, vector<2x8xf32>
    %cst_399 = arith.constant dense<0xFF800000> : vector<2xf32>
    %802 = vector.multi_reduction <maximumf>, %801, %cst_399 [1] : vector<2x8xf32> to vector<2xf32>
    %803 = vector.shape_cast %802 : vector<2xf32> to vector<2x1xf32>
    %804 = vector.broadcast %803 : vector<2x1xf32> to vector<2x8xf32>
    %805 = arith.subf %801, %804 : vector<2x8xf32>
    %806 = math.exp %805 : vector<2x8xf32>
    %cst_400 = arith.constant dense<0.000000e+00> : vector<2xf32>
    %807 = vector.multi_reduction <add>, %806, %cst_400 [1] : vector<2x8xf32> to vector<2xf32>
    %808 = vector.shape_cast %807 : vector<2xf32> to vector<2x1xf32>
    %809 = tpu.reciprocal %808 {approx = true} : vector<2x1xf32> -> vector<2x1xf32>
    %810 = vector.broadcast %809 : vector<2x1xf32> to vector<2x8xf32>
    %811 = arith.mulf %806, %810 : vector<2x8xf32>
    %812 = vector.shape_cast %811 : vector<2x8xf32> to vector<2x8x1xf32>
    %813 = vector.broadcast %812 : vector<2x8x1xf32> to vector<2x8x32xf32>
    %814 = arith.mulf %813, %21 : vector<2x8x32xf32>
    %cst_401 = arith.constant dense<0.000000e+00> : vector<2x32xf32>
    %815 = vector.multi_reduction <add>, %814, %cst_401 [1] : vector<2x8x32xf32> to vector<2x32xf32>
    %c3_402 = arith.constant 3 : index
    %c0_403 = arith.constant 0 : index
    %c0_404 = arith.constant 0 : index
    %816 = vector.load %arg11[%c3_402, %c0_403, %c0_404] : memref<5x2x32xf32, #tpu.memory_space<vmem>>, vector<1x2x32xf32>
    %817 = vector.shape_cast %816 : vector<1x2x32xf32> to vector<2x32xf32>
    %818 = tpu.concatenate %786, %815, %817 in 1 : vector<2x32xf32>, vector<2x32xf32>, vector<2x32xf32> -> vector<2x96xf32>
    %cst_405 = arith.constant dense<0.000000e+00> : vector<2x160xf32>
    %819 = tpu.matmul %818, %9, %cst_405 {dimension_numbers = #tpu.dot_dimension_numbers<[1], [0], [0], [1], [0, 0, 1, 1], [], []>} : vector<2x96xf32>, vector<96x160xf32>, vector<2x160xf32> -> vector<2x160xf32>
    %820 = vector.broadcast %14 : vector<1x160xf32> to vector<2x160xf32>
    %821 = arith.addf %819, %820 : vector<2x160xf32>
    %822 = vector.extract_strided_slice %821 {offsets = [0, 0], sizes = [2, 32], strides = [1, 1]} : vector<2x160xf32> to vector<2x32xf32>
    %823 = math.tanh %822 : vector<2x32xf32>
    %824 = vector.extract_strided_slice %821 {offsets = [0, 32], sizes = [2, 32], strides = [1, 1]} : vector<2x160xf32> to vector<2x32xf32>
    %cst_406 = arith.constant 0.000000e+00 : f32
    %825 = vector.broadcast %cst_406 : f32 to vector<2x32xf32>
    %826 = arith.subf %825, %824 : vector<2x32xf32>
    %827 = math.exp %826 : vector<2x32xf32>
    %cst_407 = arith.constant 1.000000e+00 : f32
    %828 = vector.broadcast %cst_407 : f32 to vector<2x32xf32>
    %829 = arith.addf %828, %827 : vector<2x32xf32>
    %cst_408 = arith.constant 1.000000e+00 : f32
    %830 = vector.broadcast %cst_408 : f32 to vector<2x32xf32>
    %831 = arith.divf %830, %829 : vector<2x32xf32>
    %832 = arith.mulf %823, %831 : vector<2x32xf32>
    %833 = vector.extract_strided_slice %821 {offsets = [0, 64], sizes = [2, 32], strides = [1, 1]} : vector<2x160xf32> to vector<2x32xf32>
    %834 = math.tanh %833 : vector<2x32xf32>
    %835 = vector.extract_strided_slice %821 {offsets = [0, 96], sizes = [2, 32], strides = [1, 1]} : vector<2x160xf32> to vector<2x32xf32>
    %cst_409 = arith.constant 0.000000e+00 : f32
    %836 = vector.broadcast %cst_409 : f32 to vector<2x32xf32>
    %837 = arith.subf %836, %835 : vector<2x32xf32>
    %838 = math.exp %837 : vector<2x32xf32>
    %cst_410 = arith.constant 1.000000e+00 : f32
    %839 = vector.broadcast %cst_410 : f32 to vector<2x32xf32>
    %840 = arith.addf %839, %838 : vector<2x32xf32>
    %cst_411 = arith.constant 1.000000e+00 : f32
    %841 = vector.broadcast %cst_411 : f32 to vector<2x32xf32>
    %842 = arith.divf %841, %840 : vector<2x32xf32>
    %843 = arith.mulf %834, %842 : vector<2x32xf32>
    %844 = vector.extract_strided_slice %821 {offsets = [0, 128], sizes = [2, 32], strides = [1, 1]} : vector<2x160xf32> to vector<2x32xf32>
    %845 = vector.shape_cast %844 : vector<2x32xf32> to vector<2x1x32xf32>
    %846 = vector.broadcast %845 : vector<2x1x32xf32> to vector<2x8x32xf32>
    %847 = arith.addf %23, %846 : vector<2x8x32xf32>
    %848 = math.tanh %847 : vector<2x8x32xf32>
    %849 = vector.shape_cast %18 : vector<1x32xf32> to vector<1x1x32xf32>
    %850 = vector.broadcast %849 : vector<1x1x32xf32> to vector<2x8x32xf32>
    %851 = arith.mulf %848, %850 : vector<2x8x32xf32>
    %cst_412 = arith.constant dense<0.000000e+00> : vector<2x8xf32>
    %852 = vector.multi_reduction <add>, %851, %cst_412 [2] : vector<2x8x32xf32> to vector<2x8xf32>
    %853 = vector.broadcast %20 : vector<1x1xf32> to vector<2x8xf32>
    %854 = arith.addf %852, %853 : vector<2x8xf32>
    %cst_413 = arith.constant -9.99999995E+11 : f32
    %855 = vector.broadcast %cst_413 : f32 to vector<2x8xf32>
    %856 = arith.select %29, %854, %855 : vector<2x8xi1>, vector<2x8xf32>
    %c3_414 = arith.constant 3 : index
    %c0_415 = arith.constant 0 : index
    %c0_416 = arith.constant 0 : index
    %857 = vector.load %arg13[%c3_414, %c0_415, %c0_416] : memref<5x2x8xf32, #tpu.memory_space<vmem>>, vector<1x2x8xf32>
    %858 = vector.shape_cast %857 : vector<1x2x8xf32> to vector<2x8xf32>
    %859 = vector.shape_cast %856 : vector<2x8xf32> to vector<1x2x8xf32>
    tpu.vector_store %arg13[%c3_414, %c0_415, %c0_416], %859 {strides = array<i32>} : memref<5x2x8xf32, #tpu.memory_space<vmem>>, vector<1x2x8xf32>,
    %860 = vector.broadcast %736 : vector<2x1xf32> to vector<2x32xf32>
    %861 = arith.mulf %832, %860 : vector<2x32xf32>
    %862 = vector.broadcast %736 : vector<2x1xf32> to vector<2x32xf32>
    %863 = arith.mulf %843, %862 : vector<2x32xf32>
    %864 = vector.extract_strided_slice %861 {offsets = [0, 0], sizes = [1, 32], strides = [1, 1]} : vector<2x32xf32> to vector<1x32xf32>
    %c8_417 = arith.constant 8 : index
    %c0_418 = arith.constant 0 : index
    %865 = vector.load %arg14[%c8_417, %c0_418] : memref<24x32xf32, #tpu.memory_space<vmem>>, vector<1x32xf32>
    tpu.vector_store %arg14[%c8_417, %c0_418], %864 {strides = array<i32>} : memref<24x32xf32, #tpu.memory_space<vmem>>, vector<1x32xf32>,
    %866 = vector.extract_strided_slice %863 {offsets = [0, 0], sizes = [1, 32], strides = [1, 1]} : vector<2x32xf32> to vector<1x32xf32>
    %c9_419 = arith.constant 9 : index
    %c0_420 = arith.constant 0 : index
    %867 = vector.load %arg14[%c9_419, %c0_420] : memref<24x32xf32, #tpu.memory_space<vmem>>, vector<1x32xf32>
    tpu.vector_store %arg14[%c9_419, %c0_420], %866 {strides = array<i32>} : memref<24x32xf32, #tpu.memory_space<vmem>>, vector<1x32xf32>,
    %868 = vector.extract_strided_slice %861 {offsets = [1, 0], sizes = [1, 32], strides = [1, 1]} : vector<2x32xf32> to vector<1x32xf32>
    %c20_421 = arith.constant 20 : index
    %c0_422 = arith.constant 0 : index
    %869 = vector.load %arg14[%c20_421, %c0_422] : memref<24x32xf32, #tpu.memory_space<vmem>>, vector<1x32xf32>
    tpu.vector_store %arg14[%c20_421, %c0_422], %868 {strides = array<i32>} : memref<24x32xf32, #tpu.memory_space<vmem>>, vector<1x32xf32>,
    %870 = vector.extract_strided_slice %863 {offsets = [1, 0], sizes = [1, 32], strides = [1, 1]} : vector<2x32xf32> to vector<1x32xf32>
    %c21_423 = arith.constant 21 : index
    %c0_424 = arith.constant 0 : index
    %871 = vector.load %arg14[%c21_423, %c0_424] : memref<24x32xf32, #tpu.memory_space<vmem>>, vector<1x32xf32>
    tpu.vector_store %arg14[%c21_423, %c0_424], %870 {strides = array<i32>} : memref<24x32xf32, #tpu.memory_space<vmem>>, vector<1x32xf32>,
    %c3_425 = arith.constant 3 : index
    %c0_426 = arith.constant 0 : index
    %c0_427 = arith.constant 0 : index
    %872 = vector.load %arg12[%c3_425, %c0_426, %c0_427] : memref<5x2x32xf32, #tpu.memory_space<vmem>>, vector<1x2x32xf32>
    %873 = vector.shape_cast %872 : vector<1x2x32xf32> to vector<2x32xf32>
    %c38 = arith.constant 38 : index
    %874 = memref.load %arg1[%c38] : memref<60xi32, #tpu.memory_space<smem>>
    %c39 = arith.constant 39 : index
    %875 = memref.load %arg1[%c39] : memref<60xi32, #tpu.memory_space<smem>>
    %c0_i32_428 = arith.constant 0 : i32
    %876 = arith.addi %c0_i32_428, %874 : i32
    %877 = arith.index_cast %876 : i32 to index
    %c0_429 = arith.constant 0 : index
    %878 = vector.load %arg15[%877, %c0_429] : memref<12x32xf32, #tpu.memory_space<vmem>>, vector<1x32xf32>
    %c0_430 = arith.constant 0 : index
    %c0_431 = arith.constant 0 : index
    %879 = vector.load %arg16[%c0_430, %c0_431] : memref<2x96xf32, #tpu.memory_space<vmem>>, vector<1x32xf32>
    tpu.vector_store %arg16[%c0_430, %c0_431], %878 {strides = array<i32>} : memref<2x96xf32, #tpu.memory_space<vmem>>, vector<1x32xf32>,
    %c0_i32_432 = arith.constant 0 : i32
    %880 = arith.addi %c0_i32_432, %875 : i32
    %881 = arith.index_cast %880 : i32 to index
    %c0_433 = arith.constant 0 : index
    %882 = vector.load %arg15[%881, %c0_433] : memref<12x32xf32, #tpu.memory_space<vmem>>, vector<1x32xf32>
    %c0_434 = arith.constant 0 : index
    %c32_435 = arith.constant 32 : index
    %883 = vector.load %arg16[%c0_434, %c32_435] : memref<2x96xf32, #tpu.memory_space<vmem>>, vector<1x32xf32>
    tpu.vector_store %arg16[%c0_434, %c32_435], %882 {strides = array<i32>} : memref<2x96xf32, #tpu.memory_space<vmem>>, vector<1x32xf32>,
    %c44 = arith.constant 44 : index
    %884 = memref.load %arg1[%c44] : memref<60xi32, #tpu.memory_space<smem>>
    %c45 = arith.constant 45 : index
    %885 = memref.load %arg1[%c45] : memref<60xi32, #tpu.memory_space<smem>>
    %c6_i32_436 = arith.constant 6 : i32
    %886 = arith.addi %c6_i32_436, %884 : i32
    %887 = arith.index_cast %886 : i32 to index
    %c0_437 = arith.constant 0 : index
    %888 = vector.load %arg15[%887, %c0_437] : memref<12x32xf32, #tpu.memory_space<vmem>>, vector<1x32xf32>
    %c1_438 = arith.constant 1 : index
    %c0_439 = arith.constant 0 : index
    %889 = vector.load %arg16[%c1_438, %c0_439] : memref<2x96xf32, #tpu.memory_space<vmem>>, vector<1x32xf32>
    tpu.vector_store %arg16[%c1_438, %c0_439], %888 {strides = array<i32>} : memref<2x96xf32, #tpu.memory_space<vmem>>, vector<1x32xf32>,
    %c6_i32_440 = arith.constant 6 : i32
    %890 = arith.addi %c6_i32_440, %885 : i32
    %891 = arith.index_cast %890 : i32 to index
    %c0_441 = arith.constant 0 : index
    %892 = vector.load %arg15[%891, %c0_441] : memref<12x32xf32, #tpu.memory_space<vmem>>, vector<1x32xf32>
    %c1_442 = arith.constant 1 : index
    %c32_443 = arith.constant 32 : index
    %893 = vector.load %arg16[%c1_442, %c32_443] : memref<2x96xf32, #tpu.memory_space<vmem>>, vector<1x32xf32>
    tpu.vector_store %arg16[%c1_442, %c32_443], %892 {strides = array<i32>} : memref<2x96xf32, #tpu.memory_space<vmem>>, vector<1x32xf32>,
    %c0_444 = arith.constant 0 : index
    %c64_445 = arith.constant 64 : index
    %894 = vector.load %arg16[%c0_444, %c64_445] : memref<2x96xf32, #tpu.memory_space<vmem>>, vector<2x32xf32>
    tpu.vector_store %arg16[%c0_444, %c64_445], %873 {strides = array<i32>} : memref<2x96xf32, #tpu.memory_space<vmem>>, vector<2x32xf32>,
    %c0_446 = arith.constant 0 : index
    %c0_447 = arith.constant 0 : index
    %895 = vector.load %arg16[%c0_446, %c0_447] : memref<2x96xf32, #tpu.memory_space<vmem>>, vector<2x96xf32>
    %cst_448 = arith.constant dense<0.000000e+00> : vector<2x64xf32>
    %896 = tpu.matmul %895, %10, %cst_448 {dimension_numbers = #tpu.dot_dimension_numbers<[1], [0], [0], [1], [0, 0, 1, 1], [], []>} : vector<2x96xf32>, vector<96x64xf32>, vector<2x64xf32> -> vector<2x64xf32>
    %897 = vector.broadcast %15 : vector<1x64xf32> to vector<2x64xf32>
    %898 = arith.addf %896, %897 : vector<2x64xf32>
    %899 = vector.extract_strided_slice %898 {offsets = [0, 0], sizes = [2, 32], strides = [1, 1]} : vector<2x64xf32> to vector<2x32xf32>
    %900 = math.tanh %899 : vector<2x32xf32>
    %901 = vector.extract_strided_slice %898 {offsets = [0, 32], sizes = [2, 32], strides = [1, 1]} : vector<2x64xf32> to vector<2x32xf32>
    %cst_449 = arith.constant 0.000000e+00 : f32
    %902 = vector.broadcast %cst_449 : f32 to vector<2x32xf32>
    %903 = arith.subf %902, %901 : vector<2x32xf32>
    %904 = math.exp %903 : vector<2x32xf32>
    %cst_450 = arith.constant 1.000000e+00 : f32
    %905 = vector.broadcast %cst_450 : f32 to vector<2x32xf32>
    %906 = arith.addf %905, %904 : vector<2x32xf32>
    %cst_451 = arith.constant 1.000000e+00 : f32
    %907 = vector.broadcast %cst_451 : f32 to vector<2x32xf32>
    %908 = arith.divf %907, %906 : vector<2x32xf32>
    %909 = arith.mulf %900, %908 : vector<2x32xf32>
    %910 = vector.extract_strided_slice %733 {offsets = [0, 3], sizes = [2, 1], strides = [1, 1]} : vector<2x5xf32> to vector<2x1xf32>
    %911 = arith.subf %909, %873 : vector<2x32xf32>
    %912 = vector.broadcast %910 : vector<2x1xf32> to vector<2x32xf32>
    %913 = arith.mulf %912, %911 : vector<2x32xf32>
    %914 = arith.addf %873, %913 : vector<2x32xf32>
    %c40 = arith.constant 40 : index
    %915 = memref.load %arg1[%c40] : memref<60xi32, #tpu.memory_space<smem>>
    %c41 = arith.constant 41 : index
    %916 = memref.load %arg1[%c41] : memref<60xi32, #tpu.memory_space<smem>>
    %c0_i32_452 = arith.constant 0 : i32
    %917 = arith.addi %c0_i32_452, %915 : i32
    %918 = arith.index_cast %917 : i32 to index
    %c0_453 = arith.constant 0 : index
    %919 = vector.load %arg15[%918, %c0_453] : memref<12x32xf32, #tpu.memory_space<vmem>>, vector<1x32xf32>
    %c0_454 = arith.constant 0 : index
    %c0_455 = arith.constant 0 : index
    %920 = vector.load %arg16[%c0_454, %c0_455] : memref<2x96xf32, #tpu.memory_space<vmem>>, vector<1x32xf32>
    tpu.vector_store %arg16[%c0_454, %c0_455], %919 {strides = array<i32>} : memref<2x96xf32, #tpu.memory_space<vmem>>, vector<1x32xf32>,
    %c0_i32_456 = arith.constant 0 : i32
    %921 = arith.addi %c0_i32_456, %916 : i32
    %922 = arith.index_cast %921 : i32 to index
    %c0_457 = arith.constant 0 : index
    %923 = vector.load %arg15[%922, %c0_457] : memref<12x32xf32, #tpu.memory_space<vmem>>, vector<1x32xf32>
    %c0_458 = arith.constant 0 : index
    %c32_459 = arith.constant 32 : index
    %924 = vector.load %arg16[%c0_458, %c32_459] : memref<2x96xf32, #tpu.memory_space<vmem>>, vector<1x32xf32>
    tpu.vector_store %arg16[%c0_458, %c32_459], %923 {strides = array<i32>} : memref<2x96xf32, #tpu.memory_space<vmem>>, vector<1x32xf32>,
    %c46 = arith.constant 46 : index
    %925 = memref.load %arg1[%c46] : memref<60xi32, #tpu.memory_space<smem>>
    %c47 = arith.constant 47 : index
    %926 = memref.load %arg1[%c47] : memref<60xi32, #tpu.memory_space<smem>>
    %c6_i32_460 = arith.constant 6 : i32
    %927 = arith.addi %c6_i32_460, %925 : i32
    %928 = arith.index_cast %927 : i32 to index
    %c0_461 = arith.constant 0 : index
    %929 = vector.load %arg15[%928, %c0_461] : memref<12x32xf32, #tpu.memory_space<vmem>>, vector<1x32xf32>
    %c1_462 = arith.constant 1 : index
    %c0_463 = arith.constant 0 : index
    %930 = vector.load %arg16[%c1_462, %c0_463] : memref<2x96xf32, #tpu.memory_space<vmem>>, vector<1x32xf32>
    tpu.vector_store %arg16[%c1_462, %c0_463], %929 {strides = array<i32>} : memref<2x96xf32, #tpu.memory_space<vmem>>, vector<1x32xf32>,
    %c6_i32_464 = arith.constant 6 : i32
    %931 = arith.addi %c6_i32_464, %926 : i32
    %932 = arith.index_cast %931 : i32 to index
    %c0_465 = arith.constant 0 : index
    %933 = vector.load %arg15[%932, %c0_465] : memref<12x32xf32, #tpu.memory_space<vmem>>, vector<1x32xf32>
    %c1_466 = arith.constant 1 : index
    %c32_467 = arith.constant 32 : index
    %934 = vector.load %arg16[%c1_466, %c32_467] : memref<2x96xf32, #tpu.memory_space<vmem>>, vector<1x32xf32>
    tpu.vector_store %arg16[%c1_466, %c32_467], %933 {strides = array<i32>} : memref<2x96xf32, #tpu.memory_space<vmem>>, vector<1x32xf32>,
    %c0_468 = arith.constant 0 : index
    %c64_469 = arith.constant 64 : index
    %935 = vector.load %arg16[%c0_468, %c64_469] : memref<2x96xf32, #tpu.memory_space<vmem>>, vector<2x32xf32>
    tpu.vector_store %arg16[%c0_468, %c64_469], %914 {strides = array<i32>} : memref<2x96xf32, #tpu.memory_space<vmem>>, vector<2x32xf32>,
    %c0_470 = arith.constant 0 : index
    %c0_471 = arith.constant 0 : index
    %936 = vector.load %arg16[%c0_470, %c0_471] : memref<2x96xf32, #tpu.memory_space<vmem>>, vector<2x96xf32>
    %cst_472 = arith.constant dense<0.000000e+00> : vector<2x64xf32>
    %937 = tpu.matmul %936, %10, %cst_472 {dimension_numbers = #tpu.dot_dimension_numbers<[1], [0], [0], [1], [0, 0, 1, 1], [], []>} : vector<2x96xf32>, vector<96x64xf32>, vector<2x64xf32> -> vector<2x64xf32>
    %938 = vector.broadcast %15 : vector<1x64xf32> to vector<2x64xf32>
    %939 = arith.addf %937, %938 : vector<2x64xf32>
    %940 = vector.extract_strided_slice %939 {offsets = [0, 0], sizes = [2, 32], strides = [1, 1]} : vector<2x64xf32> to vector<2x32xf32>
    %941 = math.tanh %940 : vector<2x32xf32>
    %942 = vector.extract_strided_slice %939 {offsets = [0, 32], sizes = [2, 32], strides = [1, 1]} : vector<2x64xf32> to vector<2x32xf32>
    %cst_473 = arith.constant 0.000000e+00 : f32
    %943 = vector.broadcast %cst_473 : f32 to vector<2x32xf32>
    %944 = arith.subf %943, %942 : vector<2x32xf32>
    %945 = math.exp %944 : vector<2x32xf32>
    %cst_474 = arith.constant 1.000000e+00 : f32
    %946 = vector.broadcast %cst_474 : f32 to vector<2x32xf32>
    %947 = arith.addf %946, %945 : vector<2x32xf32>
    %cst_475 = arith.constant 1.000000e+00 : f32
    %948 = vector.broadcast %cst_475 : f32 to vector<2x32xf32>
    %949 = arith.divf %948, %947 : vector<2x32xf32>
    %950 = arith.mulf %941, %949 : vector<2x32xf32>
    %951 = vector.extract_strided_slice %733 {offsets = [0, 4], sizes = [2, 1], strides = [1, 1]} : vector<2x5xf32> to vector<2x1xf32>
    %952 = arith.subf %950, %914 : vector<2x32xf32>
    %953 = vector.broadcast %951 : vector<2x1xf32> to vector<2x32xf32>
    %954 = arith.mulf %953, %952 : vector<2x32xf32>
    %955 = arith.addf %914, %954 : vector<2x32xf32>
    %956 = arith.subf %817, %955 : vector<2x32xf32>
    %957 = vector.broadcast %735 : vector<2x1xf32> to vector<2x32xf32>
    %958 = arith.mulf %957, %956 : vector<2x32xf32>
    %959 = arith.addf %955, %958 : vector<2x32xf32>
    %960 = vector.broadcast %736 : vector<2x1xf32> to vector<2x32xf32>
    %961 = arith.mulf %959, %960 : vector<2x32xf32>
    %962 = vector.extract_strided_slice %961 {offsets = [0, 0], sizes = [1, 32], strides = [1, 1]} : vector<2x32xf32> to vector<1x32xf32>
    %c4_476 = arith.constant 4 : index
    %c0_477 = arith.constant 0 : index
    %963 = vector.load %arg15[%c4_476, %c0_477] : memref<12x32xf32, #tpu.memory_space<vmem>>, vector<1x32xf32>
    tpu.vector_store %arg15[%c4_476, %c0_477], %962 {strides = array<i32>} : memref<12x32xf32, #tpu.memory_space<vmem>>, vector<1x32xf32>,
    %964 = vector.extract_strided_slice %961 {offsets = [1, 0], sizes = [1, 32], strides = [1, 1]} : vector<2x32xf32> to vector<1x32xf32>
    %c10_478 = arith.constant 10 : index
    %c0_479 = arith.constant 0 : index
    %965 = vector.load %arg15[%c10_478, %c0_479] : memref<12x32xf32, #tpu.memory_space<vmem>>, vector<1x32xf32>
    tpu.vector_store %arg15[%c10_478, %c0_479], %964 {strides = array<i32>} : memref<12x32xf32, #tpu.memory_space<vmem>>, vector<1x32xf32>,
    %c4_480 = arith.constant 4 : index
    %c0_481 = arith.constant 0 : index
    %c0_482 = arith.constant 0 : index
    %966 = vector.load %arg8[%c4_480, %c0_481, %c0_482] : memref<5x2x5xf32, #tpu.memory_space<vmem>>, vector<1x2x5xf32>
    %967 = vector.shape_cast %966 : vector<1x2x5xf32> to vector<2x5xf32>
    %968 = vector.extract_strided_slice %967 {offsets = [0, 0], sizes = [2, 1], strides = [1, 1]} : vector<2x5xf32> to vector<2x1xf32>
    %969 = vector.extract_strided_slice %967 {offsets = [0, 1], sizes = [2, 1], strides = [1, 1]} : vector<2x5xf32> to vector<2x1xf32>
    %970 = vector.extract_strided_slice %967 {offsets = [0, 2], sizes = [2, 1], strides = [1, 1]} : vector<2x5xf32> to vector<2x1xf32>
    %c48 = arith.constant 48 : index
    %971 = memref.load %arg1[%c48] : memref<60xi32, #tpu.memory_space<smem>>
    %c49 = arith.constant 49 : index
    %972 = memref.load %arg1[%c49] : memref<60xi32, #tpu.memory_space<smem>>
    %c0_i32_483 = arith.constant 0 : i32
    %973 = arith.addi %c0_i32_483, %972 : i32
    %974 = arith.index_cast %973 : i32 to index
    %c0_484 = arith.constant 0 : index
    %975 = vector.load %arg15[%974, %c0_484] : memref<12x32xf32, #tpu.memory_space<vmem>>, vector<1x32xf32>
    %c0_485 = arith.constant 0 : index
    %c0_486 = arith.constant 0 : index
    %976 = vector.load %arg16[%c0_485, %c0_486] : memref<2x96xf32, #tpu.memory_space<vmem>>, vector<1x32xf32>
    tpu.vector_store %arg16[%c0_485, %c0_486], %975 {strides = array<i32>} : memref<2x96xf32, #tpu.memory_space<vmem>>, vector<1x32xf32>,
    %c0_i32_487 = arith.constant 0 : i32
    %977 = arith.addi %c0_i32_487, %971 : i32
    %978 = arith.index_cast %977 : i32 to index
    %c0_488 = arith.constant 0 : index
    %979 = vector.load %arg14[%978, %c0_488] : memref<24x32xf32, #tpu.memory_space<vmem>>, vector<1x32xf32>
    %c0_489 = arith.constant 0 : index
    %c32_490 = arith.constant 32 : index
    %980 = vector.load %arg16[%c0_489, %c32_490] : memref<2x96xf32, #tpu.memory_space<vmem>>, vector<1x32xf32>
    tpu.vector_store %arg16[%c0_489, %c32_490], %979 {strides = array<i32>} : memref<2x96xf32, #tpu.memory_space<vmem>>, vector<1x32xf32>,
    %c54 = arith.constant 54 : index
    %981 = memref.load %arg1[%c54] : memref<60xi32, #tpu.memory_space<smem>>
    %c55 = arith.constant 55 : index
    %982 = memref.load %arg1[%c55] : memref<60xi32, #tpu.memory_space<smem>>
    %c6_i32_491 = arith.constant 6 : i32
    %983 = arith.addi %c6_i32_491, %982 : i32
    %984 = arith.index_cast %983 : i32 to index
    %c0_492 = arith.constant 0 : index
    %985 = vector.load %arg15[%984, %c0_492] : memref<12x32xf32, #tpu.memory_space<vmem>>, vector<1x32xf32>
    %c1_493 = arith.constant 1 : index
    %c0_494 = arith.constant 0 : index
    %986 = vector.load %arg16[%c1_493, %c0_494] : memref<2x96xf32, #tpu.memory_space<vmem>>, vector<1x32xf32>
    tpu.vector_store %arg16[%c1_493, %c0_494], %985 {strides = array<i32>} : memref<2x96xf32, #tpu.memory_space<vmem>>, vector<1x32xf32>,
    %c12_i32_495 = arith.constant 12 : i32
    %987 = arith.addi %c12_i32_495, %981 : i32
    %988 = arith.index_cast %987 : i32 to index
    %c0_496 = arith.constant 0 : index
    %989 = vector.load %arg14[%988, %c0_496] : memref<24x32xf32, #tpu.memory_space<vmem>>, vector<1x32xf32>
    %c1_497 = arith.constant 1 : index
    %c32_498 = arith.constant 32 : index
    %990 = vector.load %arg16[%c1_497, %c32_498] : memref<2x96xf32, #tpu.memory_space<vmem>>, vector<1x32xf32>
    tpu.vector_store %arg16[%c1_497, %c32_498], %989 {strides = array<i32>} : memref<2x96xf32, #tpu.memory_space<vmem>>, vector<1x32xf32>,
    %c0_499 = arith.constant 0 : index
    %c0_500 = arith.constant 0 : index
    %991 = vector.load %arg16[%c0_499, %c0_500] : memref<2x96xf32, #tpu.memory_space<vmem>>, vector<2x64xf32>
    %cst_501 = arith.constant dense<0.000000e+00> : vector<2x128xf32>
    %992 = tpu.matmul %991, %8, %cst_501 {dimension_numbers = #tpu.dot_dimension_numbers<[1], [0], [0], [1], [0, 0, 1, 1], [], []>} : vector<2x64xf32>, vector<64x128xf32>, vector<2x128xf32> -> vector<2x128xf32>
    %993 = vector.broadcast %13 : vector<1x128xf32> to vector<2x128xf32>
    %994 = arith.addf %992, %993 : vector<2x128xf32>
    %995 = vector.extract_strided_slice %994 {offsets = [0, 0], sizes = [2, 32], strides = [1, 1]} : vector<2x128xf32> to vector<2x32xf32>
    %996 = math.tanh %995 : vector<2x32xf32>
    %997 = vector.extract_strided_slice %994 {offsets = [0, 32], sizes = [2, 32], strides = [1, 1]} : vector<2x128xf32> to vector<2x32xf32>
    %cst_502 = arith.constant 0.000000e+00 : f32
    %998 = vector.broadcast %cst_502 : f32 to vector<2x32xf32>
    %999 = arith.subf %998, %997 : vector<2x32xf32>
    %1000 = math.exp %999 : vector<2x32xf32>
    %cst_503 = arith.constant 1.000000e+00 : f32
    %1001 = vector.broadcast %cst_503 : f32 to vector<2x32xf32>
    %1002 = arith.addf %1001, %1000 : vector<2x32xf32>
    %cst_504 = arith.constant 1.000000e+00 : f32
    %1003 = vector.broadcast %cst_504 : f32 to vector<2x32xf32>
    %1004 = arith.divf %1003, %1002 : vector<2x32xf32>
    %1005 = arith.mulf %996, %1004 : vector<2x32xf32>
    %1006 = vector.extract_strided_slice %994 {offsets = [0, 64], sizes = [2, 32], strides = [1, 1]} : vector<2x128xf32> to vector<2x32xf32>
    %1007 = math.tanh %1006 : vector<2x32xf32>
    %1008 = vector.extract_strided_slice %994 {offsets = [0, 96], sizes = [2, 32], strides = [1, 1]} : vector<2x128xf32> to vector<2x32xf32>
    %cst_505 = arith.constant 0.000000e+00 : f32
    %1009 = vector.broadcast %cst_505 : f32 to vector<2x32xf32>
    %1010 = arith.subf %1009, %1008 : vector<2x32xf32>
    %1011 = math.exp %1010 : vector<2x32xf32>
    %cst_506 = arith.constant 1.000000e+00 : f32
    %1012 = vector.broadcast %cst_506 : f32 to vector<2x32xf32>
    %1013 = arith.addf %1012, %1011 : vector<2x32xf32>
    %cst_507 = arith.constant 1.000000e+00 : f32
    %1014 = vector.broadcast %cst_507 : f32 to vector<2x32xf32>
    %1015 = arith.divf %1014, %1013 : vector<2x32xf32>
    %1016 = arith.mulf %1007, %1015 : vector<2x32xf32>
    %1017 = arith.subf %1016, %1005 : vector<2x32xf32>
    %1018 = vector.broadcast %968 : vector<2x1xf32> to vector<2x32xf32>
    %1019 = arith.mulf %1018, %1017 : vector<2x32xf32>
    %1020 = arith.addf %1005, %1019 : vector<2x32xf32>
    %cst_508 = arith.constant dense<0.000000e+00> : vector<2x32xf32>
    %1021 = tpu.matmul %1020, %11, %cst_508 {dimension_numbers = #tpu.dot_dimension_numbers<[1], [0], [0], [1], [0, 0, 1, 1], [], []>} : vector<2x32xf32>, vector<32x32xf32>, vector<2x32xf32> -> vector<2x32xf32>
    %1022 = vector.broadcast %16 : vector<1x32xf32> to vector<2x32xf32>
    %1023 = arith.addf %1021, %1022 : vector<2x32xf32>
    %1024 = vector.shape_cast %1023 : vector<2x32xf32> to vector<2x1x32xf32>
    %1025 = vector.broadcast %1024 : vector<2x1x32xf32> to vector<2x8x32xf32>
    %1026 = arith.addf %22, %1025 : vector<2x8x32xf32>
    %1027 = math.tanh %1026 : vector<2x8x32xf32>
    %1028 = vector.shape_cast %17 : vector<1x32xf32> to vector<1x1x32xf32>
    %1029 = vector.broadcast %1028 : vector<1x1x32xf32> to vector<2x8x32xf32>
    %1030 = arith.mulf %1027, %1029 : vector<2x8x32xf32>
    %cst_509 = arith.constant dense<0.000000e+00> : vector<2x8xf32>
    %1031 = vector.multi_reduction <add>, %1030, %cst_509 [2] : vector<2x8x32xf32> to vector<2x8xf32>
    %1032 = vector.broadcast %19 : vector<1x1xf32> to vector<2x8xf32>
    %1033 = arith.addf %1031, %1032 : vector<2x8xf32>
    %cst_510 = arith.constant -9.99999995E+11 : f32
    %1034 = vector.broadcast %cst_510 : f32 to vector<2x8xf32>
    %1035 = arith.select %26, %1033, %1034 : vector<2x8xi1>, vector<2x8xf32>
    %cst_511 = arith.constant dense<0xFF800000> : vector<2xf32>
    %1036 = vector.multi_reduction <maximumf>, %1035, %cst_511 [1] : vector<2x8xf32> to vector<2xf32>
    %1037 = vector.shape_cast %1036 : vector<2xf32> to vector<2x1xf32>
    %1038 = vector.broadcast %1037 : vector<2x1xf32> to vector<2x8xf32>
    %1039 = arith.subf %1035, %1038 : vector<2x8xf32>
    %1040 = math.exp %1039 : vector<2x8xf32>
    %cst_512 = arith.constant dense<0.000000e+00> : vector<2xf32>
    %1041 = vector.multi_reduction <add>, %1040, %cst_512 [1] : vector<2x8xf32> to vector<2xf32>
    %1042 = vector.shape_cast %1041 : vector<2xf32> to vector<2x1xf32>
    %1043 = tpu.reciprocal %1042 {approx = true} : vector<2x1xf32> -> vector<2x1xf32>
    %1044 = vector.broadcast %1043 : vector<2x1xf32> to vector<2x8xf32>
    %1045 = arith.mulf %1040, %1044 : vector<2x8xf32>
    %1046 = vector.shape_cast %1045 : vector<2x8xf32> to vector<2x8x1xf32>
    %1047 = vector.broadcast %1046 : vector<2x8x1xf32> to vector<2x8x32xf32>
    %1048 = arith.mulf %1047, %21 : vector<2x8x32xf32>
    %cst_513 = arith.constant dense<0.000000e+00> : vector<2x32xf32>
    %1049 = vector.multi_reduction <add>, %1048, %cst_513 [1] : vector<2x8x32xf32> to vector<2x32xf32>
    %c4_514 = arith.constant 4 : index
    %c0_515 = arith.constant 0 : index
    %c0_516 = arith.constant 0 : index
    %1050 = vector.load %arg11[%c4_514, %c0_515, %c0_516] : memref<5x2x32xf32, #tpu.memory_space<vmem>>, vector<1x2x32xf32>
    %1051 = vector.shape_cast %1050 : vector<1x2x32xf32> to vector<2x32xf32>
    %1052 = tpu.concatenate %1020, %1049, %1051 in 1 : vector<2x32xf32>, vector<2x32xf32>, vector<2x32xf32> -> vector<2x96xf32>
    %cst_517 = arith.constant dense<0.000000e+00> : vector<2x160xf32>
    %1053 = tpu.matmul %1052, %9, %cst_517 {dimension_numbers = #tpu.dot_dimension_numbers<[1], [0], [0], [1], [0, 0, 1, 1], [], []>} : vector<2x96xf32>, vector<96x160xf32>, vector<2x160xf32> -> vector<2x160xf32>
    %1054 = vector.broadcast %14 : vector<1x160xf32> to vector<2x160xf32>
    %1055 = arith.addf %1053, %1054 : vector<2x160xf32>
    %1056 = vector.extract_strided_slice %1055 {offsets = [0, 0], sizes = [2, 32], strides = [1, 1]} : vector<2x160xf32> to vector<2x32xf32>
    %1057 = math.tanh %1056 : vector<2x32xf32>
    %1058 = vector.extract_strided_slice %1055 {offsets = [0, 32], sizes = [2, 32], strides = [1, 1]} : vector<2x160xf32> to vector<2x32xf32>
    %cst_518 = arith.constant 0.000000e+00 : f32
    %1059 = vector.broadcast %cst_518 : f32 to vector<2x32xf32>
    %1060 = arith.subf %1059, %1058 : vector<2x32xf32>
    %1061 = math.exp %1060 : vector<2x32xf32>
    %cst_519 = arith.constant 1.000000e+00 : f32
    %1062 = vector.broadcast %cst_519 : f32 to vector<2x32xf32>
    %1063 = arith.addf %1062, %1061 : vector<2x32xf32>
    %cst_520 = arith.constant 1.000000e+00 : f32
    %1064 = vector.broadcast %cst_520 : f32 to vector<2x32xf32>
    %1065 = arith.divf %1064, %1063 : vector<2x32xf32>
    %1066 = arith.mulf %1057, %1065 : vector<2x32xf32>
    %1067 = vector.extract_strided_slice %1055 {offsets = [0, 64], sizes = [2, 32], strides = [1, 1]} : vector<2x160xf32> to vector<2x32xf32>
    %1068 = math.tanh %1067 : vector<2x32xf32>
    %1069 = vector.extract_strided_slice %1055 {offsets = [0, 96], sizes = [2, 32], strides = [1, 1]} : vector<2x160xf32> to vector<2x32xf32>
    %cst_521 = arith.constant 0.000000e+00 : f32
    %1070 = vector.broadcast %cst_521 : f32 to vector<2x32xf32>
    %1071 = arith.subf %1070, %1069 : vector<2x32xf32>
    %1072 = math.exp %1071 : vector<2x32xf32>
    %cst_522 = arith.constant 1.000000e+00 : f32
    %1073 = vector.broadcast %cst_522 : f32 to vector<2x32xf32>
    %1074 = arith.addf %1073, %1072 : vector<2x32xf32>
    %cst_523 = arith.constant 1.000000e+00 : f32
    %1075 = vector.broadcast %cst_523 : f32 to vector<2x32xf32>
    %1076 = arith.divf %1075, %1074 : vector<2x32xf32>
    %1077 = arith.mulf %1068, %1076 : vector<2x32xf32>
    %1078 = vector.extract_strided_slice %1055 {offsets = [0, 128], sizes = [2, 32], strides = [1, 1]} : vector<2x160xf32> to vector<2x32xf32>
    %1079 = vector.shape_cast %1078 : vector<2x32xf32> to vector<2x1x32xf32>
    %1080 = vector.broadcast %1079 : vector<2x1x32xf32> to vector<2x8x32xf32>
    %1081 = arith.addf %23, %1080 : vector<2x8x32xf32>
    %1082 = math.tanh %1081 : vector<2x8x32xf32>
    %1083 = vector.shape_cast %18 : vector<1x32xf32> to vector<1x1x32xf32>
    %1084 = vector.broadcast %1083 : vector<1x1x32xf32> to vector<2x8x32xf32>
    %1085 = arith.mulf %1082, %1084 : vector<2x8x32xf32>
    %cst_524 = arith.constant dense<0.000000e+00> : vector<2x8xf32>
    %1086 = vector.multi_reduction <add>, %1085, %cst_524 [2] : vector<2x8x32xf32> to vector<2x8xf32>
    %1087 = vector.broadcast %20 : vector<1x1xf32> to vector<2x8xf32>
    %1088 = arith.addf %1086, %1087 : vector<2x8xf32>
    %cst_525 = arith.constant -9.99999995E+11 : f32
    %1089 = vector.broadcast %cst_525 : f32 to vector<2x8xf32>
    %1090 = arith.select %29, %1088, %1089 : vector<2x8xi1>, vector<2x8xf32>
    %c4_526 = arith.constant 4 : index
    %c0_527 = arith.constant 0 : index
    %c0_528 = arith.constant 0 : index
    %1091 = vector.load %arg13[%c4_526, %c0_527, %c0_528] : memref<5x2x8xf32, #tpu.memory_space<vmem>>, vector<1x2x8xf32>
    %1092 = vector.shape_cast %1091 : vector<1x2x8xf32> to vector<2x8xf32>
    %1093 = vector.shape_cast %1090 : vector<2x8xf32> to vector<1x2x8xf32>
    tpu.vector_store %arg13[%c4_526, %c0_527, %c0_528], %1093 {strides = array<i32>} : memref<5x2x8xf32, #tpu.memory_space<vmem>>, vector<1x2x8xf32>,
    %1094 = vector.broadcast %970 : vector<2x1xf32> to vector<2x32xf32>
    %1095 = arith.mulf %1066, %1094 : vector<2x32xf32>
    %1096 = vector.broadcast %970 : vector<2x1xf32> to vector<2x32xf32>
    %1097 = arith.mulf %1077, %1096 : vector<2x32xf32>
    %1098 = vector.extract_strided_slice %1095 {offsets = [0, 0], sizes = [1, 32], strides = [1, 1]} : vector<2x32xf32> to vector<1x32xf32>
    %c10_529 = arith.constant 10 : index
    %c0_530 = arith.constant 0 : index
    %1099 = vector.load %arg14[%c10_529, %c0_530] : memref<24x32xf32, #tpu.memory_space<vmem>>, vector<1x32xf32>
    tpu.vector_store %arg14[%c10_529, %c0_530], %1098 {strides = array<i32>} : memref<24x32xf32, #tpu.memory_space<vmem>>, vector<1x32xf32>,
    %1100 = vector.extract_strided_slice %1097 {offsets = [0, 0], sizes = [1, 32], strides = [1, 1]} : vector<2x32xf32> to vector<1x32xf32>
    %c11_531 = arith.constant 11 : index
    %c0_532 = arith.constant 0 : index
    %1101 = vector.load %arg14[%c11_531, %c0_532] : memref<24x32xf32, #tpu.memory_space<vmem>>, vector<1x32xf32>
    tpu.vector_store %arg14[%c11_531, %c0_532], %1100 {strides = array<i32>} : memref<24x32xf32, #tpu.memory_space<vmem>>, vector<1x32xf32>,
    %1102 = vector.extract_strided_slice %1095 {offsets = [1, 0], sizes = [1, 32], strides = [1, 1]} : vector<2x32xf32> to vector<1x32xf32>
    %c22_533 = arith.constant 22 : index
    %c0_534 = arith.constant 0 : index
    %1103 = vector.load %arg14[%c22_533, %c0_534] : memref<24x32xf32, #tpu.memory_space<vmem>>, vector<1x32xf32>
    tpu.vector_store %arg14[%c22_533, %c0_534], %1102 {strides = array<i32>} : memref<24x32xf32, #tpu.memory_space<vmem>>, vector<1x32xf32>,
    %1104 = vector.extract_strided_slice %1097 {offsets = [1, 0], sizes = [1, 32], strides = [1, 1]} : vector<2x32xf32> to vector<1x32xf32>
    %c23_535 = arith.constant 23 : index
    %c0_536 = arith.constant 0 : index
    %1105 = vector.load %arg14[%c23_535, %c0_536] : memref<24x32xf32, #tpu.memory_space<vmem>>, vector<1x32xf32>
    tpu.vector_store %arg14[%c23_535, %c0_536], %1104 {strides = array<i32>} : memref<24x32xf32, #tpu.memory_space<vmem>>, vector<1x32xf32>,
    %c4_537 = arith.constant 4 : index
    %c0_538 = arith.constant 0 : index
    %c0_539 = arith.constant 0 : index
    %1106 = vector.load %arg12[%c4_537, %c0_538, %c0_539] : memref<5x2x32xf32, #tpu.memory_space<vmem>>, vector<1x2x32xf32>
    %1107 = vector.shape_cast %1106 : vector<1x2x32xf32> to vector<2x32xf32>
    %c50 = arith.constant 50 : index
    %1108 = memref.load %arg1[%c50] : memref<60xi32, #tpu.memory_space<smem>>
    %c51 = arith.constant 51 : index
    %1109 = memref.load %arg1[%c51] : memref<60xi32, #tpu.memory_space<smem>>
    %c0_i32_540 = arith.constant 0 : i32
    %1110 = arith.addi %c0_i32_540, %1108 : i32
    %1111 = arith.index_cast %1110 : i32 to index
    %c0_541 = arith.constant 0 : index
    %1112 = vector.load %arg15[%1111, %c0_541] : memref<12x32xf32, #tpu.memory_space<vmem>>, vector<1x32xf32>
    %c0_542 = arith.constant 0 : index
    %c0_543 = arith.constant 0 : index
    %1113 = vector.load %arg16[%c0_542, %c0_543] : memref<2x96xf32, #tpu.memory_space<vmem>>, vector<1x32xf32>
    tpu.vector_store %arg16[%c0_542, %c0_543], %1112 {strides = array<i32>} : memref<2x96xf32, #tpu.memory_space<vmem>>, vector<1x32xf32>,
    %c0_i32_544 = arith.constant 0 : i32
    %1114 = arith.addi %c0_i32_544, %1109 : i32
    %1115 = arith.index_cast %1114 : i32 to index
    %c0_545 = arith.constant 0 : index
    %1116 = vector.load %arg15[%1115, %c0_545] : memref<12x32xf32, #tpu.memory_space<vmem>>, vector<1x32xf32>
    %c0_546 = arith.constant 0 : index
    %c32_547 = arith.constant 32 : index
    %1117 = vector.load %arg16[%c0_546, %c32_547] : memref<2x96xf32, #tpu.memory_space<vmem>>, vector<1x32xf32>
    tpu.vector_store %arg16[%c0_546, %c32_547], %1116 {strides = array<i32>} : memref<2x96xf32, #tpu.memory_space<vmem>>, vector<1x32xf32>,
    %c56 = arith.constant 56 : index
    %1118 = memref.load %arg1[%c56] : memref<60xi32, #tpu.memory_space<smem>>
    %c57 = arith.constant 57 : index
    %1119 = memref.load %arg1[%c57] : memref<60xi32, #tpu.memory_space<smem>>
    %c6_i32_548 = arith.constant 6 : i32
    %1120 = arith.addi %c6_i32_548, %1118 : i32
    %1121 = arith.index_cast %1120 : i32 to index
    %c0_549 = arith.constant 0 : index
    %1122 = vector.load %arg15[%1121, %c0_549] : memref<12x32xf32, #tpu.memory_space<vmem>>, vector<1x32xf32>
    %c1_550 = arith.constant 1 : index
    %c0_551 = arith.constant 0 : index
    %1123 = vector.load %arg16[%c1_550, %c0_551] : memref<2x96xf32, #tpu.memory_space<vmem>>, vector<1x32xf32>
    tpu.vector_store %arg16[%c1_550, %c0_551], %1122 {strides = array<i32>} : memref<2x96xf32, #tpu.memory_space<vmem>>, vector<1x32xf32>,
    %c6_i32_552 = arith.constant 6 : i32
    %1124 = arith.addi %c6_i32_552, %1119 : i32
    %1125 = arith.index_cast %1124 : i32 to index
    %c0_553 = arith.constant 0 : index
    %1126 = vector.load %arg15[%1125, %c0_553] : memref<12x32xf32, #tpu.memory_space<vmem>>, vector<1x32xf32>
    %c1_554 = arith.constant 1 : index
    %c32_555 = arith.constant 32 : index
    %1127 = vector.load %arg16[%c1_554, %c32_555] : memref<2x96xf32, #tpu.memory_space<vmem>>, vector<1x32xf32>
    tpu.vector_store %arg16[%c1_554, %c32_555], %1126 {strides = array<i32>} : memref<2x96xf32, #tpu.memory_space<vmem>>, vector<1x32xf32>,
    %c0_556 = arith.constant 0 : index
    %c64_557 = arith.constant 64 : index
    %1128 = vector.load %arg16[%c0_556, %c64_557] : memref<2x96xf32, #tpu.memory_space<vmem>>, vector<2x32xf32>
    tpu.vector_store %arg16[%c0_556, %c64_557], %1107 {strides = array<i32>} : memref<2x96xf32, #tpu.memory_space<vmem>>, vector<2x32xf32>,
    %c0_558 = arith.constant 0 : index
    %c0_559 = arith.constant 0 : index
    %1129 = vector.load %arg16[%c0_558, %c0_559] : memref<2x96xf32, #tpu.memory_space<vmem>>, vector<2x96xf32>
    %cst_560 = arith.constant dense<0.000000e+00> : vector<2x64xf32>
    %1130 = tpu.matmul %1129, %10, %cst_560 {dimension_numbers = #tpu.dot_dimension_numbers<[1], [0], [0], [1], [0, 0, 1, 1], [], []>} : vector<2x96xf32>, vector<96x64xf32>, vector<2x64xf32> -> vector<2x64xf32>
    %1131 = vector.broadcast %15 : vector<1x64xf32> to vector<2x64xf32>
    %1132 = arith.addf %1130, %1131 : vector<2x64xf32>
    %1133 = vector.extract_strided_slice %1132 {offsets = [0, 0], sizes = [2, 32], strides = [1, 1]} : vector<2x64xf32> to vector<2x32xf32>
    %1134 = math.tanh %1133 : vector<2x32xf32>
    %1135 = vector.extract_strided_slice %1132 {offsets = [0, 32], sizes = [2, 32], strides = [1, 1]} : vector<2x64xf32> to vector<2x32xf32>
    %cst_561 = arith.constant 0.000000e+00 : f32
    %1136 = vector.broadcast %cst_561 : f32 to vector<2x32xf32>
    %1137 = arith.subf %1136, %1135 : vector<2x32xf32>
    %1138 = math.exp %1137 : vector<2x32xf32>
    %cst_562 = arith.constant 1.000000e+00 : f32
    %1139 = vector.broadcast %cst_562 : f32 to vector<2x32xf32>
    %1140 = arith.addf %1139, %1138 : vector<2x32xf32>
    %cst_563 = arith.constant 1.000000e+00 : f32
    %1141 = vector.broadcast %cst_563 : f32 to vector<2x32xf32>
    %1142 = arith.divf %1141, %1140 : vector<2x32xf32>
    %1143 = arith.mulf %1134, %1142 : vector<2x32xf32>
    %1144 = vector.extract_strided_slice %967 {offsets = [0, 3], sizes = [2, 1], strides = [1, 1]} : vector<2x5xf32> to vector<2x1xf32>
    %1145 = arith.subf %1143, %1107 : vector<2x32xf32>
    %1146 = vector.broadcast %1144 : vector<2x1xf32> to vector<2x32xf32>
    %1147 = arith.mulf %1146, %1145 : vector<2x32xf32>
    %1148 = arith.addf %1107, %1147 : vector<2x32xf32>
    %c52 = arith.constant 52 : index
    %1149 = memref.load %arg1[%c52] : memref<60xi32, #tpu.memory_space<smem>>
    %c53 = arith.constant 53 : index
    %1150 = memref.load %arg1[%c53] : memref<60xi32, #tpu.memory_space<smem>>
    %c0_i32_564 = arith.constant 0 : i32
    %1151 = arith.addi %c0_i32_564, %1149 : i32
    %1152 = arith.index_cast %1151 : i32 to index
    %c0_565 = arith.constant 0 : index
    %1153 = vector.load %arg15[%1152, %c0_565] : memref<12x32xf32, #tpu.memory_space<vmem>>, vector<1x32xf32>
    %c0_566 = arith.constant 0 : index
    %c0_567 = arith.constant 0 : index
    %1154 = vector.load %arg16[%c0_566, %c0_567] : memref<2x96xf32, #tpu.memory_space<vmem>>, vector<1x32xf32>
    tpu.vector_store %arg16[%c0_566, %c0_567], %1153 {strides = array<i32>} : memref<2x96xf32, #tpu.memory_space<vmem>>, vector<1x32xf32>,
    %c0_i32_568 = arith.constant 0 : i32
    %1155 = arith.addi %c0_i32_568, %1150 : i32
    %1156 = arith.index_cast %1155 : i32 to index
    %c0_569 = arith.constant 0 : index
    %1157 = vector.load %arg15[%1156, %c0_569] : memref<12x32xf32, #tpu.memory_space<vmem>>, vector<1x32xf32>
    %c0_570 = arith.constant 0 : index
    %c32_571 = arith.constant 32 : index
    %1158 = vector.load %arg16[%c0_570, %c32_571] : memref<2x96xf32, #tpu.memory_space<vmem>>, vector<1x32xf32>
    tpu.vector_store %arg16[%c0_570, %c32_571], %1157 {strides = array<i32>} : memref<2x96xf32, #tpu.memory_space<vmem>>, vector<1x32xf32>,
    %c58 = arith.constant 58 : index
    %1159 = memref.load %arg1[%c58] : memref<60xi32, #tpu.memory_space<smem>>
    %c59 = arith.constant 59 : index
    %1160 = memref.load %arg1[%c59] : memref<60xi32, #tpu.memory_space<smem>>
    %c6_i32_572 = arith.constant 6 : i32
    %1161 = arith.addi %c6_i32_572, %1159 : i32
    %1162 = arith.index_cast %1161 : i32 to index
    %c0_573 = arith.constant 0 : index
    %1163 = vector.load %arg15[%1162, %c0_573] : memref<12x32xf32, #tpu.memory_space<vmem>>, vector<1x32xf32>
    %c1_574 = arith.constant 1 : index
    %c0_575 = arith.constant 0 : index
    %1164 = vector.load %arg16[%c1_574, %c0_575] : memref<2x96xf32, #tpu.memory_space<vmem>>, vector<1x32xf32>
    tpu.vector_store %arg16[%c1_574, %c0_575], %1163 {strides = array<i32>} : memref<2x96xf32, #tpu.memory_space<vmem>>, vector<1x32xf32>,
    %c6_i32_576 = arith.constant 6 : i32
    %1165 = arith.addi %c6_i32_576, %1160 : i32
    %1166 = arith.index_cast %1165 : i32 to index
    %c0_577 = arith.constant 0 : index
    %1167 = vector.load %arg15[%1166, %c0_577] : memref<12x32xf32, #tpu.memory_space<vmem>>, vector<1x32xf32>
    %c1_578 = arith.constant 1 : index
    %c32_579 = arith.constant 32 : index
    %1168 = vector.load %arg16[%c1_578, %c32_579] : memref<2x96xf32, #tpu.memory_space<vmem>>, vector<1x32xf32>
    tpu.vector_store %arg16[%c1_578, %c32_579], %1167 {strides = array<i32>} : memref<2x96xf32, #tpu.memory_space<vmem>>, vector<1x32xf32>,
    %c0_580 = arith.constant 0 : index
    %c64_581 = arith.constant 64 : index
    %1169 = vector.load %arg16[%c0_580, %c64_581] : memref<2x96xf32, #tpu.memory_space<vmem>>, vector<2x32xf32>
    tpu.vector_store %arg16[%c0_580, %c64_581], %1148 {strides = array<i32>} : memref<2x96xf32, #tpu.memory_space<vmem>>, vector<2x32xf32>,
    %c0_582 = arith.constant 0 : index
    %c0_583 = arith.constant 0 : index
    %1170 = vector.load %arg16[%c0_582, %c0_583] : memref<2x96xf32, #tpu.memory_space<vmem>>, vector<2x96xf32>
    %cst_584 = arith.constant dense<0.000000e+00> : vector<2x64xf32>
    %1171 = tpu.matmul %1170, %10, %cst_584 {dimension_numbers = #tpu.dot_dimension_numbers<[1], [0], [0], [1], [0, 0, 1, 1], [], []>} : vector<2x96xf32>, vector<96x64xf32>, vector<2x64xf32> -> vector<2x64xf32>
    %1172 = vector.broadcast %15 : vector<1x64xf32> to vector<2x64xf32>
    %1173 = arith.addf %1171, %1172 : vector<2x64xf32>
    %1174 = vector.extract_strided_slice %1173 {offsets = [0, 0], sizes = [2, 32], strides = [1, 1]} : vector<2x64xf32> to vector<2x32xf32>
    %1175 = math.tanh %1174 : vector<2x32xf32>
    %1176 = vector.extract_strided_slice %1173 {offsets = [0, 32], sizes = [2, 32], strides = [1, 1]} : vector<2x64xf32> to vector<2x32xf32>
    %cst_585 = arith.constant 0.000000e+00 : f32
    %1177 = vector.broadcast %cst_585 : f32 to vector<2x32xf32>
    %1178 = arith.subf %1177, %1176 : vector<2x32xf32>
    %1179 = math.exp %1178 : vector<2x32xf32>
    %cst_586 = arith.constant 1.000000e+00 : f32
    %1180 = vector.broadcast %cst_586 : f32 to vector<2x32xf32>
    %1181 = arith.addf %1180, %1179 : vector<2x32xf32>
    %cst_587 = arith.constant 1.000000e+00 : f32
    %1182 = vector.broadcast %cst_587 : f32 to vector<2x32xf32>
    %1183 = arith.divf %1182, %1181 : vector<2x32xf32>
    %1184 = arith.mulf %1175, %1183 : vector<2x32xf32>
    %1185 = vector.extract_strided_slice %967 {offsets = [0, 4], sizes = [2, 1], strides = [1, 1]} : vector<2x5xf32> to vector<2x1xf32>
    %1186 = arith.subf %1184, %1148 : vector<2x32xf32>
    %1187 = vector.broadcast %1185 : vector<2x1xf32> to vector<2x32xf32>
    %1188 = arith.mulf %1187, %1186 : vector<2x32xf32>
    %1189 = arith.addf %1148, %1188 : vector<2x32xf32>
    %1190 = arith.subf %1051, %1189 : vector<2x32xf32>
    %1191 = vector.broadcast %969 : vector<2x1xf32> to vector<2x32xf32>
    %1192 = arith.mulf %1191, %1190 : vector<2x32xf32>
    %1193 = arith.addf %1189, %1192 : vector<2x32xf32>
    %1194 = vector.broadcast %970 : vector<2x1xf32> to vector<2x32xf32>
    %1195 = arith.mulf %1193, %1194 : vector<2x32xf32>
    %1196 = vector.extract_strided_slice %1195 {offsets = [0, 0], sizes = [1, 32], strides = [1, 1]} : vector<2x32xf32> to vector<1x32xf32>
    %c5_588 = arith.constant 5 : index
    %c0_589 = arith.constant 0 : index
    %1197 = vector.load %arg15[%c5_588, %c0_589] : memref<12x32xf32, #tpu.memory_space<vmem>>, vector<1x32xf32>
    tpu.vector_store %arg15[%c5_588, %c0_589], %1196 {strides = array<i32>} : memref<12x32xf32, #tpu.memory_space<vmem>>, vector<1x32xf32>,
    %1198 = vector.extract_strided_slice %1195 {offsets = [1, 0], sizes = [1, 32], strides = [1, 1]} : vector<2x32xf32> to vector<1x32xf32>
    %c11_590 = arith.constant 11 : index
    %c0_591 = arith.constant 0 : index
    %1199 = vector.load %arg15[%c11_590, %c0_591] : memref<12x32xf32, #tpu.memory_space<vmem>>, vector<1x32xf32>
    tpu.vector_store %arg15[%c11_590, %c0_591], %1198 {strides = array<i32>} : memref<12x32xf32, #tpu.memory_space<vmem>>, vector<1x32xf32>,
    return
  }
  func.func @transform_0(%arg0: i32, %arg1: memref<60xi32, #tpu.memory_space<smem>>) -> (i32, i32) {
    %c0_i32 = arith.constant 0 : i32
    %c0_i32_0 = arith.constant 0 : i32
    %c0_i32_1 = arith.constant 0 : i32
    return %c0_i32, %c0_i32_0 : i32, i32
  }
  func.func @transform_1(%arg0: i32, %arg1: memref<60xi32, #tpu.memory_space<smem>>) -> (i32, i32, i32) {
    %c0_i32 = arith.constant 0 : i32
    %c0_i32_0 = arith.constant 0 : i32
    %c0_i32_1 = arith.constant 0 : i32
    %c0_i32_2 = arith.constant 0 : i32
    return %c0_i32, %c0_i32_0, %c0_i32_1 : i32, i32, i32
  }
  func.func @transform_2(%arg0: i32, %arg1: memref<60xi32, #tpu.memory_space<smem>>) -> (i32, i32, i32) {
    %c0_i32 = arith.constant 0 : i32
    %c0_i32_0 = arith.constant 0 : i32
    %c0_i32_1 = arith.constant 0 : i32
    %c0_i32_2 = arith.constant 0 : i32
    return %c0_i32, %c0_i32_0, %c0_i32_1 : i32, i32, i32
  }
  func.func @transform_3(%arg0: i32, %arg1: memref<60xi32, #tpu.memory_space<smem>>) -> (i32, i32, i32) {
    %c0_i32 = arith.constant 0 : i32
    %c0_i32_0 = arith.constant 0 : i32
    %c0_i32_1 = arith.constant 0 : i32
    %c0_i32_2 = arith.constant 0 : i32
    return %c0_i32, %c0_i32_0, %c0_i32_1 : i32, i32, i32
  }
  func.func @transform_4(%arg0: i32, %arg1: memref<60xi32, #tpu.memory_space<smem>>) -> (i32, i32) {
    %c0_i32 = arith.constant 0 : i32
    %c0_i32_0 = arith.constant 0 : i32
    %c0_i32_1 = arith.constant 0 : i32
    return %c0_i32, %c0_i32_0 : i32, i32
  }
  func.func @transform_5(%arg0: i32, %arg1: memref<60xi32, #tpu.memory_space<smem>>) -> (i32, i32) {
    %c0_i32 = arith.constant 0 : i32
    %c0_i32_0 = arith.constant 0 : i32
    %c0_i32_1 = arith.constant 0 : i32
    return %c0_i32, %c0_i32_0 : i32, i32
  }
  func.func @transform_6(%arg0: i32, %arg1: memref<60xi32, #tpu.memory_space<smem>>) -> (i32, i32, i32) {
    %c0_i32 = arith.constant 0 : i32
    %c0_i32_0 = arith.constant 0 : i32
    %c0_i32_1 = arith.constant 0 : i32
    %c0_i32_2 = arith.constant 0 : i32
    return %c0_i32, %c0_i32_0, %c0_i32_1 : i32, i32, i32
  }
  func.func @transform_7(%arg0: i32, %arg1: memref<60xi32, #tpu.memory_space<smem>>) -> (i32, i32) {
    %c0_i32 = arith.constant 0 : i32
    %c0_i32_0 = arith.constant 0 : i32
    %c0_i32_1 = arith.constant 0 : i32
    return %c0_i32, %c0_i32_0 : i32, i32
  }
  func.func @transform_8(%arg0: i32, %arg1: memref<60xi32, #tpu.memory_space<smem>>) -> (i32, i32) {
    %c0_i32 = arith.constant 0 : i32
    %c0_i32_0 = arith.constant 0 : i32
    %c0_i32_1 = arith.constant 0 : i32
    return %c0_i32, %c0_i32_0 : i32, i32
  }
  func.func @transform_9(%arg0: i32, %arg1: memref<60xi32, #tpu.memory_space<smem>>) -> (i32, i32, i32) {
    %c0_i32 = arith.constant 0 : i32
    %c0_i32_0 = arith.constant 0 : i32
    %c0_i32_1 = arith.constant 0 : i32
    %c0_i32_2 = arith.constant 0 : i32
    return %c0_i32, %c0_i32_0, %c0_i32_1 : i32, i32, i32
  }
  func.func @transform_10(%arg0: i32, %arg1: memref<60xi32, #tpu.memory_space<smem>>) -> (i32, i32, i32) {
    %c0_i32 = arith.constant 0 : i32
    %c0_i32_0 = arith.constant 0 : i32
    %c0_i32_1 = arith.constant 0 : i32
    %c0_i32_2 = arith.constant 0 : i32
    return %c0_i32, %c0_i32_0, %c0_i32_1 : i32, i32, i32
  }
  func.func @transform_11(%arg0: i32, %arg1: memref<60xi32, #tpu.memory_space<smem>>) -> (i32, i32, i32) {
    %c0_i32 = arith.constant 0 : i32
    %c0_i32_0 = arith.constant 0 : i32
    %c0_i32_1 = arith.constant 0 : i32
    %c0_i32_2 = arith.constant 0 : i32
    return %c0_i32, %c0_i32_0, %c0_i32_1 : i32, i32, i32
  }
}

</mosaic_0001>

<bundles_post_ra>
// kernel: _device_forward.1
= control target key start
LH: loop header
LB: loop body
LE: loop exit
PB: predicated region body
PF: predicated region fallthrough
CT: control target
= control target key end

     0   :  { %s6824_s0 = inlined_call_operand.vmem [shape: s32[60], index: 0, kind: input, shape index: {}]   ;;  %s6825_s1 = inlined_call_operand.vmem [shape: f32[2,32], index: 1, kind: input, shape index: {}]   ;;  %s6826_s2 = inlined_call_operand.vmem [shape: f32[2,8,32], index: 2, kind: input, shape index: {}]   ;;  %s6827_s3 = inlined_call_operand.vmem [shape: f32[2,8,32], index: 3, kind: input, shape index: {}]   ;;  %s6828_s4 = inlined_call_operand.vmem [shape: f32[2,8,32], index: 4, kind: input, shape index: {}]   ;;  %s6829_s5 = inlined_call_operand.vmem [shape: f32[2,8], index: 5, kind: input, shape index: {}]   ;;  %s6830_s6 = inlined_call_operand.vmem [shape: f32[2,8], index: 6, kind: input, shape index: {}]   ;;  %s6831_s7 = inlined_call_operand.vmem [shape: f32[5,2,5], index: 7, kind: input, shape index: {}]   ;;  %s6832_s8 = inlined_call_operand.vmem [shape: f32[288,160], index: 8, kind: input, shape index: {}]   ;;  %s6833_s9 = inlined_call_operand.vmem [shape: f32[4,160], index: 9, kind: input, shape index: {}]   ;;  %s6834_s10 = inlined_call_operand.vmem [shape: f32[5,2,32], index: 10, kind: input, shape index: {}]   ;;  %s6835_s11 = inlined_call_operand.vmem [shape: f32[5,2,32], index: 11, kind: input, shape index: {}]   ;;  %s6836_s12 = inlined_call_operand.hbm [shape: f32[5,2,8], index: 12, kind: output, shape index: {}]  }
   0x1   :  { %s17_s23 = sshll.u32 %s6824_s0, 4  ;;  %s18_s23 = int_to_ptr.vmem [resolvable:$true] %s17_s23 }
   0x2   :  { %s5345_s24 = scalar_lea.vmem %s18_s23, 16  ;;  %p5350_p1 = scmp.lt.s32.totalorder %s18_s23, %s18_s23 }
   0x3   :  { %p5346_p0 = scmp.ne.s32.totalorder %s18_s23, %s5345_s24  ;;  %p5351_p2 = scmp.lt.s32.totalorder %s5345_s24, %s5345_s24 }
   0x5   :  { %p5352_p3 = por %p5351_p2, %p5350_p1 }
   0x7   :  { %p5353_p4 = pnand %p5352_p3, %p5346_p0 }
   0x9   :  { %5356 = shalt.err (!%p5353_p4)  }
   0xa   :  { %s5383_s25 = smov [#allocation6]  }
   0xb   :  { %20 = dma.vmem_to_smem %s18_s23, 16, %s5383_s25, [#allocation5] }
   0xc   :  { %5379 = dma.done.wait [#allocation5], 16 }
   0xd   :  { %5380 = vsyncadd [#allocation5], 4294967280 }
   0xe   :  { %22 = sfence }
   0xf   :  { %vm46_vm0 = vcmask 261120   ;;  %v53_v0 = vld [vmem:[%s6825_s1] sm:$0x1]  ;;  %vm54_vm1 = vcmask 253952   ;;  %v6845_v1 = vmov 0.0   ;;  %s118_s29 = sld [smem:[#allocation6]] }
  0x10   :  { %47 = vst.msk [vmem:[#allocation2] sm:$0xff] %vm46_vm0, %v6845_v1  ;;  %48 = vst.msk [vmem:[#allocation2 + $0x8] sm:$0xff] %vm46_vm0, %v6845_v1  ;;  %v56_v2 = vld [vmem:[%s6825_s1 + $0x1] sm:$0x1]  ;;  %s5481_s30 = sld [smem:[#allocation6 + $0x6]]  ;;  %547 = vmatprep.mubr.f32.mxu1 %v6845_v1  ;;  %v59_v4 = vld [vmem:[%s6832_s8 + $0x10] sm:$0xff] }
  0x11   :  { %49 = vst.msk [vmem:[#allocation2 + $0x10] sm:$0xff] %vm46_vm0, %v6845_v1  ;;  %50 = vst.msk [vmem:[#allocation3] sm:$0xff] %vm46_vm0, %v6845_v1  ;;  %v58_v3 = vld [vmem:[%s6832_s8] sm:$0xff]  ;;  %vm51_vm2 = vcmask 257024   ;;  %s3975_s1 = sld [smem:[#allocation6 + $0x1]]  ;;  %v6841_v5 = vmov 0.0|0.0  }
  0x12   :  { %55 = vst.msk [vmem:[#allocation2] sm:$0x1] %vm54_vm1, %v53_v0  ;;  %57 = vst.msk [vmem:[#allocation2 + $0xc] sm:$0x1] %vm54_vm1, %v56_v2  ;;  %4721 = vmatprep.subr.bf16.mxu0 %v6841_v5  ;;  %v5493_v6 = vpack.c.bf16 %v59_v4, %v58_v3  ;;  %v60_v7 = vld [vmem:[%s6832_s8 + $0x20] sm:$0xff]  ;;  %v61_v8 = vld [vmem:[%s6832_s8 + $0x30] sm:$0xff] }
  0x13   :  { %52 = vst.msk [vmem:[#allocation3 + $0x8] sm:$0xf] %vm51_vm2, %v6845_v1  ;;  %s3977_s21 = sld [smem:[#allocation6 + $0x7]]  ;;  %v5503_v9 = vpack.c.bf16 %v61_v8, %v60_v7 }
  0x14   :  { %4723 = vmatpush3.bf16.msra.mxu0 %v5493_v6 }
  0x15   :  { %23 = vsyncpa [#allocation8], 0  ;;  %4724 = vmatprep.subr.bf16.mxu0 %v6841_v5  ;;  %v62_v10 = vld [vmem:[%s6832_s8 + $0x40] sm:$0xff]  ;;  %v63_v11 = vld [vmem:[%s6832_s8 + $0x50] sm:$0xff]  ;;  %vm5386_vm3 = vmmov 0   ;;  %s123_s26 = scalar_lea.vmem [#allocation2], %s118_s29  ;;  %v146_v26 = vlaneseq }
  0x16   :  { %4317 = vmatprep.mubr.msk.f32.mxu0 %vm5386_vm3, %v6845_v1  ;;  %v5515_v13 = vpack.c.bf16 %v63_v11, %v62_v10  ;;  %s5387_s27 = smov 32   ;;  %v64_v15 = vld [vmem:[%s6832_s8 + $0x60] sm:$0xff]  ;;  %v65_v16 = vld [vmem:[%s6832_s8 + $0x70] sm:$0xff]  ;;  %s3889_s29 = scalar_lea.vmem [#allocation2], %s5481_s30  ;;  %vm129_vm4 = vcmask 516352   ;;  %vm150_vm5 = vcmask 523264  }
  0x17   :  { %s120_s0 = scalar_lea.vmem [#allocation3], %s3975_s1  ;;  %v5529_v19 = vpack.c.bf16 %v65_v16, %v64_v15  ;;  %s3983_s30 = sld [smem:[#allocation6 + $0x2]]  ;;  %v6839_v25 = vmov 0   ;;  %v5544_v27 = vshrl.u32 %v146_v26, 7  ;;  %v5552_v29 = vld [vmem:[%s6833_s9] sm:$0xff]  ;;  %v103_v41 = vld [vmem:[%s6832_s8 + $0x210] sm:$0xff] }
  0x18   :  { %4726 = vmatpush3.bf16.msra.mxu0 %v5503_v9  ;;  %6857 = vst [vmem:[#allocation11_spill] sm:$0xff] %v5515_v13  ;;  %s3985_s1 = sld [smem:[#allocation6 + $0x8]]  ;;  %5131 = vset.pattern.permute.xlu1 %v6839_v25  ;;  %v5563_v39 = vld [vmem:[%s6831_s7] sm:$0x3]  ;;  %v105_v44 = vld [vmem:[%s6832_s8 + $0x230] sm:$0xff]  ;;  %v5618_v11 = vld [vmem:[%s6827_s3 + $0x8] sm:$0xff] }
  0x19   :  { %v124_v12 = vld [vmem:[%s123_s26] sm:$0x1]  ;;  %4727 = vmatprep.subr.bf16.mxu0 %v6841_v5  ;;  %v3979_v17 = vld [vmem:[%s3889_s29 + $0xc] sm:$0x1]  ;;  %s3887_s16 = scalar_lea.vmem [#allocation3], %s3977_s21  ;;  %6858 = vst [vmem:[#allocation12_spill] sm:$0xff] %v5529_v19 }
  0x1a   :  { %126 = vrot.lane.b32.xlu0 %v124_v12, %s5387_s27  ;;  %v121_v14 = vld [vmem:[%s120_s0] sm:$0x1]  ;;  %v3978_v18 = vld [vmem:[%s3887_s16 + $0x6] sm:$0x1]  ;;  %6859 = vst [vmem:[#allocation13_spill] sm:$0xff] %v5544_v27  ;;  %v5547_v28 = vsub.s32 0, %v5544_v27 }
  0x1b   :  { %122 = vst.msk [vmem:[#allocation4] sm:$0x1] %vm54_vm1, %v121_v14  ;;  %136 = vst.msk [vmem:[#allocation4 + $0x1] sm:$0x1] %vm54_vm1, %v3978_v18  ;;  %s5389_s21 = smov 96   ;;  %v102_v40 = vld [vmem:[%s6832_s8 + $0x200] sm:$0xff] }
  0x1c   :  { %4729 = vmatpush3.bf16.msra.mxu0 %v5515_v13  ;;  %v5556_v30 = vrot.slane %v5552_v29, %v5547_v28  ;;  %v104_v42 = vld [vmem:[%s6832_s8 + $0x220] sm:$0xff]  ;;  %v5575_v43 = vpack.c.bf16 %v103_v41, %v102_v40  ;;  %v254_v46 = vsub.s32 3, %v5544_v27  ;;  %s5390_s29 = smov 64   ;;  %v5391_v58 = vmov 1966171168   ;;  %s3984_s19 = sld [smem:[#allocation6 + $0x3]] }
  0x1d   :  { %4730 = vmatprep.subr.bf16.mxu0 %v6841_v5  ;;  %s652_s17 = scalar_lea.vmem [#allocation3], %s3983_s30  ;;  %v5581_v45 = vpack.c.bf16 %v105_v44, %v104_v42  ;;  %v331_v59 = vunpack.c.l.s4 %v5391_v58  ;;  %v5611_v7 = vld [vmem:[%s6827_s3] sm:$0xff]  ;;  %v95_v41 = vld [vmem:[%s6832_s8 + $0x190] sm:$0xff]  ;;  %vm402_vm6 = vcmask 1041409   ;;  %vm406_vm8 = vcmask 58368   ;;  %s3998_s24 = sld [smem:[#allocation6 + $0xc]] }
  0x1e   :  { %141 = vrot.lane.b32.xlu0 %v3979_v17, %s5387_s27  ;;  %v653_v22 = vld [vmem:[%s652_s17] sm:$0x1]  ;;  %s3893_s18 = scalar_lea.vmem [#allocation3], %s3985_s1  ;;  %v5588_v50 = vrot.slane %v5552_v29, %v254_v46  ;;  %v97_v46 = vld [vmem:[%s6832_s8 + $0x1b0] sm:$0xff]  ;;  %vm680_vm9 = vcmask 779776   ;;  %vm479_vm10 = vcmask 785408  }
  0x1f   :  { %v3987_v23 = vld [vmem:[%s3893_s18 + $0x6] sm:$0x1]  ;;  %v332_v60 = vunpack.c.0.s8 %v331_v59  ;;  %s3986_s18 = sld [smem:[#allocation6 + $0x9]]  ;;  %vm646_vm11 = vcmask 254977   ;;  %s4000_s25 = sld [smem:[#allocation6 + $0x12]] }
  0x20   :  { %4732 = vmatpush3.bf16.msra.mxu0 %v5529_v19  ;;  %v94_v40 = vld [vmem:[%s6832_s8 + $0x180] sm:$0xff]  ;;  %s4001_s28 = sld [smem:[#allocation6 + $0x13]]  ;;  %s3999_s13 = sld [smem:[#allocation6 + $0xd]] }
  0x21   :  { %4733 = vmatprep.subr.bf16.mxu0 %v6841_v5  ;;  %v5603_v61 = vsub.s32 %v332_v60, %v5544_v27  ;;  %v5663_v42 = vpack.c.bf16 %v95_v41, %v94_v40  ;;  %v96_v44 = vld [vmem:[%s6832_s8 + $0x1a0] sm:$0xff]  ;;  %s4009_s30 = sld [smem:[#allocation6 + $0xe]] }
  0x22   :  { %s655_s22 = scalar_lea.vmem [#allocation3], %s3984_s19  ;;  %s3990_s19 = sld [smem:[#allocation6 + $0x4]] }
  0x23   :  { %s920_s26 = scalar_lea.vmem [#allocation2], %s3998_s24  ;;  %s4037_s24 = sld [smem:[#allocation6 + $0x20]] }
  0x25   :  { %s3895_s20 = scalar_lea.vmem [#allocation3], %s3986_s18  ;;  %s3907_s0 = scalar_lea.vmem [#allocation2], %s4000_s25 }
  0x26   :  { %s3905_s14 = scalar_lea.vmem [#allocation3], %s4001_s28  ;;  %s917_s15 = scalar_lea.vmem [#allocation3], %s3999_s13 }
  0x27   :  { %s4018_s25 = sld [smem:[#allocation6 + $0x16]]  ;;  %s4019_s13 = sld [smem:[#allocation6 + $0x17]] }
  0x8c   :  { %v127_v20 = vpop.permute.xlu0 %126 }
  0x8d   :  { %130 = vst.msk [vmem:[#allocation4] sm:$0x1] %vm129_vm4, %v127_v20 }
  0x90   :  { %v142_v21 = vpop.permute.xlu0 %141 }
  0x91   :  { %144 = vst.msk [vmem:[#allocation4 + $0x1] sm:$0x1] %vm129_vm4, %v142_v21 }
  0x98   :  { %v145_v24 = vld [vmem:[#allocation4] sm:$0x3] }
  0x99   :  { %667 = vst.msk [vmem:[#allocation4 + $0x1] sm:$0x1] %vm54_vm1, %v3987_v23  ;;  %654 = vst.msk [vmem:[#allocation4] sm:$0x1] %vm54_vm1, %v653_v22  ;;  %4318 = vmatmul.mubr.msk.f32.vlgmr.msra.gmra.mrb[0].mxu0 %vm150_vm5, %v145_v24  ;;  %v3988_v24 = vld [vmem:[%s3895_s20 + $0x6] sm:$0x1] }
  0x9a   :  { %4328 = vmatprep.mubr.msk.f32.mxu0 %vm5386_vm3, %v6845_v1  ;;  %4735 = vmatpush3.bf16.msra.mxu0 %v5575_v43  ;;  %s3992_s20 = sld [smem:[#allocation6 + $0xa]] }
  0x9b   :  { %4736 = vmatprep.subr.bf16.mxu0 %v6841_v5 }
  0x9e   :  { %4738 = vmatpush3.bf16.msra.mxu0 %v5581_v45 }
  0x9f   :  { %4763 = vmatprep.subr.bf16.mxu0 %v6841_v5 }
  0xa0   :  { %s3899_s23 = scalar_lea.vmem [#allocation3], %s3992_s20 }
 0x16c   :  { %v220_v31 = vpop.f32.mrb[0].mxu0 }
 0x16d   :  { %v221_v32 = vadd.f32 %v220_v31, %v5556_v30  ;;  %v4319_v33 = vpop.f32.mrb[1].mxu0  ;;  %v656_v31 = vld [vmem:[%s655_s22] sm:$0x1]  ;;  %s781_s22 = scalar_lea.vmem [#allocation3], %s3990_s19  ;;  %s4010_s19 = sld [smem:[#allocation6 + $0xf]] }
 0x16e   :  { %v90_v33 = vld [vmem:[%s6832_s8 + $0x140] sm:$0xff] }
 0x16f   :  { %v225_v34 = vsub.f32 0.0, %v221_v32 }
 0x171   :  { %v226_v35 = vmul.f32 1.442695, %v225_v34  ;;  %v91_v34 = vld [vmem:[%s6832_s8 + $0x150] sm:$0xff] }
 0x173   :  { %5156 = vpow2.f32 %v226_v35  ;;  %v92_v35 = vld [vmem:[%s6832_s8 + $0x160] sm:$0xff] }
 0x17d   :  { %v5157_v36 = vpop.eup %5156 }
 0x17e   :  { %v228_v37 = vadd.f32 1.0, %v5157_v36  ;;  %v5645_v36 = vpack.c.bf16 %v91_v34, %v90_v33 }
 0x180   :  { %5158 = vrcp.f32 %v228_v37  ;;  %v93_v37 = vld [vmem:[%s6832_s8 + $0x170] sm:$0xff] }
 0x181   :  { %5160 = vtanh.f32 %v221_v32  ;;  %v5634_v32 = vld [vmem:[%s6835_s11] sm:$0x3] }
 0x18a   :  { %v5159_v38 = vpop.eup %5158 }
 0x18b   :  { %232 = vrot.lane.b32.xlu1 %v5159_v38, %s5389_s21  ;;  %v5161_v47 = vpop.eup %5160  ;;  %v5653_v38 = vpack.c.bf16 %v93_v37, %v92_v35 }
 0x18f   :  { %243 = vperm.xlu1 %5131, %v5563_v39  }
 0x1fd   :  { %v233_v48 = vpop.permute.xlu1 %232 }
 0x1fe   :  { %v235_v49 = vmul.f32 %v5161_v47, %v233_v48  ;;  %v5673_v47 = vpack.c.bf16 %v97_v46, %v96_v44  ;;  %v98_v48 = vld [vmem:[%s6832_s8 + $0x1c0] sm:$0xff]  ;;  %v5742_v46 = vsub.s32 1, %v5544_v27 }
 0x200   :  { %237 = vrot.lane.b32.xlu0 %v235_v49, %s5390_s29  ;;  %6860 = vst [vmem:[#allocation14_spill] sm:$0xff] %v5742_v46 }
 0x204   :  { %367 = vrot.lane.b32.xlu0 %v5588_v50, %s5389_s21 }
 0x20e   :  { %v244_v52 = vpop.permute.xlu1 %243 }
 0x272   :  { %v238_v51 = vpop.permute.xlu0 %237 }
 0x273   :  { %v240_v53 = vsub.f32 %v235_v49, %v238_v51 }
 0x275   :  { %v246_v54 = vmul.f32 %v244_v52, %v240_v53  ;;  %v100_v52 = vld [vmem:[%s6832_s8 + $0x1e0] sm:$0xff]  ;;  %v101_v53 = vld [vmem:[%s6832_s8 + $0x1f0] sm:$0xff] }
 0x276   :  { %v5623_v16 = vpop.permute.xlu0 %367 }
 0x277   :  { %248 = vrot.lane.b32.xlu1 %v246_v54, %s5390_s29  ;;  %v5693_v54 = vpack.c.bf16 %v101_v53, %v100_v52 }
 0x27b   :  { %383 = vrot.lane.b32.xlu1 %v5588_v50, %s5387_s27 }
 0x2e9   :  { %v249_v55 = vpop.permute.xlu1 %248 }
 0x2ea   :  { %v5596_v56 = vadd.f32 %v249_v55, %v235_v49  ;;  %v99_v49 = vld [vmem:[%s6832_s8 + $0x1d0] sm:$0xff]  ;;  %v393_v55 = vand.u32 127, %v146_v26 }
 0x2eb   :  { %v5683_v51 = vpack.c.bf16 %v99_v49, %v98_v48 }
 0x2ec   :  { %4329 = vmatmul.mubr.msk.f32.vlgmr.msra.gmra.mrb[2].mxu0 %vm46_vm0, %v5596_v56  ;;  %v5702_v59 = vsub.s32 %v393_v55, %v5544_v27  ;;  %v5749_v55 = vld [vmem:[%s6834_s10] sm:$0x3] }
 0x2ed   :  { %4355 = vmatprep.mubr.msk.f32.mxu0 %vm5386_vm3, %v6845_v1  ;;  %v384_v57 = vpop.permute.xlu1 %383  ;;  %4765 = vmatpush3.bf16.msra.mxu0 %v5645_v36 }
 0x2ee   :  { %5111 = vpush %v384_v57  ;;  %4766 = vmatprep.subr.bf16.mxu0 %v6841_v5 }
 0x2f1   :  { %4768 = vmatpush3.bf16.msra.mxu0 %v5653_v38 }
 0x2f2   :  { %4769 = vmatprep.subr.bf16.mxu0 %v6841_v5 }
 0x2f5   :  { %4771 = vmatpush3.bf16.msra.mxu0 %v5663_v42 }
 0x2f6   :  { %4772 = vmatprep.subr.bf16.mxu0 %v6841_v5 }
 0x2f9   :  { %4774 = vmatpush3.bf16.msra.mxu0 %v5673_v47 }
 0x2fa   :  { %4775 = vmatprep.subr.bf16.mxu0 %v6841_v5 }
 0x2fd   :  { %4777 = vmatpush3.bf16.msra.mxu0 %v5683_v51 }
 0x2fe   :  { %4778 = vmatprep.subr.bf16.mxu0 %v6841_v5 }
 0x301   :  { %4780 = vmatpush3.bf16.msra.mxu0 %v5693_v54 }
 0x302   :  { %4799 = vmatprep.subr.bf16.mxu0 %v6841_v5 }
 0x31f   :  { %s5112_s16 = spop %5111 }
 0x320   :  { %v5699_v57 = vstv %s5112_s16  ;;  %s4011_s16 = sld [smem:[#allocation6 + $0x14]] }
 0x326   :  { %s3911_s1 = scalar_lea.vmem [#allocation3], %s4011_s16  ;;  %s3919_s16 = scalar_lea.vmem [#allocation3], %s4019_s13 }
 0x3bf   :  { %v325_v62 = vpop.f32.mrb[2].mxu0 }
 0x3c0   :  { %v326_v63 = vadd.f32 %v325_v62, %v5588_v50  ;;  %v4330_v0 = vpop.f32.mrb[3].mxu0 }
 0x3c2   :  { %v336_v2 = vrot.slane %v326_v63, %v5603_v61  ;;  %v5708_v63 = vld [vmem:[%s6829_s5] sm:$0x3]  ;;  %s3993_s5 = sld [smem:[#allocation6 + $0xb]] }
 0x3c3   :  { %vm114_vm7 = vcmp.gt.f32.partialorder %v5708_v63, 0.5 }
 0x3c4   :  { %v337_v3 = vcombine.high %v336_v2, %v336_v2  ;;  %v344_v4 = vrot.slane %v336_v2, %v5603_v61 }
 0x3c6   :  { %v351_v8 = vrot.slane %v337_v3, %v5603_v61  ;;  %v355_v10 = vrot.slane %v344_v4, %v5547_v28 }
 0x3c8   :  { %v359_v12 = vrot.slane %v351_v8, %v5547_v28  ;;  %v362_v14 = vadd.f32 %v355_v10, %v5611_v7  ;;  %s3901_s18 = scalar_lea.vmem [#allocation3], %s3993_s5  ;;  %s4024_s5 = sld [smem:[#allocation6 + $0x18]] }
 0x3ca   :  { %v363_v15 = vadd.f32 %v359_v12, %v5618_v11  ;;  %5162 = vtanh.f32 %v362_v14 }
 0x3cc   :  { %5164 = vtanh.f32 %v363_v15 }
 0x3d4   :  { %v5163_v17 = vpop.eup %5162 }
 0x3d5   :  { %v370_v18 = vmul.f32 %v5163_v17, %v5623_v16 }
 0x3d6   :  { %v5165_v20 = vpop.eup %5164 }
 0x3d7   :  { %v372_v21 = vsel %vm46_vm0, %v370_v18, 0.0  ;;  %v371_v22 = vmul.f32 %v5165_v20, %v5623_v16 }
 0x3d8   :  { %373 = vadd.xlane.f32.xlu0 %v372_v21 }
 0x3d9   :  { %v375_v23 = vsel %vm46_vm0, %v371_v22, 0.0 }
 0x3da   :  { %376 = vadd.xlane.f32.xlu1 %v375_v23 }
 0x3eb   :  { %672 = vrot.lane.b32.xlu1 %v3988_v24, %s5387_s27 }
 0x3ee   :  { %658 = vrot.lane.b32.xlu0 %v656_v31, %s5387_s27  ;;  %v685_v31 = vsub.s32 2, %v5544_v27 }
 0x3f0   :  { %v5735_v33 = vrot.slane %v5552_v29, %v685_v31  ;;  %v81_v31 = vld [vmem:[%s6832_s8 + $0xf8] sm:$0xff] }
 0x3f2   :  { %677 = vrot.lane.b32.xlu0 %v5634_v32, %s5390_s29 }
 0x465   :  { %v374_v58 = vpop.xlane.xlu0 %373 }
 0x466   :  { %v388_v60 = vadd.f32 %v5699_v57, %v374_v58  ;;  %v6837_v58 = vmov 3  }
 0x467   :  { %v377_v62 = vpop.xlane.xlu1 %376  ;;  %5132 = vset.pattern.permute.xlu1 %v6837_v58 }
 0x468   :  { %v389_v0 = vadd.f32 %v5699_v57, %v377_v62  ;;  %v397_v26 = vrot.slane %v388_v60, %v5702_v59  ;;  %v67_v62 = vld [vmem:[%s6832_s8 + $0x88] sm:$0xff] }
 0x469   :  { %v659_v2 = vpop.permute.xlu0 %658 }
 0x46a   :  { %v401_v3 = vrot.slane %v389_v0, %v5702_v59  ;;  %661 = vst.msk [vmem:[#allocation4] sm:$0x1] %vm129_vm4, %v659_v2  ;;  %v69_v0 = vld [vmem:[%s6832_s8 + $0x98] sm:$0xff]  ;;  %v66_v2 = vld [vmem:[%s6832_s8 + $0x80] sm:$0xff] }
 0x46b   :  { %v673_v4 = vpop.permute.xlu1 %672 }
 0x46c   :  { %v403_v8 = vsel %vm402_vm6, %v401_v3, %v397_v26  ;;  %675 = vst.msk [vmem:[#allocation4 + $0x1] sm:$0x1] %vm129_vm4, %v673_v4  ;;  %v5764_v26 = vpack.c.bf16 %v69_v0, %v67_v62  ;;  %v68_v3 = vld [vmem:[%s6832_s8 + $0x90] sm:$0xff]  ;;  %v71_v4 = vld [vmem:[%s6832_s8 + $0xa8] sm:$0xff]  ;;  %v89_v0 = vld [vmem:[%s6832_s8 + $0x138] sm:$0xff] }
 0x46d   :  { %v405_v10 = vsel %vm114_vm7, %v403_v8, -1e+12  ;;  %v678_v12 = vpop.permute.xlu0 %677  ;;  %v73_v8 = vld [vmem:[%s6832_s8 + $0xb8] sm:$0xff]  ;;  %v87_v62 = vld [vmem:[%s6832_s8 + $0x128] sm:$0xff] }
 0x46e   :  { %v407_v14 = vsel %vm406_vm8, %v405_v10, -inf  ;;  %681 = vst.msk [vmem:[#allocation4] sm:$0x3] %vm680_vm9, %v678_v12  ;;  %v5777_v12 = vpack.c.bf16 %v73_v8, %v71_v4  ;;  %4740 = vmatprep.subr.bf16.mxu1 %v5764_v26  ;;  %v86_v4 = vld [vmem:[%s6832_s8 + $0x120] sm:$0xff]  ;;  %v88_v8 = vld [vmem:[%s6832_s8 + $0x130] sm:$0xff] }
 0x46f   :  { %408 = vmax.xlane.f32.xlu1 %v407_v14  ;;  %v70_v14 = vld [vmem:[%s6832_s8 + $0xa0] sm:$0xff] }
 0x475   :  { %v682_v15 = vld [vmem:[#allocation4] sm:$0x3] }
 0x476   :  { %4356 = vmatmul.mubr.msk.f32.vlgmr.msra.gmra.mrb[4].mxu0 %vm479_vm10, %v682_v15  ;;  %v72_v15 = vld [vmem:[%s6832_s8 + $0xb0] sm:$0xff] }
 0x477   :  { %4801 = vmatpush3.bf16.msra.mxu0 %v5493_v6  ;;  %4401 = vmatprep.mubr.msk.f32.mxu0 %vm5386_vm3, %v6845_v1 }
 0x478   :  { %4802 = vmatprep.subr.bf16.mxu0 %v6841_v5 }
 0x47b   :  { %4804 = vmatpush3.bf16.msra.mxu0 %v5503_v9 }
 0x47c   :  { %4805 = vmatprep.subr.bf16.mxu0 %v6841_v5 }
 0x47f   :  { %4807 = vmatpush3.bf16.msra.mxu0 %v5515_v13 }
 0x480   :  { %4808 = vmatprep.subr.bf16.mxu0 %v6841_v5 }
 0x483   :  { %4810 = vmatpush3.bf16.msra.mxu0 %v5529_v19 }
 0x484   :  { %4811 = vmatprep.subr.bf16.mxu0 %v6841_v5 }
 0x4fc   :  { %v409_v17 = vpop.xlane.xlu1 %408 }
 0x4fd   :  { %v410_v18 = vsub.f32 %v405_v10, %v409_v17  ;;  %v5775_v10 = vpack.c.bf16 %v68_v3, %v66_v2  ;;  %v75_v17 = vld [vmem:[%s6832_s8 + $0xc8] sm:$0xff]  ;;  %v5850_v3 = vpack.c.bf16 %v89_v0, %v87_v62 }
 0x4ff   :  { %v411_v20 = vmul.f32 1.442695, %v410_v18  ;;  %v77_v18 = vld [vmem:[%s6832_s8 + $0xd8] sm:$0xff]  ;;  %4742 = vmatpush1.bf16.msra.mxu1 %v5775_v10 }
 0x500   :  { %4744 = vmatprep.subr.bf16.mxu1 %v5777_v12 }
 0x501   :  { %5166 = vpow2.f32 %v411_v20  ;;  %v5793_v20 = vpack.c.bf16 %v72_v15, %v70_v14  ;;  %v5859_v14 = vpack.c.bf16 %v88_v8, %v86_v4  ;;  %v5867_v15 = vld [vmem:[%s6826_s2 + $0x8] sm:$0xff] }
 0x503   :  { %4746 = vmatpush1.bf16.msra.mxu1 %v5793_v20 }
 0x50b   :  { %v5167_v21 = vpop.eup %5166 }
 0x50c   :  { %v413_v22 = vsel %vm406_vm8, %v5167_v21, 0.0 }
 0x50d   :  { %414 = vadd.xlane.f32.xlu0 %v413_v22  ;;  %v74_v22 = vld [vmem:[%s6832_s8 + $0xc0] sm:$0xff] }
 0x549   :  { %v756_v23 = vpop.f32.mrb[4].mxu0 }
 0x54a   :  { %v4357_v24 = vpop.f32.mrb[5].mxu0  ;;  %v5738_v34 = vadd.f32 %v756_v23, %v5735_v33  ;;  %v76_v23 = vld [vmem:[%s6832_s8 + $0xd0] sm:$0xff] }
 0x54b   :  { %v79_v24 = vld [vmem:[%s6832_s8 + $0xe8] sm:$0xff] }
 0x54c   :  { %v761_v35 = vsub.f32 0.0, %v5738_v34 }
 0x54e   :  { %v762_v37 = vmul.f32 1.442695, %v761_v35  ;;  %v5811_v35 = vpack.c.bf16 %v76_v23, %v74_v22 }
 0x550   :  { %5168 = vpow2.f32 %v762_v37  ;;  %v5814_v37 = vpack.c.bf16 %v81_v31, %v79_v24 }
 0x55a   :  { %v5169_v41 = vpop.eup %5168 }
 0x55b   :  { %v764_v44 = vadd.f32 1.0, %v5169_v41  ;;  %v80_v41 = vld [vmem:[%s6832_s8 + $0xf0] sm:$0xff] }
 0x59a   :  { %v415_v40 = vpop.xlane.xlu0 %414 }
 0x59b   :  { %5170 = vrcp.f32 %v415_v40  ;;  %v78_v40 = vld [vmem:[%s6832_s8 + $0xe0] sm:$0xff] }
 0x59c   :  { %5172 = vrcp.f32 %v764_v44  ;;  %v83_v44 = vld [vmem:[%s6832_s8 + $0x108] sm:$0xff] }
 0x59d   :  { %5174 = vtanh.f32 %v5738_v34 }
 0x5a5   :  { %v5171_v48 = vpop.eup %5170 }
 0x5a6   :  { %v417_v49 = vmul.f32 %v5171_v48, %v5167_v21  ;;  %v5173_v60 = vpop.eup %5172  ;;  %v5796_v21 = vpack.c.bf16 %v77_v18, %v75_v17  ;;  %v85_v48 = vld [vmem:[%s6832_s8 + $0x118] sm:$0xff]  ;;  %v5872_v17 = vld [vmem:[%s6826_s2] sm:$0xff] }
 0x5a7   :  { %v5175_v34 = vpop.eup %5174 }
 0x5a8   :  { %v428_v52 = vrot.slane %v417_v49, %v5742_v46  ;;  %v421_v53 = vrot.slane %v417_v49, %v5547_v28  ;;  %4748 = vmatprep.subr.bf16.mxu1 %v5796_v21  ;;  %v5829_v49 = vpack.c.bf16 %v80_v41, %v78_v40 }
 0x5a9   :  { %4750 = vmatpush1.bf16.msra.mxu1 %v5811_v35 }
 0x5aa   :  { %430 = vbcast.lane.b32.xlu1 %v428_v52, 256  ;;  %423 = vbcast.lane.b32.xlu0 %v421_v53, 256  ;;  %v5832_v52 = vpack.c.bf16 %v85_v48, %v83_v44  ;;  %v82_v53 = vld [vmem:[%s6832_s8 + $0x100] sm:$0xff] }
 0x5ab   :  { %4752 = vmatprep.subr.bf16.mxu1 %v5814_v37 }
 0x5ad   :  { %4754 = vmatpush1.bf16.msra.mxu1 %v5829_v49 }
 0x5ae   :  { %456 = vrot.lane.b32.xlu0 %v5749_v55, %s5390_s29  ;;  %4756 = vmatprep.subr.bf16.mxu1 %v5832_v52 }
 0x5b2   :  { %768 = vrot.lane.b32.xlu0 %v5173_v60, %s5389_s21  ;;  %v84_v60 = vld [vmem:[%s6832_s8 + $0x110] sm:$0xff]  ;;  %s3991_s8 = sld [smem:[#allocation6 + $0x5]] }
 0x5b3   :  { %v5847_v2 = vpack.c.bf16 %v84_v60, %v82_v53 }
 0x5b5   :  { %4758 = vmatpush1.bf16.msra.mxu1 %v5847_v2 }
 0x5b6   :  { %4760 = vmatprep.subr.bf16.mxu1 %v5850_v3 }
 0x5b8   :  { %s784_s17 = scalar_lea.vmem [#allocation3], %s3991_s8  ;;  %s1396_s8 = scalar_lea.vmem [#allocation3], %s4009_s30 }
 0x5b9   :  { %4762 = vmatpush1.bf16.msra.mxu1 %v5859_v14  ;;  %s4017_s30 = sld [smem:[#allocation6 + $0x11]] }
 0x5ba   :  { %4781 = vmatprep.subr.bf16.mxu1 %v6841_v5 }
 0x61c   :  { %v431_v18 = vpop.permute.xlu1 %430  ;;  %v424_v22 = vpop.permute.xlu0 %423 }
 0x61d   :  { %v433_v23 = vmul.f32 %v431_v18, %v5867_v15  ;;  %v432_v24 = vmul.f32 %v424_v22, %v5872_v17  ;;  %v785_v22 = vld [vmem:[%s784_s17] sm:$0x1] }
 0x61f   :  { %v441_v31 = vsel %vm46_vm0, %v433_v23, 0.0  ;;  %v434_v40 = vsel %vm46_vm0, %v432_v24, 0.0  ;;  %v3995_v23 = vld [vmem:[%s3901_s18 + $0x6] sm:$0x1]  ;;  %v782_v24 = vld [vmem:[%s781_s22] sm:$0x1] }
 0x620   :  { %v442_v41 = vrot.slane %v441_v31, 4  ;;  %v435_v44 = vrot.slane %v434_v40, 4  ;;  %801 = vrot.lane.b32.xlu0 %v3995_v23, %s5387_s27  ;;  %783 = vst.msk [vmem:[#allocation4] sm:$0x1] %vm54_vm1, %v782_v24  ;;  %s4012_s18 = sld [smem:[#allocation6 + $0x15]]  ;;  %s1399_s22 = scalar_lea.vmem [#allocation3], %s4010_s19 }
 0x621   :  { %s4027_s19 = sld [smem:[#allocation6 + $0x1f]] }
 0x622   :  { %v443_v48 = vadd.f32 %v442_v41, %v441_v31  ;;  %v436_v53 = vadd.f32 %v435_v44, %v434_v40  ;;  %v6861_v44 = vmov 0.0|0.0  }
 0x624   :  { %v444_v60 = vrot.slane %v443_v48, 2  ;;  %v437_v62 = vrot.slane %v436_v53, 2 }
 0x626   :  { %v445_v0 = vadd.f32 %v444_v60, %v443_v48  ;;  %v438_v4 = vadd.f32 %v437_v62, %v436_v53  ;;  %s3913_s20 = scalar_lea.vmem [#allocation3], %s4012_s18  ;;  %s1659_s18 = scalar_lea.vmem [#allocation2], %s4024_s5 }
 0x628   :  { %v439_v8 = vrot.slane %v438_v4, 1  ;;  %v446_v58 = vrot.slane %v445_v0, 1 }
 0x62a   :  { %v440_v25 = vadd.f32 %v439_v8, %v438_v4  ;;  %v447_v5 = vadd.f32 %v446_v58, %v445_v0  ;;  %v3994_v58 = vld [vmem:[%s3899_s23 + $0x6] sm:$0x1]  ;;  %v6847_v8 = vmov 2  }
 0x62b   :  { %796 = vst.msk [vmem:[#allocation4 + $0x1] sm:$0x1] %vm54_vm1, %v3994_v58  ;;  %5133 = vset.pattern.permute.xlu0 %v6847_v8 }
 0x62c   :  { %v451_v18 = vsel %vm402_vm6, %v447_v5, %v440_v25  ;;  %v457_v5 = vpop.permute.xlu0 %456  ;;  %636 = vperm.xlu0 %5133, %v5563_v39  }
 0x62d   :  { %452 = vrot.lane.b32.xlu1 %v451_v18, %s5387_s27 }
 0x630   :  { %v769_v41 = vpop.permute.xlu0 %768 }
 0x631   :  { %774 = vperm.xlu1 %5132, %v5563_v39  }
 0x635   :  { %787 = vrot.lane.b32.xlu1 %v785_v22, %s5387_s27  ;;  %v464_v22 = vrot.slane %v5552_v29, %v5742_v46  ;;  %v6849_v29 = vmov 1  }
 0x636   :  { %5135 = vset.pattern.permute.xlu1 %v6849_v29 }
 0x637   :  { %v5932_v23 = vrot.slane %v464_v22, %v5742_v46 }
 0x692   :  { %v802_v48 = vpop.permute.xlu0 %801 }
 0x693   :  { %804 = vst.msk [vmem:[#allocation4 + $0x1] sm:$0x1] %vm129_vm4, %v802_v48 }
 0x69f   :  { %v453_v25 = vpop.permute.xlu1 %452 }
 0x6a0   :  { %v459_v31 = vsel %vm46_vm0, %v5596_v56, %v453_v25  ;;  %v771_v56 = vmul.f32 %v5175_v34, %v769_v41  ;;  %v6843_v34 = vmov 4  }
 0x6a1   :  { %v460_v40 = vsel %vm150_vm5, %v459_v31, %v457_v5  ;;  %5134 = vset.pattern.permute.xlu0 %v6843_v34 }
 0x6a2   :  { %3982 = vmatmul.mubr.msk.f32.vlgmr.msra.gmra.mrb[0].mxu1 %vm479_vm10, %v460_v40  ;;  %v772_v53 = vsub.f32 %v771_v56, %v5634_v32  ;;  %898 = vperm.xlu0 %5134, %v5563_v39  }
 0x6a3   :  { %4783 = vmatpush3.bf16.msra.mxu1 %v5645_v36  ;;  %4382 = vmatprep.mubr.msk.f32.mxu1 %vm5386_vm3, %v6845_v1 }
 0x6a4   :  { %4784 = vmatprep.subr.bf16.mxu1 %v6861_v44 }
 0x6a6   :  { %5138 = vset.pattern.permute.xlu0 %v6847_v8 }
 0x6a7   :  { %4786 = vmatpush3.bf16.msra.mxu1 %v5653_v38 }
 0x6a8   :  { %4787 = vmatprep.subr.bf16.mxu1 %v6861_v44 }
 0x6ab   :  { %4789 = vmatpush3.bf16.msra.mxu1 %v5663_v42 }
 0x6ac   :  { %4790 = vmatprep.subr.bf16.mxu1 %v6861_v44 }
 0x6af   :  { %4792 = vmatpush3.bf16.msra.mxu1 %v5673_v47 }
 0x6b0   :  { %v775_v60 = vpop.permute.xlu1 %774  ;;  %4793 = vmatprep.subr.bf16.mxu1 %v6861_v44 }
 0x6b1   :  { %v777_v62 = vmul.f32 %v775_v60, %v772_v53 }
 0x6b3   :  { %v5903_v0 = vadd.f32 %v777_v62, %v5634_v32  ;;  %4795 = vmatpush3.bf16.msra.mxu1 %v5683_v51 }
 0x6b4   :  { %v788_v4 = vpop.permute.xlu1 %787  ;;  %4796 = vmatprep.subr.bf16.mxu1 %v6861_v44 }
 0x6b5   :  { %806 = vrot.lane.b32.xlu1 %v5903_v0, %s5390_s29  ;;  %790 = vst.msk [vmem:[#allocation4] sm:$0x1] %vm129_vm4, %v788_v4 }
 0x6b7   :  { %4798 = vmatpush3.bf16.msra.mxu1 %v5693_v54 }
 0x6b8   :  { %4818 = vmatprep.subr.bf16.mxu1 %v5764_v26 }
 0x727   :  { %v807_v32 = vpop.permute.xlu1 %806 }
 0x728   :  { %809 = vst.msk [vmem:[#allocation4] sm:$0x3] %vm680_vm9, %v807_v32 }
 0x72f   :  { %v810_v18 = vld [vmem:[#allocation4] sm:$0x3] }
 0x730   :  { %4383 = vmatmul.mubr.msk.f32.vlgmr.msra.gmra.mrb[2].mxu1 %vm479_vm10, %v810_v18  ;;  %v637_v18 = vpop.permute.xlu0 %636 }
 0x731   :  { %4820 = vmatpush1.bf16.msra.mxu1 %v5775_v10  ;;  %1298 = vmatprep.mubr.f32.mxu1 %v6845_v1 }
 0x732   :  { %4822 = vmatprep.subr.bf16.mxu1 %v5777_v12 }
 0x735   :  { %4824 = vmatpush1.bf16.msra.mxu1 %v5793_v20 }
 0x736   :  { %4826 = vmatprep.subr.bf16.mxu1 %v5796_v21 }
 0x739   :  { %4828 = vmatpush1.bf16.msra.mxu1 %v5811_v35 }
 0x73a   :  { %4830 = vmatprep.subr.bf16.mxu1 %v5814_v37 }
 0x73d   :  { %4832 = vmatpush1.bf16.msra.mxu1 %v5829_v49 }
 0x73e   :  { %4834 = vmatprep.subr.bf16.mxu1 %v5832_v52 }
 0x741   :  { %4836 = vmatpush1.bf16.msra.mxu1 %v5847_v2 }
 0x742   :  { %4838 = vmatprep.subr.bf16.mxu1 %v5850_v3 }
 0x745   :  { %4840 = vmatpush1.bf16.msra.mxu1 %v5859_v14 }
 0x746   :  { %4859 = vmatprep.subr.bf16.mxu1 %v6861_v44 }
 0x775   :  { %v549_v24 = vpop.f32.mrb[0].mxu1 }
 0x776   :  { %v550_v58 = vadd.f32 %v549_v24, %v5932_v23  ;;  %v5935_v5 = vpop.f32.mrb[1].mxu1 }
 0x777   :  { %6862 = vst [vmem:[#allocation15_spill] sm:$0xff] %v5935_v5 }
 0x778   :  { %v555_v25 = vsub.f32 0.0, %v550_v58 }
 0x77a   :  { %v556_v31 = vmul.f32 1.442695, %v555_v25 }
 0x77c   :  { %5176 = vpow2.f32 %v556_v31 }
 0x786   :  { %v5177_v40 = vpop.eup %5176 }
 0x787   :  { %v558_v41 = vadd.f32 1.0, %v5177_v40 }
 0x789   :  { %5178 = vrcp.f32 %v558_v41  ;;  %v6863_v41 = vmov 0  }
 0x78a   :  { %5180 = vtanh.f32 %v550_v58 }
 0x793   :  { %v5179_v48 = vpop.eup %5178 }
 0x794   :  { %562 = vrot.lane.b32.xlu1 %v5179_v48, %s5389_s21  ;;  %v5181_v62 = vpop.eup %5180 }
 0x803   :  { %v880_v56 = vpop.f32.mrb[2].mxu1 }
 0x804   :  { %v881_v53 = vadd.f32 %v880_v56, %v5735_v33  ;;  %v4384_v60 = vpop.f32.mrb[3].mxu1 }
 0x806   :  { %v885_v4 = vsub.f32 0.0, %v881_v53  ;;  %v563_v32 = vpop.permute.xlu1 %562 }
 0x807   :  { %v565_v22 = vmul.f32 %v5181_v62, %v563_v32 }
 0x808   :  { %v886_v24 = vmul.f32 1.442695, %v885_v4 }
 0x809   :  { %v639_v25 = vmul.f32 %v637_v18, %v565_v22  ;;  %v899_v22 = vpop.permute.xlu0 %898 }
 0x80a   :  { %5182 = vpow2.f32 %v886_v24 }
 0x80b   :  { %640 = vst.msk [vmem:[#allocation2 + $0x2] sm:$0x1] %vm54_vm1, %v639_v25  ;;  %642 = vrot.lane.b32.xlu1 %v639_v25, %s5390_s29 }
 0x80c   :  { %647 = vst.msk [vmem:[#allocation2 + $0xd] sm:$0x2] %vm646_vm11, %v639_v25 }
 0x814   :  { %v5183_v58 = vpop.eup %5182 }
 0x815   :  { %v888_v31 = vadd.f32 1.0, %v5183_v58 }
 0x817   :  { %5184 = vrcp.f32 %v888_v31 }
 0x818   :  { %5186 = vtanh.f32 %v881_v53 }
 0x821   :  { %v5185_v40 = vpop.eup %5184 }
 0x822   :  { %892 = vrot.lane.b32.xlu1 %v5185_v40, %s5389_s21  ;;  %v5187_v62 = vpop.eup %5186 }
 0x826   :  { %905 = vperm.xlu1 %5135, %v5563_v39  }
 0x82a   :  { %5136 = vset.pattern.permute.xlu1 %v6863_v41 }
 0x87d   :  { %v643_v48 = vpop.permute.xlu1 %642 }
 0x87e   :  { %645 = vst.msk [vmem:[#allocation2 + $0x3] sm:$0x1] %vm54_vm1, %v643_v48 }
 0x87f   :  { %648 = vst.msk [vmem:[#allocation2 + $0xe] sm:$0x2] %vm646_vm11, %v643_v48 }
 0x886   :  { %v921_v56 = vld [vmem:[%s920_s26] sm:$0x1]  ;;  %v4003_v60 = vld [vmem:[%s3907_s0 + $0xc] sm:$0x1]  ;;  %s4016_s26 = sld [smem:[#allocation6 + $0x10]]  ;;  %s3917_s0 = scalar_lea.vmem [#allocation3], %s4018_s25 }
 0x887   :  { %937 = vrot.lane.b32.xlu1 %v4003_v60, %s5387_s27  ;;  %923 = vrot.lane.b32.xlu0 %v921_v56, %s5387_s27  ;;  %s4035_s25 = sld [smem:[#allocation6 + $0x1a]] }
 0x88c   :  { %s1520_s28 = scalar_lea.vmem [#allocation3], %s4016_s26  ;;  %s3929_s26 = scalar_lea.vmem [#allocation3], %s4037_s24 }
 0x894   :  { %v893_v39 = vpop.permute.xlu1 %892 }
 0x895   :  { %v895_v4 = vmul.f32 %v5187_v62, %v893_v39 }
 0x897   :  { %v896_v32 = vsub.f32 %v895_v4, %v5903_v0  ;;  %v5974_v4 = vld [vmem:[%s6831_s7 + $0x2] sm:$0x3] }
 0x898   :  { %1034 = vperm.xlu1 %5136, %v5974_v4  }
 0x899   :  { %v901_v24 = vmul.f32 %v899_v22, %v896_v32  ;;  %v6864_v32 = vmov 3  }
 0x89b   :  { %v902_v25 = vadd.f32 %v901_v24, %v5903_v0 }
 0x89c   :  { %5137 = vset.pattern.permute.xlu1 %v6864_v32 }
 0x89d   :  { %v903_v58 = vsub.f32 %v5749_v55, %v902_v25 }
 0x8a5   :  { %v906_v31 = vpop.permute.xlu1 %905 }
 0x8a6   :  { %v908_v40 = vmul.f32 %v906_v31, %v903_v58 }
 0x8a8   :  { %v909_v48 = vadd.f32 %v908_v40, %v902_v25 }
 0x8aa   :  { %v910_v60 = vmul.f32 %v909_v48, %v637_v18 }
 0x8ac   :  { %911 = vst.msk [vmem:[#allocation3 + $0x1] sm:$0x1] %vm54_vm1, %v910_v60 }
 0x8ad   :  { %912 = vst.msk [vmem:[#allocation3 + $0x6] sm:$0x2] %vm646_vm11, %v910_v60 }
 0x8b4   :  { %v4002_v53 = vld [vmem:[%s3905_s14 + $0x6] sm:$0x1]  ;;  %v918_v56 = vld [vmem:[%s917_s15] sm:$0x1]  ;;  %s4064_s14 = sld [smem:[#allocation6 + $0x2d]]  ;;  %s4062_s15 = sld [smem:[#allocation6 + $0x27]] }
 0x8b5   :  { %932 = vst.msk [vmem:[#allocation4 + $0x1] sm:$0x1] %vm54_vm1, %v4002_v53  ;;  %919 = vst.msk [vmem:[#allocation4] sm:$0x1] %vm54_vm1, %v918_v56  ;;  %v4013_v18 = vld [vmem:[%s3911_s1 + $0x6] sm:$0x1] }
 0x8b6   :  { %v1397_v62 = vld [vmem:[%s1396_s8] sm:$0x1]  ;;  %s1523_s1 = scalar_lea.vmem [#allocation3], %s4017_s30  ;;  %s4026_s8 = sld [smem:[#allocation6 + $0x1e]] }
 0x8b7   :  { %s4043_s30 = sld [smem:[#allocation6 + $0x1d]] }
 0x8bc   :  { %s3925_s17 = scalar_lea.vmem [#allocation2], %s4026_s8  ;;  %s4036_s8 = sld [smem:[#allocation6 + $0x1b]] }
 0x8f9   :  { %v938_v55 = vpop.permute.xlu1 %937  ;;  %v924_v0 = vpop.permute.xlu0 %923 }
 0x8fa   :  { %940 = vst.msk [vmem:[#allocation4 + $0x1] sm:$0x1] %vm129_vm4, %v938_v55  ;;  %926 = vst.msk [vmem:[#allocation4] sm:$0x1] %vm129_vm4, %v924_v0 }
 0x901   :  { %v941_v39 = vld [vmem:[#allocation4] sm:$0x3] }
 0x902   :  { %1398 = vst.msk [vmem:[#allocation4] sm:$0x1] %vm54_vm1, %v1397_v62  ;;  %1411 = vst.msk [vmem:[#allocation4 + $0x1] sm:$0x1] %vm54_vm1, %v4013_v18  ;;  %4402 = vmatmul.mubr.msk.f32.vlgmr.msra.gmra.mrb[6].mxu0 %vm150_vm5, %v941_v39 }
 0x903   :  { %4813 = vmatpush3.bf16.msra.mxu0 %v5575_v43  ;;  %4412 = vmatprep.mubr.msk.f32.mxu0 %vm5386_vm3, %v6845_v1 }
 0x904   :  { %4814 = vmatprep.subr.bf16.mxu0 %v6861_v44 }
 0x907   :  { %4816 = vmatpush3.bf16.msra.mxu0 %v5581_v45 }
 0x908   :  { %4841 = vmatprep.subr.bf16.mxu0 %v6861_v44 }
 0x917   :  { %v1035_v18 = vpop.permute.xlu1 %1034 }
 0x9d5   :  { %v1011_v22 = vpop.f32.mrb[6].mxu0 }
 0x9d6   :  { %v1012_v24 = vadd.f32 %v1011_v22, %v5556_v30  ;;  %v4403_v25 = vpop.f32.mrb[7].mxu0 }
 0x9d8   :  { %v1016_v58 = vsub.f32 0.0, %v1012_v24 }
 0x9da   :  { %v1017_v31 = vmul.f32 1.442695, %v1016_v58 }
 0x9dc   :  { %5188 = vpow2.f32 %v1017_v31 }
 0x9e6   :  { %v5189_v40 = vpop.eup %5188 }
 0x9e7   :  { %v1019_v48 = vadd.f32 1.0, %v5189_v40 }
 0x9e9   :  { %5190 = vrcp.f32 %v1019_v48 }
 0x9ea   :  { %5192 = vtanh.f32 %v1012_v24 }
 0x9f3   :  { %v5191_v60 = vpop.eup %5190 }
 0x9f4   :  { %1023 = vrot.lane.b32.xlu0 %v5191_v60, %s5389_s21  ;;  %v5193_v53 = vpop.eup %5192 }
 0xa66   :  { %v1024_v56 = vpop.permute.xlu0 %1023 }
 0xa67   :  { %v1026_v55 = vmul.f32 %v5193_v53, %v1024_v56 }
 0xa69   :  { %1028 = vrot.lane.b32.xlu0 %v1026_v55, %s5390_s29 }
 0xadb   :  { %v1029_v0 = vpop.permute.xlu0 %1028 }
 0xadc   :  { %v1031_v62 = vsub.f32 %v1026_v55, %v1029_v0 }
 0xade   :  { %v1037_v39 = vmul.f32 %v1035_v18, %v1031_v62 }
 0xae0   :  { %1039 = vrot.lane.b32.xlu1 %v1037_v39, %s5390_s29 }
 0xb52   :  { %v1040_v22 = vpop.permute.xlu1 %1039 }
 0xb53   :  { %v5982_v25 = vadd.f32 %v1040_v22, %v1026_v55 }
 0xb55   :  { %4413 = vmatmul.mubr.msk.f32.vlgmr.msra.gmra.mrb[8].mxu0 %vm46_vm0, %v5982_v25 }
 0xb56   :  { %4843 = vmatpush3.bf16.msra.mxu0 %v5645_v36  ;;  %4439 = vmatprep.mubr.msk.f32.mxu0 %vm5386_vm3, %v6845_v1 }
 0xb57   :  { %4844 = vmatprep.subr.bf16.mxu0 %v6861_v44 }
 0xb5a   :  { %4846 = vmatpush3.bf16.msra.mxu0 %v5653_v38 }
 0xb5b   :  { %4847 = vmatprep.subr.bf16.mxu0 %v6861_v44 }
 0xb5e   :  { %4849 = vmatpush3.bf16.msra.mxu0 %v5663_v42 }
 0xb5f   :  { %4850 = vmatprep.subr.bf16.mxu0 %v6861_v44 }
 0xb62   :  { %4852 = vmatpush3.bf16.msra.mxu0 %v5673_v47 }
 0xb63   :  { %4853 = vmatprep.subr.bf16.mxu0 %v6861_v44 }
 0xb66   :  { %4855 = vmatpush3.bf16.msra.mxu0 %v5683_v51 }
 0xb67   :  { %4856 = vmatprep.subr.bf16.mxu0 %v6861_v44 }
 0xb6a   :  { %4858 = vmatpush3.bf16.msra.mxu0 %v5693_v54 }
 0xb6b   :  { %4877 = vmatprep.subr.bf16.mxu0 %v6861_v44 }
 0xc28   :  { %v1112_v24 = vpop.f32.mrb[8].mxu0 }
 0xc29   :  { %v1113_v58 = vadd.f32 %v1112_v24, %v5588_v50  ;;  %v4414_v31 = vpop.f32.mrb[9].mxu0 }
 0xc2b   :  { %v1123_v40 = vrot.slane %v1113_v58, %v5603_v61 }
 0xc2d   :  { %v1124_v48 = vcombine.high %v1123_v40, %v1123_v40  ;;  %v1131_v60 = vrot.slane %v1123_v40, %v5603_v61  ;;  %v6017_v40 = vld [vmem:[%s6835_s11 + $0x2] sm:$0x3] }
 0xc2f   :  { %v1138_v53 = vrot.slane %v1124_v48, %v5603_v61  ;;  %v1142_v56 = vrot.slane %v1131_v60, %v5547_v28 }
 0xc31   :  { %v1146_v55 = vrot.slane %v1138_v53, %v5547_v28  ;;  %v1149_v0 = vadd.f32 %v1142_v56, %v5611_v7  ;;  %v4014_v7 = vld [vmem:[%s3913_s20 + $0x6] sm:$0x1]  ;;  %s4025_s20 = sld [smem:[#allocation6 + $0x19]] }
 0xc33   :  { %v1150_v18 = vadd.f32 %v1146_v55, %v5618_v11  ;;  %5194 = vtanh.f32 %v1149_v0  ;;  %v1400_v11 = vld [vmem:[%s1399_s22] sm:$0x1]  ;;  %s3923_s22 = scalar_lea.vmem [#allocation3], %s4027_s19  ;;  %s4053_s19 = sld [smem:[#allocation6 + $0x2b]] }
 0xc35   :  { %5196 = vtanh.f32 %v1150_v18 }
 0xc37   :  { %s1656_s23 = scalar_lea.vmem [#allocation3], %s4025_s20  ;;  %s4044_s20 = sld [smem:[#allocation6 + $0x22]] }
 0xc3d   :  { %v5195_v62 = vpop.eup %5194 }
 0xc3e   :  { %v1153_v39 = vmul.f32 %v5195_v62, %v5623_v16 }
 0xc3f   :  { %v5197_v22 = vpop.eup %5196 }
 0xc40   :  { %v1155_v24 = vsel %vm46_vm0, %v1153_v39, 0.0  ;;  %v1154_v58 = vmul.f32 %v5197_v22, %v5623_v16 }
 0xc41   :  { %1156 = vadd.xlane.f32.xlu0 %v1155_v24 }
 0xc42   :  { %v1158_v31 = vsel %vm46_vm0, %v1154_v58, 0.0 }
 0xc43   :  { %1159 = vadd.xlane.f32.xlu1 %v1158_v31 }
 0xc54   :  { %1416 = vrot.lane.b32.xlu1 %v4014_v7, %s5387_s27  ;;  %v4020_v7 = vld [vmem:[%s3917_s0 + $0x6] sm:$0x1]  ;;  %s2135_s0 = scalar_lea.vmem [#allocation3], %s4035_s25  ;;  %s4045_s25 = sld [smem:[#allocation6 + $0x23]] }
 0xc57   :  { %1402 = vrot.lane.b32.xlu0 %v1400_v11, %s5387_s27  ;;  %v1521_v11 = vld [vmem:[%s1520_s28] sm:$0x1] }
 0xc5a   :  { %s3937_s28 = scalar_lea.vmem [#allocation3], %s4045_s25  ;;  %s4063_s25 = sld [smem:[#allocation6 + $0x2c]] }
 0xc5b   :  { %1421 = vrot.lane.b32.xlu0 %v6017_v40, %s5390_s29 }
 0xcce   :  { %v1157_v48 = vpop.xlane.xlu0 %1156 }
 0xccf   :  { %v1161_v60 = vadd.f32 %v1157_v48, %v5699_v57 }
 0xcd0   :  { %v1160_v53 = vpop.xlane.xlu1 %1159 }
 0xcd1   :  { %v1162_v56 = vadd.f32 %v1160_v53, %v5699_v57  ;;  %v1168_v0 = vrot.slane %v1161_v60, %v5702_v59 }
 0xcd2   :  { %v1403_v55 = vpop.permute.xlu0 %1402 }
 0xcd3   :  { %v1172_v18 = vrot.slane %v1162_v56, %v5702_v59  ;;  %1405 = vst.msk [vmem:[#allocation4] sm:$0x1] %vm129_vm4, %v1403_v55 }
 0xcd4   :  { %v1417_v62 = vpop.permute.xlu1 %1416 }
 0xcd5   :  { %1419 = vst.msk [vmem:[#allocation4 + $0x1] sm:$0x1] %vm129_vm4, %v1417_v62  ;;  %v1173_v39 = vsel %vm402_vm6, %v1172_v18, %v1168_v0 }
 0xcd6   :  { %v1422_v22 = vpop.permute.xlu0 %1421  ;;  %v1175_v24 = vsel %vm114_vm7, %v1173_v39, -1e+12 }
 0xcd7   :  { %1424 = vst.msk [vmem:[#allocation4] sm:$0x3] %vm680_vm9, %v1422_v22  ;;  %v1176_v58 = vsel %vm406_vm8, %v1175_v24, -inf }
 0xcd8   :  { %1177 = vmax.xlane.f32.xlu1 %v1176_v58 }
 0xcde   :  { %v1425_v31 = vld [vmem:[#allocation4] sm:$0x3] }
 0xcdf   :  { %4440 = vmatmul.mubr.msk.f32.vlgmr.msra.gmra.mrb[10].mxu0 %vm479_vm10, %v1425_v31  ;;  %1535 = vst.msk [vmem:[#allocation4 + $0x1] sm:$0x1] %vm54_vm1, %v4020_v7  ;;  %1522 = vst.msk [vmem:[#allocation4] sm:$0x1] %vm54_vm1, %v1521_v11 }
 0xce0   :  { %4879 = vmatpush3.bf16.msra.mxu0 %v5493_v6  ;;  %4485 = vmatprep.mubr.msk.f32.mxu0 %vm5386_vm3, %v6845_v1 }
 0xce1   :  { %4880 = vmatprep.subr.bf16.mxu0 %v6861_v44 }
 0xce4   :  { %4882 = vmatpush3.bf16.msra.mxu0 %v5503_v9 }
 0xce5   :  { %4883 = vmatprep.subr.bf16.mxu0 %v6861_v44 }
 0xce8   :  { %4885 = vmatpush3.bf16.msra.mxu0 %v5515_v13 }
 0xce9   :  { %4886 = vmatprep.subr.bf16.mxu0 %v6861_v44 }
 0xcec   :  { %4888 = vmatpush3.bf16.msra.mxu0 %v5529_v19 }
 0xced   :  { %4889 = vmatprep.subr.bf16.mxu0 %v6861_v44 }
 0xd65   :  { %v1178_v48 = vpop.xlane.xlu1 %1177 }
 0xd66   :  { %v1179_v60 = vsub.f32 %v1175_v24, %v1178_v48 }
 0xd68   :  { %v1180_v53 = vmul.f32 1.442695, %v1179_v60 }
 0xd6a   :  { %5198 = vpow2.f32 %v1180_v53  ;;  %v6052_v53 = vld [vmem:[%s6834_s10 + $0x2] sm:$0x3] }
 0xd74   :  { %v5199_v56 = vpop.eup %5198 }
 0xd75   :  { %v1182_v55 = vsel %vm406_vm8, %v5199_v56, 0.0 }
 0xd76   :  { %1183 = vadd.xlane.f32.xlu0 %v1182_v55 }
 0xdb2   :  { %v1495_v0 = vpop.f32.mrb[10].mxu0 }
 0xdb3   :  { %v4441_v18 = vpop.f32.mrb[11].mxu0  ;;  %v1496_v62 = vadd.f32 %v1495_v0, %v5735_v33 }
 0xdb5   :  { %v1500_v39 = vsub.f32 0.0, %v1496_v62 }
 0xdb7   :  { %v1501_v22 = vmul.f32 1.442695, %v1500_v39 }
 0xdb9   :  { %5200 = vpow2.f32 %v1501_v22 }
 0xdc3   :  { %v5201_v31 = vpop.eup %5200 }
 0xdc4   :  { %v1503_v7 = vadd.f32 1.0, %v5201_v31 }
 0xe03   :  { %v1184_v58 = vpop.xlane.xlu0 %1183 }
 0xe04   :  { %5202 = vrcp.f32 %v1184_v58 }
 0xe05   :  { %5204 = vrcp.f32 %v1503_v7 }
 0xe06   :  { %5206 = vtanh.f32 %v1496_v62 }
 0xe0e   :  { %v5203_v11 = vpop.eup %5202 }
 0xe0f   :  { %v1186_v24 = vmul.f32 %v5203_v11, %v5199_v56  ;;  %v5205_v55 = vpop.eup %5204  ;;  %v4021_v56 = vld [vmem:[%s3919_s16 + $0x6] sm:$0x1]  ;;  %s3949_s16 = scalar_lea.vmem [#allocation3], %s4064_s14 }
 0xe11   :  { %v1197_v48 = vrot.slane %v1186_v24, %v5742_v46  ;;  %v1190_v60 = vrot.slane %v1186_v24, %v5547_v28 }
 0xe13   :  { %1199 = vbcast.lane.b32.xlu1 %v1197_v48, 256  ;;  %1192 = vbcast.lane.b32.xlu0 %v1190_v60, 256 }
 0xe17   :  { %1226 = vrot.lane.b32.xlu0 %v6052_v53, %s5390_s29 }
 0xe1b   :  { %1507 = vrot.lane.b32.xlu0 %v5205_v55, %s5389_s21 }
 0xe1f   :  { %1540 = vrot.lane.b32.xlu0 %v4021_v56, %s5387_s27 }
 0xe23   :  { %1380 = vperm.xlu0 %5138, %v5974_v4  }
 0xe27   :  { %5139 = vset.pattern.permute.xlu0 %v6843_v34 }
 0xe28   :  { %1637 = vperm.xlu0 %5139, %v5974_v4  }
 0xe2c   :  { %5143 = vset.pattern.permute.xlu0 %v6847_v8 }
 0xe85   :  { %v1200_v0 = vpop.permute.xlu1 %1199  ;;  %v1193_v18 = vpop.permute.xlu0 %1192 }
 0xe86   :  { %v1202_v39 = vmul.f32 %v1200_v0, %v5867_v15  ;;  %v1201_v22 = vmul.f32 %v1193_v18, %v5872_v17  ;;  %v1524_v18 = vld [vmem:[%s1523_s1] sm:$0x1]  ;;  %s4038_s1 = sld [smem:[#allocation6 + $0x21]] }
 0xe88   :  { %v1210_v58 = vsel %vm46_vm0, %v1202_v39, 0.0  ;;  %v1203_v31 = vsel %vm46_vm0, %v1201_v22, 0.0  ;;  %v6865_v39 = vmov 1  }
 0xe89   :  { %v1211_v7 = vrot.slane %v1210_v58, 4  ;;  %v1204_v11 = vrot.slane %v1203_v31, 4  ;;  %v1227_v24 = vpop.permute.xlu0 %1226 }
 0xe8b   :  { %v1212_v48 = vadd.f32 %v1211_v7, %v1210_v58  ;;  %v1205_v60 = vadd.f32 %v1204_v11, %v1203_v31 }
 0xe8c   :  { %s3931_s5 = scalar_lea.vmem [#allocation3], %s4038_s1  ;;  %s2262_s1 = scalar_lea.vmem [#allocation3], %s4043_s30 }
 0xe8d   :  { %v1213_v55 = vrot.slane %v1212_v48, 2  ;;  %v1206_v56 = vrot.slane %v1205_v60, 2  ;;  %v1508_v34 = vpop.permute.xlu0 %1507  ;;  %s2877_s30 = scalar_lea.vmem [#allocation3], %s4062_s15  ;;  %s4079_s15 = sld [smem:[#allocation6 + $0x37]] }
 0xe8f   :  { %v1214_v1 = vadd.f32 %v1213_v55, %v1212_v48  ;;  %v1207_v8 = vadd.f32 %v1206_v56, %v1205_v60 }
 0xe91   :  { %v1541_v29 = vpop.permute.xlu0 %1540  ;;  %v1208_v5 = vrot.slane %v1207_v8, 1  ;;  %v1215_v27 = vrot.slane %v1214_v1, 1 }
 0xe92   :  { %1543 = vst.msk [vmem:[#allocation4 + $0x1] sm:$0x1] %vm129_vm4, %v1541_v29 }
 0xe93   :  { %v1209_v15 = vadd.f32 %v1208_v5, %v1207_v8  ;;  %v1216_v17 = vadd.f32 %v1215_v27, %v1214_v1  ;;  %v6866_v1 = vmov 0.0   ;;  %v5207_v27 = vpop.eup %5206 }
 0xe94   :  { %v1510_v5 = vmul.f32 %v5207_v27, %v1508_v34 }
 0xe95   :  { %v1221_v0 = vsel %vm402_vm6, %v1216_v17, %v1209_v15 }
 0xe96   :  { %1222 = vrot.lane.b32.xlu1 %v1221_v0, %s5387_s27 }
 0xe9a   :  { %1513 = vperm.xlu1 %5137, %v5974_v4  }
 0xe9e   :  { %1526 = vrot.lane.b32.xlu1 %v1524_v18, %s5387_s27 }
 0xe9f   :  { %5140 = vset.pattern.permute.xlu1 %v6865_v39 }
 0xf08   :  { %v1223_v22 = vpop.permute.xlu1 %1222 }
 0xf09   :  { %v1229_v29 = vsel %vm46_vm0, %v5982_v25, %v1223_v22  ;;  %v1511_v25 = vsub.f32 %v1510_v5, %v6017_v40  ;;  %v1381_v5 = vpop.permute.xlu0 %1380 }
 0xf0a   :  { %v1230_v8 = vsel %vm150_vm5, %v1229_v29, %v1227_v24 }
 0xf0b   :  { %4007 = vmatmul.mubr.msk.f32.vlgmr.msra.gmra.mrb[4].mxu1 %vm479_vm10, %v1230_v8 }
 0xf0c   :  { %4861 = vmatpush3.bf16.msra.mxu1 %v5645_v36  ;;  %4466 = vmatprep.mubr.msk.f32.mxu1 %vm5386_vm3, %v6866_v1 }
 0xf0d   :  { %4862 = vmatprep.subr.bf16.mxu1 %v6861_v44 }
 0xf10   :  { %4864 = vmatpush3.bf16.msra.mxu1 %v5653_v38 }
 0xf11   :  { %4865 = vmatprep.subr.bf16.mxu1 %v6861_v44 }
 0xf14   :  { %4867 = vmatpush3.bf16.msra.mxu1 %v5663_v42 }
 0xf15   :  { %4868 = vmatprep.subr.bf16.mxu1 %v6861_v44 }
 0xf18   :  { %4870 = vmatpush3.bf16.msra.mxu1 %v5673_v47 }
 0xf19   :  { %v1514_v62 = vpop.permute.xlu1 %1513  ;;  %4871 = vmatprep.subr.bf16.mxu1 %v6861_v44 }
 0xf1a   :  { %v1516_v58 = vmul.f32 %v1514_v62, %v1511_v25 }
 0xf1c   :  { %v6088_v31 = vadd.f32 %v6017_v40, %v1516_v58  ;;  %4873 = vmatpush3.bf16.msra.mxu1 %v5683_v51 }
 0xf1d   :  { %v1527_v7 = vpop.permute.xlu1 %1526  ;;  %4874 = vmatprep.subr.bf16.mxu1 %v6861_v44 }
 0xf1e   :  { %1529 = vst.msk [vmem:[#allocation4] sm:$0x1] %vm129_vm4, %v1527_v7  ;;  %1545 = vrot.lane.b32.xlu1 %v6088_v31, %s5390_s29 }
 0xf20   :  { %4876 = vmatpush3.bf16.msra.mxu1 %v5693_v54 }
 0xf21   :  { %4896 = vmatprep.subr.bf16.mxu1 %v5764_v26 }
 0xf90   :  { %v1546_v34 = vpop.permute.xlu1 %1545 }
 0xf91   :  { %1548 = vst.msk [vmem:[#allocation4] sm:$0x3] %vm680_vm9, %v1546_v34 }
 0xf98   :  { %v1549_v11 = vld [vmem:[#allocation4] sm:$0x3] }
 0xf99   :  { %4467 = vmatmul.mubr.msk.f32.vlgmr.msra.gmra.mrb[6].mxu1 %vm479_vm10, %v1549_v11 }
 0xf9a   :  { %4898 = vmatpush1.bf16.msra.mxu1 %v5775_v10  ;;  %2037 = vmatprep.mubr.f32.mxu1 %v6866_v1 }
 0xf9b   :  { %4900 = vmatprep.subr.bf16.mxu1 %v5777_v12 }
 0xf9e   :  { %4902 = vmatpush1.bf16.msra.mxu1 %v5793_v20 }
 0xf9f   :  { %4904 = vmatprep.subr.bf16.mxu1 %v5796_v21 }
 0xfa2   :  { %4906 = vmatpush1.bf16.msra.mxu1 %v5811_v35 }
 0xfa3   :  { %4908 = vmatprep.subr.bf16.mxu1 %v5814_v37 }
 0xfa6   :  { %4910 = vmatpush1.bf16.msra.mxu1 %v5829_v49 }
 0xfa7   :  { %4912 = vmatprep.subr.bf16.mxu1 %v5832_v52 }
 0xfaa   :  { %4914 = vmatpush1.bf16.msra.mxu1 %v5847_v2 }
 0xfab   :  { %4916 = vmatprep.subr.bf16.mxu1 %v5850_v3 }
 0xfae   :  { %4918 = vmatpush1.bf16.msra.mxu1 %v5859_v14 }
 0xfaf   :  { %4937 = vmatprep.subr.bf16.mxu1 %v6861_v44 }
 0xfde   :  { %v1300_v40 = vpop.f32.mrb[4].mxu1 }
 0xfdf   :  { %v1301_v24 = vadd.f32 %v1300_v40, %v5932_v23  ;;  %v6113_v48 = vpop.f32.mrb[5].mxu1 }
 0xfe0   :  { %6867 = vst [vmem:[#allocation16_spill] sm:$0xff] %v6113_v48 }
 0xfe1   :  { %v1306_v60 = vsub.f32 0.0, %v1301_v24 }
 0xfe3   :  { %v1307_v55 = vmul.f32 1.442695, %v1306_v60 }
 0xfe5   :  { %5208 = vpow2.f32 %v1307_v55 }
 0xfef   :  { %v5209_v56 = vpop.eup %5208 }
 0xff0   :  { %v1309_v15 = vadd.f32 1.0, %v5209_v56 }
 0xff2   :  { %5210 = vrcp.f32 %v1309_v15 }
 0xff3   :  { %5212 = vtanh.f32 %v1301_v24 }
 0xffc   :  { %v5211_v17 = vpop.eup %5210 }
 0xffd   :  { %1313 = vrot.lane.b32.xlu1 %v5211_v17, %s5389_s21  ;;  %v5213_v29 = vpop.eup %5212  ;;  %v1638_v17 = vpop.permute.xlu0 %1637 }
0x106c   :  { %v1619_v0 = vpop.f32.mrb[6].mxu1 }
0x106d   :  { %v1620_v18 = vadd.f32 %v1619_v0, %v5735_v33  ;;  %v4468_v22 = vpop.f32.mrb[7].mxu1 }
0x106f   :  { %v1624_v8 = vsub.f32 0.0, %v1620_v18  ;;  %v1314_v27 = vpop.permute.xlu1 %1313 }
0x1070   :  { %v1316_v25 = vmul.f32 %v5213_v29, %v1314_v27 }
0x1071   :  { %v1625_v62 = vmul.f32 1.442695, %v1624_v8 }
0x1072   :  { %v1383_v58 = vmul.f32 %v1381_v5, %v1316_v25 }
0x1073   :  { %5214 = vpow2.f32 %v1625_v62 }
0x1074   :  { %1384 = vst.msk [vmem:[#allocation2 + $0x4] sm:$0x1] %vm54_vm1, %v1383_v58  ;;  %1386 = vrot.lane.b32.xlu1 %v1383_v58, %s5390_s29 }
0x1075   :  { %1390 = vst.msk [vmem:[#allocation2 + $0xf] sm:$0x2] %vm646_vm11, %v1383_v58 }
0x107d   :  { %v5215_v7 = vpop.eup %5214 }
0x107e   :  { %v1627_v34 = vadd.f32 1.0, %v5215_v7 }
0x1080   :  { %5216 = vrcp.f32 %v1627_v34 }
0x1081   :  { %5218 = vtanh.f32 %v1620_v18 }
0x108a   :  { %v5217_v11 = vpop.eup %5216 }
0x108b   :  { %1631 = vrot.lane.b32.xlu1 %v5217_v11, %s5389_s21  ;;  %v5219_v55 = vpop.eup %5218  ;;  %v6148_v11 = vld [vmem:[%s6831_s7 + $0x4] sm:$0x3] }
0x108f   :  { %1644 = vperm.xlu1 %5140, %v5974_v4  }
0x1093   :  { %5141 = vset.pattern.permute.xlu1 %v6863_v41 }
0x10e6   :  { %v1387_v40 = vpop.permute.xlu1 %1386 }
0x10e7   :  { %1389 = vst.msk [vmem:[#allocation2 + $0x5] sm:$0x1] %vm54_vm1, %v1387_v40 }
0x10e8   :  { %1391 = vst.msk [vmem:[#allocation2 + $0x10] sm:$0x2] %vm646_vm11, %v1387_v40 }
0x10ef   :  { %v4029_v24 = vld [vmem:[%s3925_s17 + $0xc] sm:$0x1]  ;;  %v1660_v60 = vld [vmem:[%s1659_s18] sm:$0x1]  ;;  %s2138_s17 = scalar_lea.vmem [#allocation3], %s4036_s8  ;;  %s4052_s8 = sld [smem:[#allocation6 + $0x2a]] }
0x10f0   :  { %1676 = vrot.lane.b32.xlu1 %v4029_v24, %s5387_s27  ;;  %1662 = vrot.lane.b32.xlu0 %v1660_v60, %s5387_s27 }
0x10f4   :  { %1773 = vperm.xlu1 %5141, %v6148_v11  }
0x10f8   :  { %5142 = vset.pattern.permute.xlu1 %v6864_v32 }
0x10fd   :  { %v1632_v4 = vpop.permute.xlu1 %1631 }
0x10fe   :  { %v1634_v56 = vmul.f32 %v5219_v55, %v1632_v4 }
0x1100   :  { %v1635_v15 = vsub.f32 %v1634_v56, %v6088_v31 }
0x1102   :  { %v1640_v0 = vmul.f32 %v1638_v17, %v1635_v15 }
0x1104   :  { %v1641_v22 = vadd.f32 %v1640_v0, %v6088_v31 }
0x1106   :  { %v1642_v29 = vsub.f32 %v6052_v53, %v1641_v22 }
0x110e   :  { %v1645_v8 = vpop.permute.xlu1 %1644 }
0x110f   :  { %v1647_v27 = vmul.f32 %v1645_v8, %v1642_v29 }
0x1111   :  { %v1648_v25 = vadd.f32 %v1647_v27, %v1641_v22 }
0x1113   :  { %v1649_v62 = vmul.f32 %v1648_v25, %v1381_v5 }
0x1115   :  { %1650 = vst.msk [vmem:[#allocation3 + $0x2] sm:$0x1] %vm54_vm1, %v1649_v62 }
0x1116   :  { %1651 = vst.msk [vmem:[#allocation3 + $0x7] sm:$0x2] %vm646_vm11, %v1649_v62 }
0x111d   :  { %v4028_v18 = vld [vmem:[%s3923_s22 + $0x6] sm:$0x1]  ;;  %v1657_v58 = vld [vmem:[%s1656_s23] sm:$0x1]  ;;  %s4042_s22 = sld [smem:[#allocation6 + $0x1c]]  ;;  %s3935_s23 = scalar_lea.vmem [#allocation3], %s4044_s20 }
0x111e   :  { %1671 = vst.msk [vmem:[#allocation4 + $0x1] sm:$0x1] %vm54_vm1, %v4028_v18  ;;  %1658 = vst.msk [vmem:[#allocation4] sm:$0x1] %vm54_vm1, %v1657_v58  ;;  %v4039_v5 = vld [vmem:[%s3929_s26 + $0x6] sm:$0x1] }
0x111f   :  { %v2136_v7 = vld [vmem:[%s2135_s0] sm:$0x1]  ;;  %s4051_s20 = sld [smem:[#allocation6 + $0x25]]  ;;  %s3947_s0 = scalar_lea.vmem [#allocation3], %s4063_s25 }
0x1120   :  { %s4069_s25 = sld [smem:[#allocation6 + $0x29]] }
0x1123   :  { %s2259_s24 = scalar_lea.vmem [#allocation3], %s4042_s22  ;;  %s3941_s22 = scalar_lea.vmem [#allocation3], %s4053_s19 }
0x1162   :  { %v1677_v53 = vpop.permute.xlu1 %1676  ;;  %v1663_v31 = vpop.permute.xlu0 %1662 }
0x1163   :  { %1679 = vst.msk [vmem:[#allocation4 + $0x1] sm:$0x1] %vm129_vm4, %v1677_v53  ;;  %1665 = vst.msk [vmem:[#allocation4] sm:$0x1] %vm129_vm4, %v1663_v31 }
0x116a   :  { %v1680_v34 = vld [vmem:[#allocation4] sm:$0x3] }
0x116b   :  { %2137 = vst.msk [vmem:[#allocation4] sm:$0x1] %vm54_vm1, %v2136_v7  ;;  %2150 = vst.msk [vmem:[#allocation4 + $0x1] sm:$0x1] %vm54_vm1, %v4039_v5  ;;  %4486 = vmatmul.mubr.msk.f32.vlgmr.msra.gmra.mrb[12].mxu0 %vm150_vm5, %v1680_v34 }
0x116c   :  { %4891 = vmatpush3.bf16.msra.mxu0 %v5575_v43  ;;  %4496 = vmatprep.mubr.msk.f32.mxu0 %vm5386_vm3, %v6866_v1 }
0x116d   :  { %4892 = vmatprep.subr.bf16.mxu0 %v6861_v44 }
0x1170   :  { %4894 = vmatpush3.bf16.msra.mxu0 %v5581_v45 }
0x1171   :  { %4919 = vmatprep.subr.bf16.mxu0 %v6861_v44 }
0x1173   :  { %v1774_v27 = vpop.permute.xlu1 %1773 }
0x123e   :  { %v1750_v40 = vpop.f32.mrb[12].mxu0 }
0x123f   :  { %v1751_v24 = vadd.f32 %v1750_v40, %v5556_v30  ;;  %v4487_v60 = vpop.f32.mrb[13].mxu0 }
0x1241   :  { %v1755_v55 = vsub.f32 0.0, %v1751_v24 }
0x1243   :  { %v1756_v4 = vmul.f32 1.442695, %v1755_v55 }
0x1245   :  { %5220 = vpow2.f32 %v1756_v4  ;;  %v6183_v4 = vld [vmem:[%s6827_s3] sm:$0xff] }
0x124f   :  { %v5221_v56 = vpop.eup %5220 }
0x1250   :  { %v1758_v15 = vadd.f32 1.0, %v5221_v56 }
0x1252   :  { %5222 = vrcp.f32 %v1758_v15  ;;  %v6189_v15 = vld [vmem:[%s6827_s3 + $0x8] sm:$0xff] }
0x1253   :  { %5224 = vtanh.f32 %v1751_v24 }
0x125c   :  { %v5223_v17 = vpop.eup %5222 }
0x125d   :  { %1762 = vrot.lane.b32.xlu0 %v5223_v17, %s5389_s21  ;;  %v5225_v0 = vpop.eup %5224 }
0x12cf   :  { %v1763_v22 = vpop.permute.xlu0 %1762 }
0x12d0   :  { %v1765_v29 = vmul.f32 %v5225_v0, %v1763_v22 }
0x12d2   :  { %1767 = vrot.lane.b32.xlu0 %v1765_v29, %s5390_s29 }
0x1344   :  { %v1768_v8 = vpop.permute.xlu0 %1767 }
0x1345   :  { %v1770_v25 = vsub.f32 %v1765_v29, %v1768_v8 }
0x1347   :  { %v1776_v62 = vmul.f32 %v1774_v27, %v1770_v25 }
0x1349   :  { %1778 = vrot.lane.b32.xlu1 %v1776_v62, %s5390_s29  ;;  %v4040_v62 = vld [vmem:[%s3931_s5 + $0x6] sm:$0x1]  ;;  %s4050_s5 = sld [smem:[#allocation6 + $0x24]] }
0x134f   :  { %s2398_s18 = scalar_lea.vmem [#allocation2], %s4050_s5  ;;  %s4070_s5 = sld [smem:[#allocation6 + $0x2e]] }
0x13bb   :  { %v1779_v18 = vpop.permute.xlu1 %1778 }
0x13bc   :  { %v6156_v58 = vadd.f32 %v1779_v18, %v1765_v29  ;;  %v2139_v18 = vld [vmem:[%s2138_s17] sm:$0x1]  ;;  %s3943_s17 = scalar_lea.vmem [#allocation2], %s4052_s8  ;;  %s4087_s8 = sld [smem:[#allocation6 + $0x32]] }
0x13be   :  { %4497 = vmatmul.mubr.msk.f32.vlgmr.msra.gmra.mrb[14].mxu0 %vm46_vm0, %v6156_v58 }
0x13bf   :  { %4921 = vmatpush3.bf16.msra.mxu0 %v5645_v36  ;;  %4523 = vmatprep.mubr.msk.f32.mxu0 %vm5386_vm3, %v6866_v1 }
0x13c0   :  { %4922 = vmatprep.subr.bf16.mxu0 %v6861_v44 }
0x13c3   :  { %4924 = vmatpush3.bf16.msra.mxu0 %v5653_v38 }
0x13c4   :  { %4925 = vmatprep.subr.bf16.mxu0 %v6861_v44 }
0x13c7   :  { %4927 = vmatpush3.bf16.msra.mxu0 %v5663_v42 }
0x13c8   :  { %4928 = vmatprep.subr.bf16.mxu0 %v6861_v44 }
0x13cb   :  { %4930 = vmatpush3.bf16.msra.mxu0 %v5673_v47 }
0x13cc   :  { %4931 = vmatprep.subr.bf16.mxu0 %v6861_v44 }
0x13cf   :  { %4933 = vmatpush3.bf16.msra.mxu0 %v5683_v51 }
0x13d0   :  { %4934 = vmatprep.subr.bf16.mxu0 %v6861_v44 }
0x13d3   :  { %4936 = vmatpush3.bf16.msra.mxu0 %v5693_v54 }
0x13d4   :  { %4955 = vmatprep.subr.bf16.mxu0 %v6861_v44 }
0x1491   :  { %v1851_v53 = vpop.f32.mrb[14].mxu0 }
0x1492   :  { %v1852_v31 = vadd.f32 %v1851_v53, %v5588_v50  ;;  %v4498_v5 = vpop.f32.mrb[15].mxu0  ;;  %v6201_v53 = vld [vmem:[%s6835_s11 + $0x4] sm:$0x3] }
0x1494   :  { %v1862_v7 = vrot.slane %v1852_v31, %v5603_v61 }
0x1496   :  { %v1863_v34 = vcombine.high %v1862_v7, %v1862_v7  ;;  %v1870_v40 = vrot.slane %v1862_v7, %v5603_v61 }
0x1498   :  { %v1877_v24 = vrot.slane %v1863_v34, %v5603_v61  ;;  %v1881_v60 = vrot.slane %v1870_v40, %v5547_v28 }
0x149a   :  { %v1885_v55 = vrot.slane %v1877_v24, %v5547_v28  ;;  %v1888_v56 = vadd.f32 %v6183_v4, %v1881_v60 }
0x149c   :  { %v1889_v17 = vadd.f32 %v6189_v15, %v1885_v55  ;;  %5226 = vtanh.f32 %v1888_v56 }
0x149e   :  { %5228 = vtanh.f32 %v1889_v17 }
0x14a6   :  { %v5227_v0 = vpop.eup %5226 }
0x14a7   :  { %v1892_v22 = vmul.f32 %v5227_v0, %v5623_v16 }
0x14a8   :  { %v5229_v29 = vpop.eup %5228 }
0x14a9   :  { %v1894_v8 = vsel %vm46_vm0, %v1892_v22, 0.0  ;;  %v1893_v27 = vmul.f32 %v5229_v29, %v5623_v16 }
0x14aa   :  { %1895 = vadd.xlane.f32.xlu0 %v1894_v8  ;;  %v4046_v8 = vld [vmem:[%s3935_s23 + $0x6] sm:$0x1]  ;;  %s2395_s23 = scalar_lea.vmem [#allocation3], %s4051_s20  ;;  %s4071_s20 = sld [smem:[#allocation6 + $0x2f]] }
0x14ab   :  { %v1897_v25 = vsel %vm46_vm0, %v1893_v27, 0.0  ;;  %v2260_v27 = vld [vmem:[%s2259_s24] sm:$0x1]  ;;  %s4061_s24 = sld [smem:[#allocation6 + $0x26]] }
0x14ac   :  { %1898 = vadd.xlane.f32.xlu1 %v1897_v25 }
0x14b1   :  { %s2874_s26 = scalar_lea.vmem [#allocation3], %s4061_s24  ;;  %s3955_s24 = scalar_lea.vmem [#allocation3], %s4071_s20 }
0x14bd   :  { %2155 = vrot.lane.b32.xlu1 %v4040_v62, %s5387_s27 }
0x14c0   :  { %2141 = vrot.lane.b32.xlu0 %v2139_v18, %s5387_s27 }
0x14c4   :  { %2160 = vrot.lane.b32.xlu0 %v6201_v53, %s5390_s29 }
0x1537   :  { %v1896_v31 = vpop.xlane.xlu0 %1895 }
0x1538   :  { %v1900_v5 = vadd.f32 %v1896_v31, %v5699_v57 }
0x1539   :  { %v1899_v7 = vpop.xlane.xlu1 %1898 }
0x153a   :  { %v1901_v34 = vadd.f32 %v1899_v7, %v5699_v57  ;;  %v1907_v24 = vrot.slane %v1900_v5, %v5702_v59 }
0x153b   :  { %v2142_v40 = vpop.permute.xlu0 %2141 }
0x153c   :  { %v1911_v60 = vrot.slane %v1901_v34, %v5702_v59  ;;  %2144 = vst.msk [vmem:[#allocation4] sm:$0x1] %vm129_vm4, %v2142_v40 }
0x153d   :  { %v2156_v55 = vpop.permute.xlu1 %2155 }
0x153e   :  { %2158 = vst.msk [vmem:[#allocation4 + $0x1] sm:$0x1] %vm129_vm4, %v2156_v55  ;;  %v1912_v56 = vsel %vm402_vm6, %v1911_v60, %v1907_v24 }
0x153f   :  { %v2161_v17 = vpop.permute.xlu0 %2160  ;;  %v1914_v0 = vsel %vm114_vm7, %v1912_v56, -1e+12 }
0x1540   :  { %2163 = vst.msk [vmem:[#allocation4] sm:$0x3] %vm680_vm9, %v2161_v17  ;;  %v1915_v22 = vsel %vm406_vm8, %v1914_v0, -inf }
0x1541   :  { %1916 = vmax.xlane.f32.xlu1 %v1915_v22 }
0x1547   :  { %v2164_v29 = vld [vmem:[#allocation4] sm:$0x3] }
0x1548   :  { %4524 = vmatmul.mubr.msk.f32.vlgmr.msra.gmra.mrb[16].mxu0 %vm479_vm10, %v2164_v29  ;;  %2274 = vst.msk [vmem:[#allocation4 + $0x1] sm:$0x1] %vm54_vm1, %v4046_v8  ;;  %2261 = vst.msk [vmem:[#allocation4] sm:$0x1] %vm54_vm1, %v2260_v27  ;;  %v6236_v27 = vld [vmem:[%s6834_s10 + $0x4] sm:$0x3] }
0x1549   :  { %4957 = vmatpush3.bf16.msra.mxu0 %v5493_v6  ;;  %4569 = vmatprep.mubr.msk.f32.mxu0 %vm5386_vm3, %v6866_v1 }
0x154a   :  { %4958 = vmatprep.subr.bf16.mxu0 %v6861_v44 }
0x154d   :  { %4960 = vmatpush3.bf16.msra.mxu0 %v5503_v9 }
0x154e   :  { %4961 = vmatprep.subr.bf16.mxu0 %v6861_v44 }
0x1551   :  { %4963 = vmatpush3.bf16.msra.mxu0 %v5515_v13 }
0x1552   :  { %4964 = vmatprep.subr.bf16.mxu0 %v6861_v44 }
0x1555   :  { %4966 = vmatpush3.bf16.msra.mxu0 %v5529_v19 }
0x1556   :  { %4967 = vmatprep.subr.bf16.mxu0 %v6861_v44 }
0x15ce   :  { %v1917_v25 = vpop.xlane.xlu1 %1916 }
0x15cf   :  { %v1918_v62 = vsub.f32 %v1914_v0, %v1917_v25 }
0x15d1   :  { %v1919_v18 = vmul.f32 1.442695, %v1918_v62  ;;  %v4047_v62 = vld [vmem:[%s3937_s28 + $0x6] sm:$0x1]  ;;  %s4076_s28 = sld [smem:[#allocation6 + $0x30]] }
0x15d3   :  { %5230 = vpow2.f32 %v1919_v18  ;;  %v6868_v18 = vmov 4  }
0x15d7   :  { %s3137_s14 = scalar_lea.vmem [#allocation2], %s4076_s28 }
0x15dd   :  { %v5231_v31 = vpop.eup %5230 }
0x15de   :  { %v1921_v5 = vsel %vm406_vm8, %v5231_v31, 0.0 }
0x15df   :  { %1922 = vadd.xlane.f32.xlu0 %v1921_v5 }
0x161b   :  { %v2234_v7 = vpop.f32.mrb[16].mxu0 }
0x161c   :  { %v4525_v34 = vpop.f32.mrb[17].mxu0  ;;  %v2235_v40 = vadd.f32 %v2234_v7, %v5735_v33 }
0x161d   :  { %v6249_v34 = vld [vmem:[%s6826_s2 + $0x8] sm:$0xff] }
0x161e   :  { %v2239_v24 = vsub.f32 0.0, %v2235_v40  ;;  %6870 = vst [vmem:[#allocation17_spill] sm:$0xff] %v6249_v34 }
0x1620   :  { %v2240_v60 = vmul.f32 1.442695, %v2239_v24 }
0x1622   :  { %5232 = vpow2.f32 %v2240_v60  ;;  %v6255_v60 = vld [vmem:[%s6826_s2] sm:$0xff] }
0x162c   :  { %v5233_v56 = vpop.eup %5232 }
0x162d   :  { %v2242_v17 = vadd.f32 1.0, %v5233_v56 }
0x166c   :  { %v1923_v55 = vpop.xlane.xlu0 %1922 }
0x166d   :  { %5234 = vrcp.f32 %v1923_v55 }
0x166e   :  { %5236 = vrcp.f32 %v2242_v17 }
0x166f   :  { %5238 = vtanh.f32 %v2235_v40 }
0x1677   :  { %v5235_v22 = vpop.eup %5234 }
0x1678   :  { %v1925_v0 = vmul.f32 %v5235_v22, %v5231_v31  ;;  %v5237_v25 = vpop.eup %5236  ;;  %v6869_v31 = vmov 2  }
0x167a   :  { %v1936_v29 = vrot.slane %v1925_v0, %v5742_v46  ;;  %v1929_v8 = vrot.slane %v1925_v0, %v5547_v28 }
0x167c   :  { %1938 = vbcast.lane.b32.xlu1 %v1936_v29, 256  ;;  %1931 = vbcast.lane.b32.xlu0 %v1929_v8, 256  ;;  %v5239_v29 = vpop.eup %5238 }
0x1680   :  { %1965 = vrot.lane.b32.xlu0 %v6236_v27, %s5390_s29 }
0x1684   :  { %2246 = vrot.lane.b32.xlu0 %v5237_v25, %s5389_s21 }
0x1688   :  { %2279 = vrot.lane.b32.xlu0 %v4047_v62, %s5387_s27 }
0x168c   :  { %2119 = vperm.xlu0 %5143, %v6148_v11  }
0x1690   :  { %5144 = vset.pattern.permute.xlu0 %v6868_v18 }
0x1691   :  { %2376 = vperm.xlu0 %5144, %v6148_v11  }
0x1695   :  { %5148 = vset.pattern.permute.xlu0 %v6869_v31 }
0x16ee   :  { %v1939_v5 = vpop.permute.xlu1 %1938  ;;  %v1932_v7 = vpop.permute.xlu0 %1931 }
0x16ef   :  { %v1941_v24 = vmul.f32 %v6249_v34, %v1939_v5  ;;  %v1940_v55 = vmul.f32 %v6255_v60, %v1932_v7 }
0x16f1   :  { %v1949_v56 = vsel %vm46_vm0, %v1941_v24, 0.0  ;;  %v1942_v40 = vsel %vm46_vm0, %v1940_v55, 0.0 }
0x16f2   :  { %v1950_v17 = vrot.slane %v1949_v56, 4  ;;  %v1943_v22 = vrot.slane %v1942_v40, 4  ;;  %v1966_v0 = vpop.permute.xlu0 %1965 }
0x16f4   :  { %v1951_v8 = vadd.f32 %v1950_v17, %v1949_v56  ;;  %v1944_v25 = vadd.f32 %v1943_v22, %v1942_v40  ;;  %v2263_v56 = vld [vmem:[%s2262_s1] sm:$0x1] }
0x16f6   :  { %v1952_v62 = vrot.slane %v1951_v8, 2  ;;  %v1945_v48 = vrot.slane %v1944_v25, 2  ;;  %v2247_v5 = vpop.permute.xlu0 %2246 }
0x16f7   :  { %v2249_v31 = vmul.f32 %v5239_v29, %v2247_v5 }
0x16f8   :  { %v1953_v34 = vadd.f32 %v1952_v62, %v1951_v8  ;;  %v1946_v18 = vadd.f32 %v1945_v48, %v1944_v25 }
0x16fa   :  { %v1954_v46 = vrot.slane %v1953_v34, 1  ;;  %v1947_v19 = vrot.slane %v1946_v18, 1  ;;  %v2280_v13 = vpop.permute.xlu0 %2279 }
0x16fb   :  { %2282 = vst.msk [vmem:[#allocation4 + $0x1] sm:$0x1] %vm129_vm4, %v2280_v13 }
0x16fc   :  { %v1948_v7 = vadd.f32 %v1947_v19, %v1946_v18  ;;  %v1955_v24 = vadd.f32 %v1954_v46, %v1953_v34  ;;  %v2250_v19 = vsub.f32 %v2249_v31, %v6201_v53 }
0x16fe   :  { %v1960_v55 = vsel %vm402_vm6, %v1955_v24, %v1948_v7 }
0x16ff   :  { %1961 = vrot.lane.b32.xlu1 %v1960_v55, %s5387_s27 }
0x1703   :  { %2252 = vperm.xlu1 %5142, %v6148_v11  }
0x1707   :  { %2265 = vrot.lane.b32.xlu1 %v2263_v56, %s5387_s27 }
0x1708   :  { %5145 = vset.pattern.permute.xlu1 %v6865_v39 }
0x1771   :  { %v1962_v48 = vpop.permute.xlu1 %1961 }
0x1772   :  { %v1968_v40 = vsel %vm46_vm0, %v6156_v58, %v1962_v48 }
0x1773   :  { %v1969_v13 = vsel %vm150_vm5, %v1968_v40, %v1966_v0 }
0x1774   :  { %4033 = vmatmul.mubr.msk.f32.vlgmr.msra.gmra.mrb[8].mxu1 %vm479_vm10, %v1969_v13  ;;  %v2120_v13 = vpop.permute.xlu0 %2119 }
0x1775   :  { %4939 = vmatpush3.bf16.msra.mxu1 %v5645_v36  ;;  %4550 = vmatprep.mubr.msk.f32.mxu1 %vm5386_vm3, %v6866_v1 }
0x1776   :  { %4940 = vmatprep.subr.bf16.mxu1 %v6861_v44 }
0x1779   :  { %4942 = vmatpush3.bf16.msra.mxu1 %v5653_v38 }
0x177a   :  { %4943 = vmatprep.subr.bf16.mxu1 %v6861_v44 }
0x177d   :  { %4945 = vmatpush3.bf16.msra.mxu1 %v5663_v42 }
0x177e   :  { %4946 = vmatprep.subr.bf16.mxu1 %v6861_v44 }
0x1781   :  { %4948 = vmatpush3.bf16.msra.mxu1 %v5673_v47 }
0x1782   :  { %v2253_v46 = vpop.permute.xlu1 %2252  ;;  %4949 = vmatprep.subr.bf16.mxu1 %v6861_v44 }
0x1783   :  { %v2255_v58 = vmul.f32 %v2253_v46, %v2250_v19 }
0x1785   :  { %v6282_v18 = vadd.f32 %v6201_v53, %v2255_v58  ;;  %4951 = vmatpush3.bf16.msra.mxu1 %v5683_v51 }
0x1786   :  { %v2266_v34 = vpop.permute.xlu1 %2265  ;;  %4952 = vmatprep.subr.bf16.mxu1 %v6861_v44 }
0x1787   :  { %2268 = vst.msk [vmem:[#allocation4] sm:$0x1] %vm129_vm4, %v2266_v34  ;;  %2284 = vrot.lane.b32.xlu1 %v6282_v18, %s5390_s29 }
0x1789   :  { %4954 = vmatpush3.bf16.msra.mxu1 %v5693_v54 }
0x178a   :  { %4974 = vmatprep.subr.bf16.mxu1 %v5764_v26 }
0x17f9   :  { %v2285_v31 = vpop.permute.xlu1 %2284 }
0x17fa   :  { %2287 = vst.msk [vmem:[#allocation4] sm:$0x3] %vm680_vm9, %v2285_v31 }
0x1801   :  { %v2288_v17 = vld [vmem:[#allocation4] sm:$0x3] }
0x1802   :  { %4551 = vmatmul.mubr.msk.f32.vlgmr.msra.gmra.mrb[10].mxu1 %vm479_vm10, %v2288_v17 }
0x1803   :  { %4976 = vmatpush1.bf16.msra.mxu1 %v5775_v10  ;;  %2776 = vmatprep.mubr.f32.mxu1 %v6866_v1 }
0x1804   :  { %4978 = vmatprep.subr.bf16.mxu1 %v5777_v12 }
0x1807   :  { %4980 = vmatpush1.bf16.msra.mxu1 %v5793_v20 }
0x1808   :  { %4982 = vmatprep.subr.bf16.mxu1 %v5796_v21 }
0x180b   :  { %4984 = vmatpush1.bf16.msra.mxu1 %v5811_v35 }
0x180c   :  { %4986 = vmatprep.subr.bf16.mxu1 %v5814_v37 }
0x180f   :  { %4988 = vmatpush1.bf16.msra.mxu1 %v5829_v49 }
0x1810   :  { %4990 = vmatprep.subr.bf16.mxu1 %v5832_v52 }
0x1813   :  { %4992 = vmatpush1.bf16.msra.mxu1 %v5847_v2 }
0x1814   :  { %4994 = vmatprep.subr.bf16.mxu1 %v5850_v3 }
0x1817   :  { %4996 = vmatpush1.bf16.msra.mxu1 %v5859_v14 }
0x1818   :  { %5015 = vmatprep.subr.bf16.mxu1 %v6861_v44 }
0x1847   :  { %v2039_v53 = vpop.f32.mrb[8].mxu1 }
0x1848   :  { %v2040_v22 = vadd.f32 %v2039_v53, %v5932_v23  ;;  %v6307_v0 = vpop.f32.mrb[9].mxu1 }
0x184a   :  { %v2045_v29 = vsub.f32 0.0, %v2040_v22 }
0x184c   :  { %v2046_v8 = vmul.f32 1.442695, %v2045_v29 }
0x184e   :  { %5240 = vpow2.f32 %v2046_v8 }
0x1858   :  { %v5241_v25 = vpop.eup %5240 }
0x1859   :  { %v2048_v62 = vadd.f32 1.0, %v5241_v25 }
0x185b   :  { %5242 = vrcp.f32 %v2048_v62 }
0x185c   :  { %5244 = vtanh.f32 %v2040_v22 }
0x1865   :  { %v5243_v5 = vpop.eup %5242 }
0x1866   :  { %2052 = vrot.lane.b32.xlu1 %v5243_v5, %s5389_s21  ;;  %v5245_v56 = vpop.eup %5244  ;;  %v2377_v5 = vpop.permute.xlu0 %2376 }
0x18d5   :  { %v2358_v7 = vpop.f32.mrb[10].mxu1 }
0x18d6   :  { %v2359_v24 = vadd.f32 %v2358_v7, %v5735_v33  ;;  %v4552_v55 = vpop.f32.mrb[11].mxu1 }
0x18d8   :  { %v2363_v48 = vsub.f32 0.0, %v2359_v24  ;;  %v2053_v40 = vpop.permute.xlu1 %2052 }
0x18d9   :  { %v2055_v19 = vmul.f32 %v5245_v56, %v2053_v40 }
0x18da   :  { %v2364_v46 = vmul.f32 1.442695, %v2363_v48 }
0x18db   :  { %v2122_v58 = vmul.f32 %v2120_v13, %v2055_v19 }
0x18dc   :  { %5246 = vpow2.f32 %v2364_v46 }
0x18dd   :  { %2123 = vst.msk [vmem:[#allocation2 + $0x6] sm:$0x1] %vm54_vm1, %v2122_v58  ;;  %2125 = vrot.lane.b32.xlu1 %v2122_v58, %s5390_s29 }
0x18de   :  { %2129 = vst.msk [vmem:[#allocation2 + $0x11] sm:$0x2] %vm646_vm11, %v2122_v58 }
0x18e6   :  { %v5247_v34 = vpop.eup %5246 }
0x18e7   :  { %v2366_v31 = vadd.f32 1.0, %v5247_v34 }
0x18e9   :  { %5248 = vrcp.f32 %v2366_v31 }
0x18ea   :  { %5250 = vtanh.f32 %v2359_v24 }
0x18f3   :  { %v5249_v17 = vpop.eup %5248 }
0x18f4   :  { %2370 = vrot.lane.b32.xlu1 %v5249_v17, %s5389_s21  ;;  %v5251_v8 = vpop.eup %5250  ;;  %v6342_v17 = vld [vmem:[%s6831_s7 + $0x6] sm:$0x3] }
0x18f8   :  { %2383 = vperm.xlu1 %5145, %v6148_v11  }
0x18fc   :  { %5146 = vset.pattern.permute.xlu1 %v6863_v41 }
0x194f   :  { %v2126_v53 = vpop.permute.xlu1 %2125 }
0x1950   :  { %2128 = vst.msk [vmem:[#allocation2 + $0x7] sm:$0x1] %vm54_vm1, %v2126_v53 }
0x1951   :  { %2130 = vst.msk [vmem:[#allocation2 + $0x12] sm:$0x2] %vm646_vm11, %v2126_v53 }
0x1958   :  { %v4055_v22 = vld [vmem:[%s3943_s17 + $0xc] sm:$0x1]  ;;  %v2399_v29 = vld [vmem:[%s2398_s18] sm:$0x1]  ;;  %s4068_s17 = sld [smem:[#allocation6 + $0x28]]  ;;  %s3953_s18 = scalar_lea.vmem [#allocation3], %s4070_s5 }
0x1959   :  { %2415 = vrot.lane.b32.xlu1 %v4055_v22, %s5387_s27  ;;  %2401 = vrot.lane.b32.xlu0 %v2399_v29, %s5387_s27  ;;  %s4089_s5 = sld [smem:[#allocation6 + $0x38]] }
0x195d   :  { %2512 = vperm.xlu1 %5146, %v6342_v17  }
0x195e   :  { %s2998_s19 = scalar_lea.vmem [#allocation3], %s4068_s17  ;;  %s3613_s17 = scalar_lea.vmem [#allocation3], %s4087_s8 }
0x1961   :  { %5147 = vset.pattern.permute.xlu1 %v6864_v32 }
0x1966   :  { %v2371_v11 = vpop.permute.xlu1 %2370 }
0x1967   :  { %v2373_v25 = vmul.f32 %v5251_v8, %v2371_v11 }
0x1969   :  { %v2374_v62 = vsub.f32 %v2373_v25, %v6282_v18 }
0x196b   :  { %v2379_v7 = vmul.f32 %v2377_v5, %v2374_v62 }
0x196d   :  { %v2380_v55 = vadd.f32 %v2379_v7, %v6282_v18 }
0x196f   :  { %v2381_v56 = vsub.f32 %v6236_v27, %v2380_v55 }
0x1977   :  { %v2384_v48 = vpop.permute.xlu1 %2383 }
0x1978   :  { %v2386_v40 = vmul.f32 %v2384_v48, %v2381_v56 }
0x197a   :  { %v2387_v19 = vadd.f32 %v2386_v40, %v2380_v55 }
0x197c   :  { %v2388_v46 = vmul.f32 %v2387_v19, %v2120_v13 }
0x197e   :  { %2389 = vst.msk [vmem:[#allocation3 + $0x3] sm:$0x1] %vm54_vm1, %v2388_v46 }
0x197f   :  { %2390 = vst.msk [vmem:[#allocation3 + $0x8] sm:$0x2] %vm646_vm11, %v2388_v46 }
0x1986   :  { %v4054_v24 = vld [vmem:[%s3941_s22 + $0x6] sm:$0x1]  ;;  %v2396_v58 = vld [vmem:[%s2395_s23] sm:$0x1] }
0x1987   :  { %2410 = vst.msk [vmem:[#allocation4 + $0x1] sm:$0x1] %vm54_vm1, %v4054_v24  ;;  %2397 = vst.msk [vmem:[#allocation4] sm:$0x1] %vm54_vm1, %v2396_v58  ;;  %v2875_v13 = vld [vmem:[%s2874_s26] sm:$0x1] }
0x1988   :  { %v4065_v31 = vld [vmem:[%s3947_s0 + $0x6] sm:$0x1]  ;;  %s3001_s26 = scalar_lea.vmem [#allocation3], %s4069_s25  ;;  %s4078_s0 = sld [smem:[#allocation6 + $0x36]] }
0x1989   :  { %s4090_s25 = sld [smem:[#allocation6 + $0x39]] }
0x198e   :  { %s3961_s13 = scalar_lea.vmem [#allocation2], %s4078_s0  ;;  %s4096_s0 = sld [smem:[#allocation6 + $0x3a]] }
0x19cb   :  { %v2416_v27 = vpop.permute.xlu1 %2415  ;;  %v2402_v18 = vpop.permute.xlu0 %2401 }
0x19cc   :  { %2418 = vst.msk [vmem:[#allocation4 + $0x1] sm:$0x1] %vm129_vm4, %v2416_v27  ;;  %2404 = vst.msk [vmem:[#allocation4] sm:$0x1] %vm129_vm4, %v2402_v18 }
0x19d3   :  { %v2419_v34 = vld [vmem:[#allocation4] sm:$0x3] }
0x19d4   :  { %2876 = vst.msk [vmem:[#allocation4] sm:$0x1] %vm54_vm1, %v2875_v13  ;;  %4570 = vmatmul.mubr.msk.f32.vlgmr.msra.gmra.mrb[18].mxu0 %vm150_vm5, %v2419_v34  ;;  %2889 = vst.msk [vmem:[#allocation4 + $0x1] sm:$0x1] %vm54_vm1, %v4065_v31 }
0x19d5   :  { %4969 = vmatpush3.bf16.msra.mxu0 %v5575_v43  ;;  %4580 = vmatprep.mubr.msk.f32.mxu0 %vm5386_vm3, %v6866_v1 }
0x19d6   :  { %4970 = vmatprep.subr.bf16.mxu0 %v6861_v44 }
0x19d9   :  { %4972 = vmatpush3.bf16.msra.mxu0 %v5581_v45 }
0x19da   :  { %4997 = vmatprep.subr.bf16.mxu0 %v6861_v44 }
0x19dc   :  { %v2513_v40 = vpop.permute.xlu1 %2512 }
0x1aa7   :  { %v2489_v53 = vpop.f32.mrb[18].mxu0 }
0x1aa8   :  { %v2490_v22 = vadd.f32 %v2489_v53, %v5556_v30  ;;  %v4571_v29 = vpop.f32.mrb[19].mxu0 }
0x1aaa   :  { %v2494_v8 = vsub.f32 0.0, %v2490_v22 }
0x1aac   :  { %v2495_v11 = vmul.f32 1.442695, %v2494_v8 }
0x1aae   :  { %5252 = vpow2.f32 %v2495_v11 }
0x1ab8   :  { %v5253_v25 = vpop.eup %5252 }
0x1ab9   :  { %v2497_v62 = vadd.f32 1.0, %v5253_v25 }
0x1abb   :  { %5254 = vrcp.f32 %v2497_v62 }
0x1abc   :  { %5256 = vtanh.f32 %v2490_v22 }
0x1ac5   :  { %v5255_v5 = vpop.eup %5254 }
0x1ac6   :  { %2501 = vrot.lane.b32.xlu0 %v5255_v5, %s5389_s21  ;;  %v5257_v7 = vpop.eup %5256 }
0x1b38   :  { %v2502_v55 = vpop.permute.xlu0 %2501 }
0x1b39   :  { %v2504_v56 = vmul.f32 %v5257_v7, %v2502_v55 }
0x1b3b   :  { %2506 = vrot.lane.b32.xlu0 %v2504_v56, %s5390_s29 }
0x1bad   :  { %v2507_v48 = vpop.permute.xlu0 %2506 }
0x1bae   :  { %v2509_v19 = vsub.f32 %v2504_v56, %v2507_v48 }
0x1bb0   :  { %v2515_v46 = vmul.f32 %v2513_v40, %v2509_v19  ;;  %v6385_v40 = vld [vmem:[%s6835_s11 + $0x6] sm:$0x3] }
0x1bb2   :  { %2517 = vrot.lane.b32.xlu1 %v2515_v46, %s5390_s29 }
0x1c24   :  { %v2518_v24 = vpop.permute.xlu1 %2517 }
0x1c25   :  { %v6350_v58 = vadd.f32 %v2518_v24, %v2504_v56 }
0x1c27   :  { %4581 = vmatmul.mubr.msk.f32.vlgmr.msra.gmra.mrb[20].mxu0 %vm46_vm0, %v6350_v58 }
0x1c28   :  { %4999 = vmatpush3.bf16.msra.mxu0 %v5645_v36  ;;  %4607 = vmatprep.mubr.msk.f32.mxu0 %vm5386_vm3, %v6866_v1 }
0x1c29   :  { %5000 = vmatprep.subr.bf16.mxu0 %v6861_v44 }
0x1c2c   :  { %5002 = vmatpush3.bf16.msra.mxu0 %v5653_v38 }
0x1c2d   :  { %5003 = vmatprep.subr.bf16.mxu0 %v6861_v44 }
0x1c30   :  { %5005 = vmatpush3.bf16.msra.mxu0 %v5663_v42 }
0x1c31   :  { %5006 = vmatprep.subr.bf16.mxu0 %v6861_v44 }
0x1c34   :  { %5008 = vmatpush3.bf16.msra.mxu0 %v5673_v47 }
0x1c35   :  { %5009 = vmatprep.subr.bf16.mxu0 %v6861_v44 }
0x1c38   :  { %5011 = vmatpush3.bf16.msra.mxu0 %v5683_v51 }
0x1c39   :  { %5012 = vmatprep.subr.bf16.mxu0 %v6861_v44 }
0x1c3c   :  { %5014 = vmatpush3.bf16.msra.mxu0 %v5693_v54 }
0x1c3d   :  { %5033 = vmatprep.subr.bf16.mxu0 %v6861_v44 }
0x1cfa   :  { %v2590_v27 = vpop.f32.mrb[20].mxu0 }
0x1cfb   :  { %v2591_v18 = vadd.f32 %v2590_v27, %v5588_v50  ;;  %v4582_v13 = vpop.f32.mrb[21].mxu0 }
0x1cfd   :  { %v2601_v34 = vrot.slane %v2591_v18, %v5603_v61 }
0x1cff   :  { %v2602_v31 = vcombine.high %v2601_v34, %v2601_v34  ;;  %v2609_v53 = vrot.slane %v2601_v34, %v5603_v61 }
0x1d01   :  { %v2616_v22 = vrot.slane %v2602_v31, %v5603_v61  ;;  %v2620_v29 = vrot.slane %v2609_v53, %v5547_v28 }
0x1d03   :  { %v2624_v8 = vrot.slane %v2616_v22, %v5547_v28  ;;  %v2627_v11 = vadd.f32 %v6183_v4, %v2620_v29  ;;  %v4066_v4 = vld [vmem:[%s3949_s16 + $0x6] sm:$0x1]  ;;  %s4077_s16 = sld [smem:[#allocation6 + $0x31]] }
0x1d05   :  { %v2628_v25 = vadd.f32 %v6189_v15, %v2624_v8  ;;  %5258 = vtanh.f32 %v2627_v11  ;;  %v2878_v15 = vld [vmem:[%s2877_s30] sm:$0x1]  ;;  %s3959_s30 = scalar_lea.vmem [#allocation3], %s4079_s15 }
0x1d07   :  { %5260 = vtanh.f32 %v2628_v25  ;;  %v4072_v25 = vld [vmem:[%s3953_s18 + $0x6] sm:$0x1]  ;;  %s3965_s18 = scalar_lea.vmem [#allocation3], %s4089_s5 }
0x1d09   :  { %s3134_s1 = scalar_lea.vmem [#allocation3], %s4077_s16 }
0x1d0f   :  { %v5259_v62 = vpop.eup %5258 }
0x1d10   :  { %v2631_v5 = vmul.f32 %v5259_v62, %v5623_v16  ;;  %v2999_v62 = vld [vmem:[%s2998_s19] sm:$0x1] }
0x1d11   :  { %v5261_v7 = vpop.eup %5260 }
0x1d12   :  { %v2633_v55 = vsel %vm46_vm0, %v2631_v5, 0.0  ;;  %v2632_v56 = vmul.f32 %v5261_v7, %v5623_v16  ;;  %v6871_v5 = vld [vmem:[#allocation11_spill] sm:$0xff]  ;;  %v6872_v7 = vld [vmem:[#allocation12_spill] sm:$0xff] }
0x1d13   :  { %2634 = vadd.xlane.f32.xlu0 %v2633_v55 }
0x1d14   :  { %v2636_v48 = vsel %vm46_vm0, %v2632_v56, 0.0 }
0x1d15   :  { %2637 = vadd.xlane.f32.xlu1 %v2636_v48 }
0x1d26   :  { %2894 = vrot.lane.b32.xlu1 %v4066_v4, %s5387_s27 }
0x1d29   :  { %2880 = vrot.lane.b32.xlu0 %v2878_v15, %s5387_s27 }
0x1d2d   :  { %2899 = vrot.lane.b32.xlu0 %v6385_v40, %s5390_s29 }
0x1da0   :  { %v2635_v19 = vpop.xlane.xlu0 %2634 }
0x1da1   :  { %v2639_v46 = vadd.f32 %v2635_v19, %v5699_v57 }
0x1da2   :  { %v2638_v24 = vpop.xlane.xlu1 %2637 }
0x1da3   :  { %v2640_v27 = vadd.f32 %v2638_v24, %v5699_v57  ;;  %v2646_v13 = vrot.slane %v2639_v46, %v5702_v59 }
0x1da4   :  { %v2881_v18 = vpop.permute.xlu0 %2880 }
0x1da5   :  { %v2650_v34 = vrot.slane %v2640_v27, %v5702_v59  ;;  %2883 = vst.msk [vmem:[#allocation4] sm:$0x1] %vm129_vm4, %v2881_v18 }
0x1da6   :  { %v2895_v31 = vpop.permute.xlu1 %2894 }
0x1da7   :  { %2897 = vst.msk [vmem:[#allocation4 + $0x1] sm:$0x1] %vm129_vm4, %v2895_v31  ;;  %v2651_v53 = vsel %vm402_vm6, %v2650_v34, %v2646_v13 }
0x1da8   :  { %v2900_v22 = vpop.permute.xlu0 %2899  ;;  %v2653_v29 = vsel %vm114_vm7, %v2651_v53, -1e+12  ;;  %v6873_v53 = vld [vmem:[#allocation14_spill] sm:$0xff] }
0x1da9   :  { %2902 = vst.msk [vmem:[#allocation4] sm:$0x3] %vm680_vm9, %v2900_v22  ;;  %v2654_v8 = vsel %vm406_vm8, %v2653_v29, -inf }
0x1daa   :  { %2655 = vmax.xlane.f32.xlu1 %v2654_v8  ;;  %v6420_v8 = vld [vmem:[%s6834_s10 + $0x6] sm:$0x3] }
0x1db0   :  { %v2903_v11 = vld [vmem:[#allocation4] sm:$0x3] }
0x1db1   :  { %4608 = vmatmul.mubr.msk.f32.vlgmr.msra.gmra.mrb[22].mxu0 %vm479_vm10, %v2903_v11  ;;  %3013 = vst.msk [vmem:[#allocation4 + $0x1] sm:$0x1] %vm54_vm1, %v4072_v25  ;;  %3000 = vst.msk [vmem:[#allocation4] sm:$0x1] %vm54_vm1, %v2999_v62  ;;  %v4073_v25 = vld [vmem:[%s3955_s24 + $0x6] sm:$0x1] }
0x1db2   :  { %5035 = vmatpush3.bf16.msra.mxu0 %v5493_v6  ;;  %4653 = vmatprep.mubr.msk.f32.mxu0 %vm5386_vm3, %v6866_v1  ;;  %v6874_v62 = vmov 4   ;;  %s6658_s24 = sld [smem:[#allocation6 + $0x35]] }
0x1db3   :  { %5036 = vmatprep.subr.bf16.mxu0 %v6861_v44 }
0x1db6   :  { %5038 = vmatpush3.bf16.msra.mxu0 %v5503_v9 }
0x1db7   :  { %5039 = vmatprep.subr.bf16.mxu0 %v6861_v44 }
0x1dba   :  { %5041 = vmatpush3.bf16.msra.mxu0 %v6871_v5 }
0x1dbb   :  { %5042 = vmatprep.subr.bf16.mxu0 %v6861_v44 }
0x1dbe   :  { %5044 = vmatpush3.bf16.msra.mxu0 %v6872_v7 }
0x1dbf   :  { %5045 = vmatprep.subr.bf16.mxu0 %v6861_v44 }
0x1e37   :  { %v2656_v55 = vpop.xlane.xlu1 %2655 }
0x1e38   :  { %v2657_v56 = vsub.f32 %v2653_v29, %v2656_v55  ;;  %v6875_v55 = vld [vmem:[#allocation17_spill] sm:$0xff] }
0x1e3a   :  { %v2658_v6 = vmul.f32 1.442695, %v2657_v56 }
0x1e3c   :  { %5262 = vpow2.f32 %v2658_v6 }
0x1e46   :  { %v5263_v48 = vpop.eup %5262 }
0x1e47   :  { %v2660_v4 = vsel %vm406_vm8, %v5263_v48, 0.0 }
0x1e48   :  { %2661 = vadd.xlane.f32.xlu0 %v2660_v4 }
0x1e84   :  { %v2973_v15 = vpop.f32.mrb[22].mxu0 }
0x1e85   :  { %v4609_v9 = vpop.f32.mrb[23].mxu0  ;;  %v2974_v19 = vadd.f32 %v2973_v15, %v5735_v33 }
0x1e87   :  { %v2978_v46 = vsub.f32 0.0, %v2974_v19 }
0x1e89   :  { %v2979_v24 = vmul.f32 1.442695, %v2978_v46 }
0x1e8b   :  { %5264 = vpow2.f32 %v2979_v24 }
0x1e95   :  { %v5265_v18 = vpop.eup %5264 }
0x1e96   :  { %v2981_v13 = vadd.f32 1.0, %v5265_v18 }
0x1ed5   :  { %v2662_v27 = vpop.xlane.xlu0 %2661 }
0x1ed6   :  { %5266 = vrcp.f32 %v2662_v27 }
0x1ed7   :  { %5268 = vrcp.f32 %v2981_v13 }
0x1ed8   :  { %5270 = vtanh.f32 %v2974_v19 }
0x1ee0   :  { %v5267_v34 = vpop.eup %5266 }
0x1ee1   :  { %v2664_v31 = vmul.f32 %v5267_v34, %v5263_v48  ;;  %v5269_v11 = vpop.eup %5268 }
0x1ee2   :  { %v5271_v24 = vpop.eup %5270 }
0x1ee3   :  { %v2675_v22 = vrot.slane %v2664_v31, %v6873_v53  ;;  %v2668_v29 = vrot.slane %v2664_v31, %v5547_v28 }
0x1ee5   :  { %2677 = vbcast.lane.b32.xlu1 %v2675_v22, 256  ;;  %2670 = vbcast.lane.b32.xlu0 %v2668_v29, 256 }
0x1ee9   :  { %2704 = vrot.lane.b32.xlu0 %v6420_v8, %s5390_s29 }
0x1eed   :  { %2985 = vrot.lane.b32.xlu0 %v5269_v11, %s5389_s21 }
0x1ef1   :  { %3018 = vrot.lane.b32.xlu0 %v4073_v25, %s5387_s27 }
0x1ef5   :  { %2858 = vperm.xlu0 %5148, %v6342_v17  }
0x1ef9   :  { %5149 = vset.pattern.permute.xlu0 %v6874_v62 }
0x1efa   :  { %3115 = vperm.xlu0 %5149, %v6342_v17  }
0x1f57   :  { %v2678_v5 = vpop.permute.xlu1 %2677  ;;  %v2671_v7 = vpop.permute.xlu0 %2670 }
0x1f58   :  { %v2680_v56 = vmul.f32 %v6875_v55, %v2678_v5  ;;  %v2679_v6 = vmul.f32 %v6255_v60, %v2671_v7  ;;  %v3002_v55 = vld [vmem:[%s3001_s26] sm:$0x1]  ;;  %s3967_s26 = scalar_lea.vmem [#allocation3], %s4090_s25  ;;  %s5396_s25 = smov 31  }
0x1f5a   :  { %v2688_v48 = vsel %vm46_vm0, %v2680_v56, 0.0  ;;  %v2681_v4 = vsel %vm46_vm0, %v2679_v6, 0.0 }
0x1f5b   :  { %v2689_v15 = vrot.slane %v2688_v48, 4  ;;  %v2682_v9 = vrot.slane %v2681_v4, 4  ;;  %v2705_v46 = vpop.permute.xlu0 %2704 }
0x1f5d   :  { %v2690_v27 = vadd.f32 %v2689_v15, %v2688_v48  ;;  %v2683_v18 = vadd.f32 %v2682_v9, %v2681_v4 }
0x1f5f   :  { %v2691_v13 = vrot.slane %v2690_v27, 2  ;;  %v2684_v34 = vrot.slane %v2683_v18, 2  ;;  %v2986_v31 = vpop.permute.xlu0 %2985 }
0x1f60   :  { %v2988_v19 = vmul.f32 %v5271_v24, %v2986_v31 }
0x1f61   :  { %v2692_v22 = vadd.f32 %v2691_v13, %v2690_v27  ;;  %v2685_v29 = vadd.f32 %v2684_v34, %v2683_v18 }
0x1f63   :  { %v2693_v11 = vrot.slane %v2692_v22, 1  ;;  %v2686_v25 = vrot.slane %v2685_v29, 1  ;;  %v3019_v62 = vpop.permute.xlu0 %3018 }
0x1f64   :  { %3021 = vst.msk [vmem:[#allocation4 + $0x1] sm:$0x1] %vm129_vm4, %v3019_v62 }
0x1f65   :  { %v2694_v60 = vadd.f32 %v2693_v11, %v2692_v22  ;;  %v2687_v5 = vadd.f32 %v2686_v25, %v2685_v29 }
0x1f67   :  { %v2699_v7 = vsel %vm402_vm6, %v2694_v60, %v2687_v5 }
0x1f68   :  { %2700 = vrot.lane.b32.xlu1 %v2699_v7, %s5387_s27 }
0x1f6c   :  { %2991 = vperm.xlu1 %5147, %v6342_v17  }
0x1f70   :  { %3004 = vrot.lane.b32.xlu1 %v3002_v55, %s5387_s27 }
0x1f71   :  { %5150 = vset.pattern.permute.xlu1 %v6865_v39 }
0x1f74   :  { %v2859_v13 = vpop.permute.xlu0 %2858 }
0x1f79   :  { %v3116_v55 = vpop.permute.xlu0 %3115 }
0x1fda   :  { %v2701_v56 = vpop.permute.xlu1 %2700 }
0x1fdb   :  { %v2707_v6 = vsel %vm46_vm0, %v6350_v58, %v2701_v56  ;;  %v2989_v58 = vsub.f32 %v2988_v19, %v6385_v40 }
0x1fdc   :  { %v2708_v48 = vsel %vm150_vm5, %v2707_v6, %v2705_v46 }
0x1fdd   :  { %4059 = vmatmul.mubr.msk.f32.vlgmr.msra.gmra.mrb[12].mxu1 %vm479_vm10, %v2708_v48 }
0x1fde   :  { %5017 = vmatpush3.bf16.msra.mxu1 %v5645_v36  ;;  %4634 = vmatprep.mubr.msk.f32.mxu1 %vm5386_vm3, %v6866_v1 }
0x1fdf   :  { %5018 = vmatprep.subr.bf16.mxu1 %v6861_v44 }
0x1fe2   :  { %5020 = vmatpush3.bf16.msra.mxu1 %v5653_v38 }
0x1fe3   :  { %5021 = vmatprep.subr.bf16.mxu1 %v6861_v44 }
0x1fe6   :  { %5023 = vmatpush3.bf16.msra.mxu1 %v5663_v42 }
0x1fe7   :  { %5024 = vmatprep.subr.bf16.mxu1 %v6861_v44 }
0x1fea   :  { %5026 = vmatpush3.bf16.msra.mxu1 %v5673_v47 }
0x1feb   :  { %v2992_v4 = vpop.permute.xlu1 %2991  ;;  %5027 = vmatprep.subr.bf16.mxu1 %v6861_v44 }
0x1fec   :  { %v2994_v15 = vmul.f32 %v2992_v4, %v2989_v58 }
0x1fee   :  { %v6455_v9 = vadd.f32 %v6385_v40, %v2994_v15  ;;  %5029 = vmatpush3.bf16.msra.mxu1 %v5683_v51 }
0x1fef   :  { %v3005_v46 = vpop.permute.xlu1 %3004  ;;  %5030 = vmatprep.subr.bf16.mxu1 %v6861_v44 }
0x1ff0   :  { %3007 = vst.msk [vmem:[#allocation4] sm:$0x1] %vm129_vm4, %v3005_v46  ;;  %3023 = vrot.lane.b32.xlu1 %v6455_v9, %s5390_s29 }
0x1ff2   :  { %5032 = vmatpush3.bf16.msra.mxu1 %v5693_v54 }
0x1ff3   :  { %5052 = vmatprep.subr.bf16.mxu1 %v5764_v26 }
0x2062   :  { %v3024_v24 = vpop.permute.xlu1 %3023 }
0x2063   :  { %3026 = vst.msk [vmem:[#allocation4] sm:$0x3] %vm680_vm9, %v3024_v24 }
0x206a   :  { %v3027_v27 = vld [vmem:[#allocation4] sm:$0x3] }
0x206b   :  { %4635 = vmatmul.mubr.msk.f32.vlgmr.msra.gmra.mrb[14].mxu1 %vm479_vm10, %v3027_v27 }
0x206c   :  { %5054 = vmatpush1.bf16.msra.mxu1 %v5775_v10  ;;  %3515 = vmatprep.mubr.f32.mxu1 %v6866_v1 }
0x206d   :  { %5056 = vmatprep.subr.bf16.mxu1 %v5777_v12 }
0x2070   :  { %5058 = vmatpush1.bf16.msra.mxu1 %v5793_v20 }
0x2071   :  { %5060 = vmatprep.subr.bf16.mxu1 %v5796_v21 }
0x2074   :  { %5062 = vmatpush1.bf16.msra.mxu1 %v5811_v35 }
0x2075   :  { %5064 = vmatprep.subr.bf16.mxu1 %v5814_v37 }
0x2078   :  { %5066 = vmatpush1.bf16.msra.mxu1 %v5829_v49 }
0x2079   :  { %5068 = vmatprep.subr.bf16.mxu1 %v5832_v52 }
0x207c   :  { %5070 = vmatpush1.bf16.msra.mxu1 %v5847_v2 }
0x207d   :  { %5072 = vmatprep.subr.bf16.mxu1 %v5850_v3 }
0x2080   :  { %5074 = vmatpush1.bf16.msra.mxu1 %v5859_v14 }
0x2081   :  { %5093 = vmatprep.subr.bf16.mxu1 %v6861_v44 }
0x20b0   :  { %v2778_v26 = vpop.f32.mrb[12].mxu1 }
0x20b1   :  { %v2779_v10 = vadd.f32 %v2778_v26, %v5932_v23  ;;  %v6480_v12 = vpop.f32.mrb[13].mxu1 }
0x20b3   :  { %v2784_v20 = vsub.f32 0.0, %v2779_v10 }
0x20b5   :  { %v2785_v21 = vmul.f32 1.442695, %v2784_v20 }
0x20b7   :  { %5272 = vpow2.f32 %v2785_v21  ;;  %v6515_v21 = vld [vmem:[%s6831_s7 + $0x8] sm:$0x3]  ;;  %s4088_s7 = sld [smem:[#allocation6 + $0x33]] }
0x20bd   :  { %s3616_s22 = scalar_lea.vmem [#allocation3], %s4088_s7 }
0x20c1   :  { %v5273_v35 = vpop.eup %5272 }
0x20c2   :  { %v2787_v37 = vadd.f32 1.0, %v5273_v35 }
0x20c4   :  { %5274 = vrcp.f32 %v2787_v37 }
0x20c5   :  { %5276 = vtanh.f32 %v2779_v10 }
0x20ce   :  { %v5275_v49 = vpop.eup %5274 }
0x20cf   :  { %2791 = vrot.lane.b32.xlu1 %v5275_v49, %s5389_s21  ;;  %v5277_v14 = vpop.eup %5276 }
0x213e   :  { %v3097_v52 = vpop.f32.mrb[14].mxu1 }
0x213f   :  { %v3098_v2 = vadd.f32 %v3097_v52, %v5735_v33  ;;  %v4636_v3 = vpop.f32.mrb[15].mxu1 }
0x2141   :  { %v3102_v40 = vsub.f32 0.0, %v3098_v2  ;;  %v2792_v18 = vpop.permute.xlu1 %2791 }
0x2142   :  { %v2794_v34 = vmul.f32 %v5277_v14, %v2792_v18 }
0x2143   :  { %v3103_v31 = vmul.f32 1.442695, %v3102_v40 }
0x2144   :  { %v2861_v19 = vmul.f32 %v2859_v13, %v2794_v34 }
0x2145   :  { %5278 = vpow2.f32 %v3103_v31 }
0x2146   :  { %2862 = vst.msk [vmem:[#allocation2 + $0x8] sm:$0x1] %vm54_vm1, %v2861_v19  ;;  %2864 = vrot.lane.b32.xlu1 %v2861_v19, %s5390_s29 }
0x2147   :  { %2868 = vst.msk [vmem:[#allocation2 + $0x13] sm:$0x2] %vm646_vm11, %v2861_v19 }
0x214f   :  { %v5279_v22 = vpop.eup %5278 }
0x2150   :  { %v3105_v29 = vadd.f32 1.0, %v5279_v22 }
0x2152   :  { %5280 = vrcp.f32 %v3105_v29 }
0x2153   :  { %5282 = vtanh.f32 %v3098_v2 }
0x215c   :  { %v5281_v11 = vpop.eup %5280 }
0x215d   :  { %3109 = vrot.lane.b32.xlu1 %v5281_v11, %s5389_s21  ;;  %v5283_v5 = vpop.eup %5282 }
0x2161   :  { %3122 = vperm.xlu1 %5150, %v6342_v17  }
0x2165   :  { %5151 = vset.pattern.permute.xlu1 %v6863_v41 }
0x21b8   :  { %v2865_v25 = vpop.permute.xlu1 %2864 }
0x21b9   :  { %2867 = vst.msk [vmem:[#allocation2 + $0x9] sm:$0x1] %vm54_vm1, %v2865_v25 }
0x21ba   :  { %2869 = vst.msk [vmem:[#allocation2 + $0x14] sm:$0x2] %vm646_vm11, %v2865_v25 }
0x21c1   :  { %v4081_v62 = vld [vmem:[%s3961_s13 + $0xc] sm:$0x1]  ;;  %v3138_v60 = vld [vmem:[%s3137_s14] sm:$0x1]  ;;  %s3971_s13 = scalar_lea.vmem [#allocation3], %s4096_s0 }
0x21c2   :  { %3154 = vrot.lane.b32.xlu1 %v4081_v62, %s5387_s27  ;;  %3140 = vrot.lane.b32.xlu0 %v3138_v60, %s5387_s27 }
0x21c6   :  { %3251 = vperm.xlu1 %5151, %v6515_v21  }
0x21ca   :  { %5152 = vset.pattern.permute.xlu1 %v6864_v32 }
0x21cf   :  { %v3110_v17 = vpop.permute.xlu1 %3109 }
0x21d0   :  { %v3112_v7 = vmul.f32 %v5283_v5, %v3110_v17 }
0x21d2   :  { %v3113_v41 = vsub.f32 %v3112_v7, %v6455_v9 }
0x21d4   :  { %v3118_v56 = vmul.f32 %v3116_v55, %v3113_v41 }
0x21d6   :  { %v3119_v6 = vadd.f32 %v3118_v56, %v6455_v9 }
0x21d8   :  { %v3120_v48 = vsub.f32 %v6420_v8, %v3119_v6 }
0x21e0   :  { %v3123_v58 = vpop.permute.xlu1 %3122 }
0x21e1   :  { %v3125_v4 = vmul.f32 %v3123_v58, %v3120_v48 }
0x21e3   :  { %v3126_v15 = vadd.f32 %v3125_v4, %v3119_v6 }
0x21e5   :  { %v3127_v46 = vmul.f32 %v3126_v15, %v2859_v13 }
0x21e7   :  { %3128 = vst.msk [vmem:[#allocation3 + $0x4] sm:$0x1] %vm54_vm1, %v3127_v46 }
0x21e8   :  { %3129 = vst.msk [vmem:[#allocation3 + $0x9] sm:$0x2] %vm646_vm11, %v3127_v46 }
0x21ef   :  { %v4080_v24 = vld [vmem:[%s3959_s30 + $0x6] sm:$0x1]  ;;  %v3135_v27 = vld [vmem:[%s3134_s1] sm:$0x1] }
0x21f0   :  { %3149 = vst.msk [vmem:[#allocation4 + $0x1] sm:$0x1] %vm54_vm1, %v4080_v24  ;;  %3136 = vst.msk [vmem:[#allocation4] sm:$0x1] %vm54_vm1, %v3135_v27  ;;  %v3614_v10 = vld [vmem:[%s3613_s17] sm:$0x1] }
0x21f1   :  { %v4091_v20 = vld [vmem:[%s3965_s18 + $0x6] sm:$0x1]  ;;  %v3617_v32 = vld [vmem:[%s3616_s22] sm:$0x1] }
0x21f2   :  { %v4092_v29 = vld [vmem:[%s3967_s26 + $0x6] sm:$0x1] }
0x21f3   :  { %v4098_v7 = vld [vmem:[%s3971_s13 + $0x6] sm:$0x1] }
0x21f4   :  { %v5340_v24 = vld [vmem:[%s6827_s3] sm:$0xff] }
0x2234   :  { %v3155_v8 = vpop.permute.xlu1 %3154  ;;  %v3141_v9 = vpop.permute.xlu0 %3140 }
0x2235   :  { %3157 = vst.msk [vmem:[#allocation4 + $0x1] sm:$0x1] %vm129_vm4, %v3155_v8  ;;  %3143 = vst.msk [vmem:[#allocation4] sm:$0x1] %vm129_vm4, %v3141_v9  ;;  %v5341_v8 = vld [vmem:[%s6827_s3 + $0x8] sm:$0xff]  ;;  %s4097_s3 = sld [smem:[#allocation6 + $0x3b]] }
0x223b   :  { %s3973_s5 = scalar_lea.vmem [#allocation3], %s4097_s3 }
0x223c   :  { %v3158_v26 = vld [vmem:[#allocation4] sm:$0x3] }
0x223d   :  { %4654 = vmatmul.mubr.msk.f32.vlgmr.msra.gmra.mrb[24].mxu0 %vm150_vm5, %v3158_v26  ;;  %3615 = vst.msk [vmem:[#allocation4] sm:$0x1] %vm54_vm1, %v3614_v10  ;;  %3628 = vst.msk [vmem:[#allocation4 + $0x1] sm:$0x1] %vm54_vm1, %v4091_v20 }
0x223e   :  { %5047 = vmatpush3.bf16.msra.mxu0 %v5575_v43  ;;  %4664 = vmatprep.mubr.msk.f32.mxu0 %vm5386_vm3, %v6866_v1 }
0x223f   :  { %5048 = vmatprep.subr.bf16.mxu0 %v6861_v44 }
0x2242   :  { %5050 = vmatpush3.bf16.msra.mxu0 %v5581_v45 }
0x2243   :  { %5075 = vmatprep.subr.bf16.mxu0 %v6861_v44 }
0x2245   :  { %v3252_v34 = vpop.permute.xlu1 %3251 }
0x2310   :  { %v3228_v35 = vpop.f32.mrb[24].mxu0 }
0x2311   :  { %v3229_v43 = vadd.f32 %v3228_v35, %v5556_v30  ;;  %v4655_v37 = vpop.f32.mrb[25].mxu0  ;;  %v6526_v30 = vld [vmem:[%s6835_s11 + $0x8] sm:$0x3]  ;;  %s4094_s11 = sld [smem:[#allocation6 + $0x34]] }
0x2313   :  { %v3233_v49 = vsub.f32 0.0, %v3229_v43 }
0x2315   :  { %v3234_v52 = vmul.f32 1.442695, %v3233_v49 }
0x2317   :  { %5284 = vpow2.f32 %v3234_v52  ;;  %s3737_s28 = scalar_lea.vmem [#allocation3], %s4094_s11 }
0x2318   :  { %v3738_v17 = vld [vmem:[%s3737_s28] sm:$0x1] }
0x2321   :  { %v5285_v2 = vpop.eup %5284 }
0x2322   :  { %v3236_v45 = vadd.f32 1.0, %v5285_v2 }
0x2324   :  { %5286 = vrcp.f32 %v3236_v45 }
0x2325   :  { %5288 = vtanh.f32 %v3229_v43 }
0x232e   :  { %v5287_v3 = vpop.eup %5286 }
0x232f   :  { %3240 = vrot.lane.b32.xlu0 %v5287_v3, %s5389_s21  ;;  %v5289_v14 = vpop.eup %5288 }
0x23a1   :  { %v3241_v40 = vpop.permute.xlu0 %3240 }
0x23a2   :  { %v3243_v18 = vmul.f32 %v5289_v14, %v3241_v40 }
0x23a4   :  { %3245 = vrot.lane.b32.xlu0 %v3243_v18, %s5390_s29 }
0x23a8   :  { %3619 = vrot.lane.b32.xlu0 %v3617_v32, %s5387_s27 }
0x23ac   :  { %3638 = vrot.lane.b32.xlu0 %v6526_v30, %s5390_s29 }
0x2416   :  { %v3246_v13 = vpop.permute.xlu0 %3245 }
0x2417   :  { %v3248_v31 = vsub.f32 %v3243_v18, %v3246_v13 }
0x2419   :  { %v3254_v19 = vmul.f32 %v3252_v34, %v3248_v31 }
0x241a   :  { %v3620_v22 = vpop.permute.xlu0 %3619 }
0x241b   :  { %3622 = vst.msk [vmem:[#allocation4] sm:$0x1] %vm129_vm4, %v3620_v22  ;;  %3256 = vrot.lane.b32.xlu1 %v3254_v19, %s5390_s29 }
0x241e   :  { %v3639_v62 = vpop.permute.xlu0 %3638 }
0x241f   :  { %3633 = vrot.lane.b32.xlu1 %v4092_v29, %s5387_s27 }
0x248d   :  { %v3257_v11 = vpop.permute.xlu1 %3256 }
0x248e   :  { %v6533_v25 = vadd.f32 %v3257_v11, %v3243_v18 }
0x2490   :  { %4665 = vmatmul.mubr.msk.f32.vlgmr.msra.gmra.mrb[26].mxu0 %vm46_vm0, %v6533_v25 }
0x2491   :  { %v3634_v60 = vpop.permute.xlu1 %3633  ;;  %5077 = vmatpush3.bf16.msra.mxu0 %v5645_v36  ;;  %4691 = vmatprep.mubr.msk.f32.mxu0 %vm5386_vm3, %v6866_v1 }
0x2492   :  { %3636 = vst.msk [vmem:[#allocation4 + $0x1] sm:$0x1] %vm129_vm4, %v3634_v60  ;;  %5078 = vmatprep.subr.bf16.mxu0 %v6861_v44 }
0x2493   :  { %3641 = vst.msk [vmem:[#allocation4] sm:$0x3] %vm680_vm9, %v3639_v62 }
0x2495   :  { %5080 = vmatpush3.bf16.msra.mxu0 %v5653_v38 }
0x2496   :  { %5081 = vmatprep.subr.bf16.mxu0 %v6861_v44 }
0x2499   :  { %5083 = vmatpush3.bf16.msra.mxu0 %v5663_v42 }
0x249a   :  { %5084 = vmatprep.subr.bf16.mxu0 %v6861_v44  ;;  %v3642_v5 = vld [vmem:[#allocation4] sm:$0x3] }
0x249b   :  { %3739 = vst.msk [vmem:[#allocation4] sm:$0x1] %vm54_vm1, %v3738_v17  ;;  %3752 = vst.msk [vmem:[#allocation4 + $0x1] sm:$0x1] %vm54_vm1, %v4098_v7 }
0x249d   :  { %5086 = vmatpush3.bf16.msra.mxu0 %v5673_v47 }
0x249e   :  { %5087 = vmatprep.subr.bf16.mxu0 %v6861_v44 }
0x24a1   :  { %5089 = vmatpush3.bf16.msra.mxu0 %v5683_v51 }
0x24a2   :  { %5090 = vmatprep.subr.bf16.mxu0 %v6861_v44 }
0x24a5   :  { %5092 = vmatpush3.bf16.msra.mxu0 %v5693_v54 }
0x24a8   :  { %4692 = vmatmul.mubr.msk.f32.vlgmr.msra.gmra.mrb[28].mxu0 %vm479_vm10, %v3642_v5 }
0x2563   :  { %v3329_v41 = vpop.f32.mrb[26].mxu0 }
0x2564   :  { %v3330_v55 = vadd.f32 %v3329_v41, %v5588_v50  ;;  %v4666_v56 = vpop.f32.mrb[27].mxu0 }
0x2566   :  { %v3340_v6 = vrot.slane %v3330_v55, %v5603_v61 }
0x2568   :  { %v3341_v48 = vcombine.high %v3340_v6, %v3340_v6  ;;  %v3348_v58 = vrot.slane %v3340_v6, %v5603_v61  ;;  %v6588_v6 = vld [vmem:[%s6834_s10 + $0x8] sm:$0x3] }
0x256a   :  { %v3355_v4 = vrot.slane %v3341_v48, %v5603_v61  ;;  %v3359_v15 = vrot.slane %v3348_v58, %v5547_v28  ;;  %v6876_v48 = vmov 2   ;;  %v4099_v58 = vld [vmem:[%s3973_s5 + $0x6] sm:$0x1] }
0x256c   :  { %v3363_v46 = vrot.slane %v3355_v4, %v5547_v28  ;;  %v3366_v27 = vadd.f32 %v5340_v24, %v3359_v15  ;;  %v6877_v4 = vld [vmem:[#allocation13_spill] sm:$0xff] }
0x256d   :  { %v467_v15 = vsub.s32 5, %v6877_v4 }
0x256e   :  { %v3367_v9 = vadd.f32 %v5341_v8, %v3363_v46  ;;  %5290 = vtanh.f32 %v3366_v27  ;;  %v5342_v46 = vld [vmem:[%s6833_s9] sm:$0xff]  ;;  %v6878_v8 = vld [vmem:[#allocation15_spill] sm:$0xff] }
0x256f   :  { %v468_v24 = vrot.slane %v5342_v46, %v467_v15 }
0x2570   :  { %5292 = vtanh.f32 %v3367_v9 }
0x2571   :  { %v6601_v27 = vrot.slane %v468_v24, %v6873_v53 }
0x2573   :  { %v552_v9 = vadd.f32 %v6878_v8, %v6601_v27 }
0x2578   :  { %v5291_v26 = vpop.eup %5290 }
0x2579   :  { %v3370_v10 = vmul.f32 %v5291_v26, %v5623_v16  ;;  %v6879_v26 = vld [vmem:[#allocation16_spill] sm:$0xff] }
0x257a   :  { %v5293_v20 = vpop.eup %5292 }
0x257b   :  { %v3372_v35 = vsel %vm46_vm0, %v3370_v10, 0.0  ;;  %v3371_v43 = vmul.f32 %v5293_v20, %v5623_v16  ;;  %v3712_v32 = vpop.f32.mrb[28].mxu0  ;;  %v1303_v10 = vadd.f32 %v6879_v26, %v6601_v27  ;;  %v6608_v20 = vrot.slane %v552_v9, %v5603_v61 }
0x257c   :  { %3373 = vadd.xlane.f32.xlu1 %v3372_v35  ;;  %v4693_v13 = vpop.f32.mrb[29].mxu0  ;;  %v3713_v29 = vadd.f32 %v3712_v32, %v5735_v33 }
0x257d   :  { %v3375_v37 = vsel %vm46_vm0, %v3371_v43, 0.0  ;;  %v1324_v35 = vrot.slane %v1303_v10, %v5603_v61  ;;  %v2042_v43 = vadd.f32 %v6307_v0, %v6601_v27 }
0x257e   :  { %3376 = vadd.xlane.f32.xlu0 %v3375_v37  ;;  %v3717_v11 = vsub.f32 0.0, %v3713_v29  ;;  %v581_v37 = vrot.slane %v6608_v20, %v5603_v61 }
0x2580   :  { %v3718_v62 = vmul.f32 1.442695, %v3717_v11 }
0x2609   :  { %v3374_v49 = vpop.xlane.xlu1 %3373 }
0x260a   :  { %v3378_v52 = vadd.f32 %v3374_v49, %v5699_v57  ;;  %v1325_v49 = vcombine.high %v1324_v35, %v1324_v35 }
0x260b   :  { %v3377_v2 = vpop.xlane.xlu0 %3376 }
0x260c   :  { %v3379_v45 = vadd.f32 %v3377_v2, %v5699_v57  ;;  %v3385_v3 = vrot.slane %v3378_v52, %v5702_v59  ;;  %v6617_v52 = vrot.slane %v2042_v43, %v5603_v61  ;;  %v2781_v2 = vadd.f32 %v6480_v12, %v6601_v27  ;;  %v5343_v12 = vld [vmem:[%s6826_s2 + $0x8] sm:$0xff] }
0x260d   :  { %v1339_v0 = vrot.slane %v1325_v49, %v5603_v61 }
0x260e   :  { %v3389_v14 = vrot.slane %v3379_v45, %v5702_v59  ;;  %v592_v45 = vrot.slane %v581_v37, %v5547_v28 }
0x2610   :  { %v3390_v40 = vsel %vm402_vm6, %v3389_v14, %v3385_v3  ;;  %v6625_v3 = vld [vmem:[%s6828_s4] sm:$0xff] }
0x2611   :  { %v3392_v18 = vsel %vm114_vm7, %v3390_v40, -1e+12  ;;  %v2064_v40 = vcombine.high %v6617_v52, %v6617_v52 }
0x2612   :  { %v3393_v16 = vsel %vm406_vm8, %v3392_v18, -inf }
0x2613   :  { %3394 = vmax.xlane.f32.xlu0 %v3393_v16 }
0x26a0   :  { %v3395_v34 = vpop.xlane.xlu0 %3394 }
0x26a1   :  { %v3396_v31 = vsub.f32 %v3392_v18, %v3395_v34  ;;  %v6632_v18 = vrot.slane %v2781_v2, %v5603_v61  ;;  %v5344_v34 = vld [vmem:[%s6826_s2] sm:$0xff] }
0x26a3   :  { %v3397_v19 = vmul.f32 1.442695, %v3396_v31 }
0x26a5   :  { %5294 = vpow2.f32 %v3397_v19  ;;  %v599_v19 = vadd.f32 %v592_v45, %v6625_v3 }
0x26a6   :  { %5296 = vpow2.f32 %v3718_v62 }
0x26af   :  { %v5295_v22 = vpop.eup %5294 }
0x26b0   :  { %v3399_v57 = vsel %vm406_vm8, %v5295_v22, 0.0  ;;  %v5297_v60 = vpop.eup %5296 }
0x26b1   :  { %3400 = vadd.xlane.f32.xlu1 %v3399_v57  ;;  %v3720_v5 = vadd.f32 1.0, %v5297_v60  ;;  %v2803_v60 = vcombine.high %v6632_v18, %v6632_v18 }
0x273e   :  { %v3401_v63 = vpop.xlane.xlu1 %3400 }
0x273f   :  { %5298 = vrcp.f32 %v3401_v63  ;;  %v2078_v63 = vrot.slane %v2064_v40, %v5603_v61 }
0x2740   :  { %5300 = vrcp.f32 %v3720_v5 }
0x2741   :  { %5302 = vtanh.f32 %v3713_v29  ;;  %v6651_v29 = vld [vmem:[%s6828_s4 + $0x8] sm:$0xff]  ;;  %s3740_s4 = scalar_lea.vmem [#allocation3], %s6658_s24 }
0x2742   :  { %5304 = vtanh.f32 %v599_v19 }
0x2749   :  { %v5299_v17 = vpop.eup %5298 }
0x274a   :  { %v3403_v7 = vmul.f32 %v5299_v17, %v5295_v22  ;;  %v5301_v56 = vpop.eup %5300  ;;  %v1347_v22 = vrot.slane %v1339_v0, %v5547_v28 }
0x274b   :  { %v5303_v9 = vpop.eup %5302 }
0x274c   :  { %v3414_v41 = vrot.slane %v3403_v7, %v6873_v53  ;;  %v3407_v55 = vrot.slane %v3403_v7, %v5547_v28  ;;  %v1332_v53 = vrot.slane %v1324_v35, %v5603_v61  ;;  %v5305_v45 = vpop.eup %5304 }
0x274e   :  { %3416 = vbcast.lane.b32.xlu1 %v3414_v41, 256  ;;  %3409 = vbcast.lane.b32.xlu0 %v3407_v55, 256  ;;  %v1343_v14 = vrot.slane %v1332_v53, %v5547_v28 }
0x2750   :  { %v1350_v57 = vadd.f32 %v1343_v14, %v6625_v3 }
0x2752   :  { %3730 = vperm.xlu1 %5152, %v6515_v21   ;;  %3724 = vrot.lane.b32.xlu0 %v5301_v56, %s5389_s21  ;;  %v1351_v56 = vadd.f32 %v1347_v22, %v6651_v29  ;;  %5306 = vtanh.f32 %v1350_v57  ;;  %v3741_v22 = vld [vmem:[%s3740_s4] sm:$0x1] }
0x2754   :  { %5308 = vtanh.f32 %v1351_v56  ;;  %v574_v56 = vcombine.high %v6608_v20, %v6608_v20 }
0x2756   :  { %3443 = vrot.lane.b32.xlu0 %v6588_v6, %s5390_s29  ;;  %5153 = vset.pattern.permute.xlu1 %v6876_v48  ;;  %v2086_v48 = vrot.slane %v2078_v63, %v5547_v28 }
0x2758   :  { %v2090_v26 = vadd.f32 %v2086_v48, %v6651_v29  ;;  %v588_v48 = vrot.slane %v574_v56, %v5603_v61 }
0x275a   :  { %3757 = vrot.lane.b32.xlu0 %v4099_v58, %s5387_s27  ;;  %v2817_v58 = vrot.slane %v2803_v60, %v5603_v61  ;;  %5310 = vtanh.f32 %v2090_v26 }
0x275c   :  { %v2825_v10 = vrot.slane %v2817_v58, %v5547_v28  ;;  %v596_v58 = vrot.slane %v588_v48, %v5547_v28 }
0x275e   :  { %603 = vrot.lane.b32.xlu0 %v5588_v50, %s5390_s29  ;;  %v2829_v0 = vadd.f32 %v2825_v10, %v6651_v29 }
0x2760   :  { %5312 = vtanh.f32 %v2829_v0 }
0x27c0   :  { %v3417_v16 = vpop.permute.xlu1 %3416  ;;  %v3410_v32 = vpop.permute.xlu0 %3409 }
0x27c1   :  { %v3419_v13 = vmul.f32 %v5343_v12, %v3417_v16  ;;  %v3418_v31 = vmul.f32 %v5344_v34, %v3410_v32  ;;  %v5307_v16 = vpop.eup %5306 }
0x27c2   :  { %v5309_v57 = vpop.eup %5308 }
0x27c3   :  { %v3427_v11 = vsel %vm46_vm0, %v3419_v13, 0.0  ;;  %v3420_v62 = vsel %vm46_vm0, %v3418_v31, 0.0  ;;  %v5311_v60 = vpop.eup %5310 }
0x27c4   :  { %v3428_v5 = vrot.slane %v3427_v11, 4  ;;  %v3421_v17 = vrot.slane %v3420_v62, 4  ;;  %v3725_v7 = vpop.permute.xlu0 %3724 }
0x27c5   :  { %v3727_v49 = vmul.f32 %v5303_v9, %v3725_v7  ;;  %v5313_v7 = vpop.eup %5312 }
0x27c6   :  { %v3429_v41 = vadd.f32 %v3428_v5, %v3427_v11  ;;  %v3422_v55 = vadd.f32 %v3421_v17, %v3420_v62 }
0x27c7   :  { %v3728_v12 = vsub.f32 %v3727_v49, %v6526_v30 }
0x27c8   :  { %v3430_v4 = vrot.slane %v3429_v41, 2  ;;  %v3423_v15 = vrot.slane %v3422_v55, 2  ;;  %v6656_v46 = vpop.permute.xlu0 %3443 }
0x27ca   :  { %v3431_v24 = vadd.f32 %v3430_v4, %v3429_v41  ;;  %v3424_v8 = vadd.f32 %v3423_v15, %v3422_v55  ;;  %v2071_v4 = vrot.slane %v6617_v52, %v5603_v61  ;;  %v600_v15 = vadd.f32 %v596_v58, %v6651_v29 }
0x27cc   :  { %v3432_v35 = vrot.slane %v3431_v24, 1  ;;  %v3425_v43 = vrot.slane %v3424_v8, 1  ;;  %v3758_v37 = vpop.permute.xlu0 %3757  ;;  %5314 = vtanh.f32 %v600_v15 }
0x27cd   :  { %3760 = vst.msk [vmem:[#allocation4 + $0x1] sm:$0x1] %vm129_vm4, %v3758_v37 }
0x27ce   :  { %v3433_v53 = vadd.f32 %v3432_v35, %v3431_v24  ;;  %v3426_v2 = vadd.f32 %v3425_v43, %v3424_v8  ;;  %v2082_v24 = vrot.slane %v2071_v4, %v5547_v28 }
0x27d0   :  { %v6664_v14 = vpop.permute.xlu0 %603  ;;  %v3438_v40 = vsel %vm402_vm6, %v3433_v53, %v3426_v2  ;;  %v2089_v8 = vadd.f32 %v2082_v24, %v6625_v3 }
0x27d1   :  { %v3731_v32 = vpop.permute.xlu1 %3730  ;;  %3439 = vrot.lane.b32.xlu1 %v3438_v40, %s5387_s27  ;;  %v606_v13 = vmul.f32 %v5305_v45, %v6664_v14  ;;  %v1354_v19 = vmul.f32 %v5307_v16, %v6664_v14  ;;  %v1355_v63 = vmul.f32 %v5309_v57, %v6664_v14  ;;  %v2094_v17 = vmul.f32 %v5311_v60, %v6664_v14 }
0x27d2   :  { %v3733_v34 = vmul.f32 %v3731_v32, %v3728_v12  ;;  %v2833_v41 = vmul.f32 %v5313_v7, %v6664_v14  ;;  %5316 = vtanh.f32 %v2089_v8 }
0x27d3   :  { %v608_v31 = vsel %vm46_vm0, %v606_v13, 0.0  ;;  %v1356_v62 = vsel %vm46_vm0, %v1354_v19, 0.0  ;;  %v1359_v5 = vsel %vm46_vm0, %v1355_v63, 0.0 }
0x27d4   :  { %609 = vadd.xlane.f32.xlu0 %v608_v31  ;;  %v6675_v11 = vadd.f32 %v6526_v30, %v3733_v34  ;;  %v2098_v30 = vsel %vm46_vm0, %v2094_v17, 0.0  ;;  %v2837_v55 = vsel %vm46_vm0, %v2833_v41, 0.0 }
0x27d5   :  { %3743 = vrot.lane.b32.xlu1 %v3741_v22, %s5387_s27 }
0x27d6   :  { %v5315_v26 = vpop.eup %5314 }
0x27d7   :  { %v607_v10 = vmul.f32 %v5315_v26, %v6664_v14 }
0x27d8   :  { %1357 = vadd.xlane.f32.xlu0 %v1356_v62 }
0x27d9   :  { %3762 = vrot.lane.b32.xlu1 %v6675_v11, %s5390_s29  ;;  %v611_v35 = vsel %vm46_vm0, %v607_v10, 0.0 }
0x27dc   :  { %1360 = vadd.xlane.f32.xlu0 %v1359_v5  ;;  %v5317_v52 = vpop.eup %5316 }
0x27dd   :  { %3597 = vperm.xlu1 %5153, %v6515_v21   ;;  %v2093_v43 = vmul.f32 %v5317_v52, %v6664_v14 }
0x27e0   :  { %2099 = vadd.xlane.f32.xlu0 %v2098_v30 }
0x27e1   :  { %614 = vrot.lane.b32.xlu1 %v5588_v50, %s5396_s25  ;;  %v2810_v50 = vrot.slane %v6632_v18, %v5603_v61  ;;  %v2095_v18 = vsel %vm46_vm0, %v2093_v43, 0.0 }
0x27e2   :  { %5154 = vset.pattern.permute.xlu1 %v6865_v39 }
0x27e3   :  { %v2821_v9 = vrot.slane %v2810_v50, %v5547_v28 }
0x27e4   :  { %2838 = vadd.xlane.f32.xlu0 %v2837_v55 }
0x27e5   :  { %v2828_v20 = vadd.f32 %v2821_v9, %v6625_v3 }
0x27e7   :  { %5318 = vtanh.f32 %v2828_v20 }
0x27f1   :  { %v5319_v37 = vpop.eup %5318 }
0x27f2   :  { %v2832_v49 = vmul.f32 %v5319_v37, %v6664_v14 }
0x27f4   :  { %v2834_v53 = vsel %vm46_vm0, %v2832_v49, 0.0 }
0x2805   :  { %612 = vadd.xlane.f32.xlu1 %v611_v35 }
0x2809   :  { %2096 = vadd.xlane.f32.xlu1 %v2095_v18 }
0x280d   :  { %2835 = vadd.xlane.f32.xlu1 %v2834_v53 }
0x2843   :  { %v3440_v2 = vpop.permute.xlu1 %3439 }
0x2844   :  { %v3446_v45 = vsel %vm46_vm0, %v6533_v25, %v3440_v2 }
0x2845   :  { %v3447_v0 = vsel %vm150_vm5, %v3446_v45, %v6656_v46 }
0x2846   :  { %4085 = vmatmul.mubr.msk.f32.vlgmr.msra.gmra.mrb[16].mxu1 %vm479_vm10, %v3447_v0 }
0x2847   :  { %5095 = vmatpush3.bf16.msra.mxu1 %v5645_v36  ;;  %v3744_v40 = vpop.permute.xlu1 %3743  ;;  %4718 = vmatprep.mubr.msk.f32.mxu1 %vm5386_vm3, %v6866_v1 }
0x2848   :  { %3746 = vst.msk [vmem:[#allocation4] sm:$0x1] %vm129_vm4, %v3744_v40  ;;  %5096 = vmatprep.subr.bf16.mxu1 %v6861_v44 }
0x284b   :  { %5098 = vmatpush3.bf16.msra.mxu1 %v5653_v38  ;;  %v3763_v16 = vpop.permute.xlu1 %3762 }
0x284c   :  { %3765 = vst.msk [vmem:[#allocation4] sm:$0x3] %vm680_vm9, %v3763_v16  ;;  %5099 = vmatprep.subr.bf16.mxu1 %v6861_v44 }
0x284f   :  { %5101 = vmatpush3.bf16.msra.mxu1 %v5663_v42 }
0x2850   :  { %5102 = vmatprep.subr.bf16.mxu1 %v6861_v44 }
0x2853   :  { %5104 = vmatpush3.bf16.msra.mxu1 %v5673_v47  ;;  %v3766_v38 = vld [vmem:[#allocation4] sm:$0x3]  ;;  %v6734_v47 = vld [vmem:[%s6830_s6] sm:$0x3]  ;;  %s5397_s6 = smov [#allocation7]  }
0x2854   :  { %5105 = vmatprep.subr.bf16.mxu1 %v6861_v44  ;;  %vm116_vm12 = vcmp.gt.f32.partialorder %v6734_v47, 0.5 }
0x2857   :  { %5107 = vmatpush3.bf16.msra.mxu1 %v5683_v51 }
0x2858   :  { %5108 = vmatprep.subr.bf16.mxu1 %v6861_v44 }
0x285b   :  { %5110 = vmatpush3.bf16.msra.mxu1 %v5693_v54 }
0x285c   :  { %v6728_v36 = vpop.permute.xlu1 %3597 }
0x285e   :  { %4719 = vmatmul.mubr.msk.f32.vlgmr.msra.gmra.mrb[18].mxu1 %vm479_vm10, %v3766_v38 }
0x2860   :  { %v615_v1 = vpop.permute.xlu1 %614 }
0x2861   :  { %5113 = vpush %v615_v1  ;;  %v610_v42 = vpop.xlane.xlu0 %609 }
0x2865   :  { %v1358_v25 = vpop.xlane.xlu0 %1357 }
0x2869   :  { %v1361_v46 = vpop.xlane.xlu0 %1360 }
0x286d   :  { %v2100_v32 = vpop.xlane.xlu0 %2099 }
0x2871   :  { %v2839_v60 = vpop.xlane.xlu0 %2838 }
0x2892   :  { %s5114_s26 = spop %5113  ;;  %v613_v51 = vpop.xlane.xlu1 %612 }
0x2893   :  { %v6736_v44 = vstv %s5114_s26 }
0x2894   :  { %v1362_v54 = vadd.f32 %v1358_v25, %v6736_v44  ;;  %v1363_v12 = vadd.f32 %v1361_v46, %v6736_v44  ;;  %v619_v13 = vadd.f32 %v6736_v44, %v610_v42  ;;  %v620_v34 = vadd.f32 %v6736_v44, %v613_v51 }
0x2895   :  { %v2102_v31 = vadd.f32 %v2100_v32, %v6736_v44  ;;  %v2841_v30 = vadd.f32 %v2839_v60, %v6736_v44 }
0x2896   :  { %v626_v19 = vrot.slane %v619_v13, %v5702_v59  ;;  %v1369_v22 = vrot.slane %v1362_v54, %v5702_v59  ;;  %v1373_v57 = vrot.slane %v1363_v12, %v5702_v59  ;;  %v630_v62 = vrot.slane %v620_v34, %v5702_v59  ;;  %v2097_v63 = vpop.xlane.xlu1 %2096 }
0x2897   :  { %v2101_v5 = vadd.f32 %v2097_v63, %v6736_v44  ;;  %v2112_v56 = vrot.slane %v2102_v31, %v5702_v59  ;;  %v2851_v50 = vrot.slane %v2841_v30, %v5702_v59 }
0x2898   :  { %v1374_v17 = vsel %vm402_vm6, %v1373_v57, %v1369_v22  ;;  %v631_v7 = vsel %vm402_vm6, %v630_v62, %v626_v19 }
0x2899   :  { %v1376_v41 = vsel %vm116_vm12, %v1374_v17, -1e+12  ;;  %v633_v55 = vsel %vm116_vm12, %v631_v7, -1e+12  ;;  %v2108_v48 = vrot.slane %v2101_v5, %v5702_v59 }
0x289a   :  { %634 = vst.msk [vmem:[#allocation7] sm:$0x3] %vm406_vm8, %v633_v55  ;;  %1378 = vst.msk [vmem:[#allocation7 + $0x2] sm:$0x3] %vm406_vm8, %v1376_v41  ;;  %v2836_v58 = vpop.xlane.xlu1 %2835 }
0x289b   :  { %v2113_v4 = vsel %vm402_vm6, %v2112_v56, %v2108_v48  ;;  %v2840_v15 = vadd.f32 %v2836_v58, %v6736_v44 }
0x289c   :  { %v2115_v24 = vsel %vm116_vm12, %v2113_v4, -1e+12 }
0x289d   :  { %2117 = vst.msk [vmem:[#allocation7 + $0x4] sm:$0x3] %vm406_vm8, %v2115_v24  ;;  %v2847_v8 = vrot.slane %v2840_v15, %v5702_v59 }
0x289f   :  { %v2852_v9 = vsel %vm402_vm6, %v2851_v50, %v2847_v8 }
0x28a0   :  { %v2854_v20 = vsel %vm116_vm12, %v2852_v9, -1e+12 }
0x28a1   :  { %2856 = vst.msk [vmem:[#allocation7 + $0x6] sm:$0x3] %vm406_vm8, %v2854_v20 }
0x2919   :  { %v3517_v26 = vpop.f32.mrb[16].mxu1 }
0x291a   :  { %v3518_v10 = vadd.f32 %v3517_v26, %v5932_v23  ;;  %v3519_v52 = vpop.f32.mrb[17].mxu1 }
0x291b   :  { %v3520_v35 = vadd.f32 %v3519_v52, %v6601_v27 }
0x291c   :  { %v3523_v43 = vsub.f32 0.0, %v3518_v10 }
0x291d   :  { %v3541_v37 = vrot.slane %v3520_v35, %v5603_v61 }
0x291e   :  { %v3524_v18 = vmul.f32 1.442695, %v3523_v43 }
0x291f   :  { %v3549_v49 = vrot.slane %v3541_v37, %v5603_v61  ;;  %v3542_v42 = vcombine.high %v3541_v37, %v3541_v37 }
0x2920   :  { %5320 = vpow2.f32 %v3524_v18 }
0x2921   :  { %v3560_v53 = vrot.slane %v3549_v49, %v5547_v28 }
0x2923   :  { %v3567_v2 = vadd.f32 %v3560_v53, %v6625_v3  ;;  %v3556_v3 = vrot.slane %v3542_v42, %v5603_v61 }
0x2925   :  { %5322 = vtanh.f32 %v3567_v2  ;;  %v3564_v51 = vrot.slane %v3556_v3, %v5547_v28 }
0x2927   :  { %v3568_v54 = vadd.f32 %v3564_v51, %v6651_v29 }
0x292a   :  { %v5321_v45 = vpop.eup %5320 }
0x292b   :  { %v3526_v0 = vadd.f32 1.0, %v5321_v45 }
0x292d   :  { %5324 = vrcp.f32 %v3526_v0 }
0x292f   :  { %v5323_v40 = vpop.eup %5322 }
0x2930   :  { %v3571_v23 = vmul.f32 %v5323_v40, %v6664_v14 }
0x2931   :  { %v3836_v16 = vpop.f32.mrb[18].mxu1 }
0x2932   :  { %v3837_v27 = vadd.f32 %v3836_v16, %v5735_v33  ;;  %v4720_v38 = vpop.f32.mrb[19].mxu1  ;;  %v3573_v1 = vsel %vm46_vm0, %v3571_v23, 0.0 }
0x2933   :  { %3574 = vadd.xlane.f32.xlu1 %v3573_v1 }
0x2934   :  { %v3841_v25 = vsub.f32 0.0, %v3837_v27 }
0x2936   :  { %v3842_v46 = vmul.f32 1.442695, %v3841_v25 }
0x2937   :  { %v5325_v32 = vpop.eup %5324 }
0x2938   :  { %5326 = vpow2.f32 %v3842_v46  ;;  %3530 = vrot.lane.b32.xlu0 %v5325_v32, %s5389_s21 }
0x2939   :  { %5328 = vtanh.f32 %v3568_v54 }
0x2942   :  { %v5327_v12 = vpop.eup %5326 }
0x2943   :  { %v3844_v13 = vadd.f32 1.0, %v5327_v12  ;;  %v5329_v33 = vpop.eup %5328 }
0x2944   :  { %v3572_v31 = vmul.f32 %v5329_v33, %v6664_v14 }
0x2945   :  { %5330 = vrcp.f32 %v3844_v13 }
0x2946   :  { %v3576_v19 = vsel %vm46_vm0, %v3572_v31, 0.0  ;;  %5332 = vtanh.f32 %v3518_v10 }
0x294f   :  { %v5331_v34 = vpop.eup %5330 }
0x2950   :  { %3848 = vrot.lane.b32.xlu1 %v5331_v34, %s5389_s21  ;;  %v5333_v28 = vpop.eup %5332  ;;  %s3874_s21 = sshll.u32 %s5397_s6, 4  ;;  %s3875_s21 = int_to_ptr.vmem [resolvable:$true] %s3874_s21 }
0x2951   :  { %p5362_p6 = scmp.lt.s32.totalorder %s3875_s21, %s3875_s21 }
0x2957   :  { %3577 = vadd.xlane.f32.xlu0 %v3576_v19 }
0x296d   :  { %3854 = vperm.xlu0 %5149, %v6515_v21  }
0x2971   :  { %5155 = vset.pattern.permute.xlu0 %v6865_v39 }
0x29aa   :  { %v3531_v61 = vpop.permute.xlu0 %3530 }
0x29ab   :  { %v3533_v29 = vmul.f32 %v5333_v28, %v3531_v61 }
0x29ad   :  { %v3600_v22 = vmul.f32 %v6728_v36, %v3533_v29 }
0x29af   :  { %3601 = vst.msk [vmem:[#allocation2 + $0xa] sm:$0x1] %vm54_vm1, %v3600_v22  ;;  %3603 = vrot.lane.b32.xlu1 %v3600_v22, %s5390_s29  ;;  %s5357_s29 = scalar_lea.vmem %s3875_s21, 160 }
0x29b0   :  { %3607 = vst.msk [vmem:[#allocation2 + $0x15] sm:$0x2] %vm646_vm11, %v3600_v22  ;;  %p5358_p5 = scmp.ne.s32.totalorder %s3875_s21, %s5357_s29  ;;  %p5363_p7 = scmp.lt.s32.totalorder %s5357_s29, %s5357_s29 }
0x29b2   :  { %p5364_p8 = por %p5363_p7, %p5362_p6 }
0x29b3   :  { %3861 = vperm.xlu1 %5154, %v6515_v21  }
0x29b4   :  { %p5365_p9 = pnand %p5364_p8, %p5358_p5 }
0x29c0   :  { %v3575_v14 = vpop.xlane.xlu1 %3574 }
0x29c1   :  { %v3579_v57 = vadd.f32 %v3575_v14, %v6736_v44 }
0x29c3   :  { %v3586_v63 = vrot.slane %v3579_v57, %v5702_v59 }
0x29e4   :  { %v3578_v62 = vpop.xlane.xlu0 %3577 }
0x29e5   :  { %v3580_v39 = vadd.f32 %v3578_v62, %v6736_v44 }
0x29e7   :  { %v3590_v60 = vrot.slane %v3580_v39, %v5702_v59 }
0x29e9   :  { %v3591_v5 = vsel %vm402_vm6, %v3590_v60, %v3586_v63 }
0x29ea   :  { %v3593_v17 = vsel %vm116_vm12, %v3591_v5, -1e+12 }
0x29eb   :  { %3595 = vst.msk [vmem:[#allocation7 + $0x8] sm:$0x3] %vm406_vm8, %v3593_v17 }
0x29ec   :  { %5368 = shalt.err (!%p5365_p9)
}
0x29ed   :  { %s5369_s14 = scalar_lea.hbm %s6836_s12, 160 }
0x29ee   :  { %p5370_p10 = scmp.ne.s32.totalorder %s6836_s12, %s5369_s14  ;;  %p5373_p11 = scmp.lt.u32.totalorder %s5369_s14, %s6836_s12 }
0x29f0   :  { %p5375_p12 = pnand %p5373_p11, %p5370_p10 }
0x29f2   :  { %5378 = shalt.err (!%p5375_p12)
}
0x29f3   :  { %s5398_s1 = smov 2   ;;  %5334 = vtanh.f32 %v3837_v27  ;;  %v3849_v59 = vpop.permute.xlu1 %3848  ;;  %v3855_v7 = vpop.permute.xlu0 %3854 }
0x29f4   :  { %3880 = dma.vmem_to_hbm [thread:$0]  %s3875_s21, 160, %s6836_s12, [#allocation8], %s5387_s27, %s5387_s27, %s5398_s1  }
0x29fd   :  { %v5335_v47 = vpop.eup %5334 }
0x29fe   :  { %v3851_v44 = vmul.f32 %v5335_v47, %v3849_v59 }
0x2a00   :  { %v3852_v30 = vsub.f32 %v3851_v44, %v6675_v11 }
0x2a02   :  { %v3857_v41 = vmul.f32 %v3855_v7, %v3852_v30 }
0x2a04   :  { %v3858_v55 = vadd.f32 %v3857_v41, %v6675_v11 }
0x2a06   :  { %v3859_v56 = vsub.f32 %v6588_v6, %v3858_v55 }
0x2a21   :  { %v3604_v21 = vpop.permute.xlu1 %3603 }
0x2a22   :  { %3606 = vst.msk [vmem:[#allocation2 + $0xb] sm:$0x1] %vm54_vm1, %v3604_v21 }
0x2a23   :  { %3608 = vst.msk [vmem:[#allocation2 + $0x16] sm:$0x2] %vm646_vm11, %v3604_v21 }
0x2a32   :  { %v3862_v48 = vpop.permute.xlu1 %3861 }
0x2a33   :  { %v3864_v58 = vmul.f32 %v3862_v48, %v3859_v56 }
0x2a35   :  { %v3865_v4 = vadd.f32 %v3864_v58, %v3858_v55 }
0x2a37   :  { %v3866_v15 = vmul.f32 %v3865_v4, %v6728_v36 }
0x2a39   :  { %3867 = vst.msk [vmem:[#allocation3 + $0x5] sm:$0x1] %vm54_vm1, %v3866_v15 }
0x2a3a   :  { %3868 = vst.msk [vmem:[#allocation3 + $0xa] sm:$0x2] %vm646_vm11, %v3866_v15 }
0x2a3b   :  { %5381 = dma.done.wait [#allocation8], 160  }
0x2a3c   :  { %5382 = vsyncadd [#allocation8], 4294967136 }
0x2a3d   :  { %3884 = vsyncpa [#allocation8], 1 }

</bundles_post_ra>
